<compile_context>
chip_gen: v6e
topology: v6e:2x2x1
jax: 0.10.0
libtpu: 0.0.40
codegen_flags: <defaults>
</compile_context>

<pallas_src>
import math

import jax
import jax.numpy as jnp
from jax.experimental import pallas as pl
from jax.experimental.pallas import tpu as pltpu


# --------------------------- in-kernel building blocks ---------------------------- #

def _conv_relu(a, wm, brow, pad_ref, patch_ref, H, W, Cin, K):
    """'same' KxK conv (stride 1) + bias + ReLU on one lane-packed image.

    a:     (H, W*Cin) f32 value, lanes pack (w, cin)
    wm:    (K*K*W*Cin, W*Cout) packed im2col weight matrix
    brow:  (1, W*Cout) bias tiled over w
    pad_ref, patch_ref: shared VMEM scratch (max-sized over all convs)
    returns (H, W*Cout) f32 value, lanes pack (w, cout)
    """
    p = (K - 1) // 2
    Hp = H + 2 * p
    WC = W * Cin
    WpC = (W + 2 * p) * Cin

    # In-VMEM 'same' zero padding: memset the used region, then write the interior.
    pad_ref[0:Hp, 0:WpC] = jnp.zeros((Hp, WpC), jnp.float32)
    pad_ref[p:p + H, p * Cin:(p + W) * Cin] = a

    # im2col: pack the K*K shifted windows side by side (lane-dense) in VMEM.
    for kh in range(K):
        for kw in range(K):
            t = kh * K + kw
            patch_ref[0:H, t * WC:(t + 1) * WC] = \
                pad_ref[kh:kh + H, kw * Cin:kw * Cin + WC]

    patch = patch_ref[0:H, 0:K * K * WC]                  # (H, K*K*W*Cin)
    out = jnp.dot(patch, wm, preferred_element_type=jnp.float32) + brow
    return jnp.maximum(out, 0.0)                          # ReLU


def _maxpool2x2(a, sel_w, sel_h, W, C):
    """2x2 / stride-2 max pool on a lane-packed image (even H and W).

    a:     (H, W*C) f32, lanes pack (w, c)
    sel_w: ((W-1)*C, (W//2)*C) 0/1 matrix selecting even-w pair maxima
    sel_h: (H//2, H-1)         0/1 matrix selecting even-h pair maxima
    returns (H//2, (W//2)*C)
    """
    H = a.shape[0]
    # pool along w: pairwise max of neighbouring w, then gather even w via 0/1 matmul
    pw = jnp.maximum(a[:, :(W - 1) * C], a[:, C:])        # (H, (W-1)*C)
    aw = jnp.dot(pw, sel_w, preferred_element_type=jnp.float32)   # (H, Wo*C)
    # pool along h: pairwise max of neighbouring rows, then gather even rows
    ph = jnp.maximum(aw[:H - 1, :], aw[1:, :])            # (H-1, Wo*C)
    return jnp.dot(sel_h, ph, preferred_element_type=jnp.float32)  # (Ho, Wo*C)


def _make_stem_kernel(layout):
    """Build the fused StemBlock kernel for a static op layout.

    layout: list of ops, each either
       ("conv", H, W, Cin, Cout, K)  -> consumes 2 params (wm, brow)
       ("pool", H, W, C)             -> consumes 2 params (sel_w, sel_h)
    """
    n_params = 2 * len(layout)

    def kernel(x_ref, *refs):
        param_refs = refs[:n_params]
        o_ref = refs[n_params]
        pad_ref = refs[n_params + 1]
        patch_ref = refs[n_params + 2]

        a = x_ref[0]                                      # (H, W*Cin) lane-packed
        pi = 0
        for op in layout:                                 # unrolled at trace time
            if op[0] == "conv":
                _, H, W, Cin, Cout, K = op
                wm = param_refs[pi][...]
                brow = param_refs[pi + 1][...]
                pi += 2
                a = _conv_relu(a, wm, brow, pad_ref, patch_ref, H, W, Cin, K)
            else:
                _, H, W, C = op
                sel_w = param_refs[pi][...]
                sel_h = param_refs[pi + 1][...]
                pi += 2
                a = _maxpool2x2(a, sel_w, sel_h, W, C)
        o_ref[0] = a

    return kernel, n_params


# ------------------------------ parameter packing --------------------------------- #

def _pack_conv(wgt, b, W):
    """Pack HWIO weights into the lane-packed im2col weight matrix (done once)."""
    K, _, Cin, Cout = wgt.shape
    eye = jnp.eye(W, dtype=jnp.float32)
    # (K, K, W, Cin, W, Cout): block-diagonal over w with the (Cin, Cout) tap matrix
    wm = (wgt.astype(jnp.float32)[:, :, None, :, None, :]
          * eye[None, None, :, None, :, None])
    wm = wm.reshape(K * K * W * Cin, W * Cout)
    brow = jnp.tile(b.astype(jnp.float32), W).reshape(1, W * Cout)
    return wm, brow


def _pool_selectors(H, W, C):
    """Exact 0/1 selection matrices used by the in-kernel 2x2 max pool."""
    assert H % 2 == 0 and W % 2 == 0, "pooling stage requires even spatial dims"
    Ho, Wo = H // 2, W // 2
    r = jnp.arange((W - 1) * C)[:, None]
    q = jnp.arange(Wo * C)[None, :]
    sel_w = (r == q + (q // C) * C).astype(jnp.float32)   # ((W-1)*C, Wo*C)
    rr = jnp.arange(Ho)[:, None]
    cc = jnp.arange(H - 1)[None, :]
    sel_h = (cc == 2 * rr).astype(jnp.float32)            # (Ho, H-1)
    return [sel_w, sel_h]


def pack_stem_params(params, H, W, kernel_size):
    """Flatten + pre-pack all StemBlock parameters (called once, outside forward)."""
    K = kernel_size
    packed, layout = [], []
    h, w = H, W
    c = params[0][0][0].shape[2]                          # in_channels
    for bi, block in enumerate(params):
        if bi > 0:                                        # pool=block>0, pool_before_convs
            packed += _pool_selectors(h, w, c)
            layout.append(("pool", h, w, c))
            h, w = h // 2, w // 2
        for (wgt, b) in block:                            # conv -> ReLU (no batch norm)
            cin, cout = wgt.shape[2], wgt.shape[3]
            wm, brow = _pack_conv(wgt, b, w)
            packed += [wm, brow]
            layout.append(("conv", h, w, cin, cout, K))
            c = cout
    packed += _pool_selectors(h, w, c)                    # final '_last_pool'
    layout.append(("pool", h, w, c))
    h, w = h // 2, w // 2
    return packed, layout, (h, w, c)


# --------------------------------- forward pass ------------------------------------ #

def stem_block_forward(x_nchw, packed, layout, out_hwc):
    """StemBlock.forward. Input/output are NCHW (PyTorch convention)."""
    N, Cin, H, W = x_nchw.shape
    # NCHW -> lane-packed (N, H, W*Cin), channels fastest on the lane dim.
    x = jnp.transpose(x_nchw, (0, 2, 3, 1)).astype(jnp.float32).reshape(N, H, W * Cin)
    Ho, Wo, Co = out_hwc

    kernel, n_params = _make_stem_kernel(layout)
    assert n_params == len(packed)

    # Shared VMEM scratch, max-sized over all convs (padded image + im2col patch).
    convs = [op for op in layout if op[0] == "conv"]
    pad_rows = max(op[1] + op[5] - 1 for op in convs)               # H + 2p
    pad_lanes = max((op[2] + op[5] - 1) * op[3] for op in convs)    # (W + 2p) * Cin
    patch_rows = max(op[1] for op in convs)                         # H
    patch_lanes = max(op[5] * op[5] * op[2] * op[3] for op in convs)  # K*K*W*Cin

    in_specs = [pl.BlockSpec((1, H, W * Cin), lambda n: (n, 0, 0))]
    for arr in packed:                                    # all packed params are 2-D
        in_specs.append(pl.BlockSpec(arr.shape, lambda n: (0, 0)))

    out = pl.pallas_call(
        kernel,
        out_shape=jax.ShapeDtypeStruct((N, Ho, Wo * Co), jnp.float32),
        grid=(N,),                                        # one image per grid step
        in_specs=in_specs,
        out_specs=pl.BlockSpec((1, Ho, Wo * Co), lambda n: (n, 0, 0)),
        scratch_shapes=[
            pltpu.VMEM((pad_rows, pad_lanes), jnp.float32),
            pltpu.VMEM((patch_rows, patch_lanes), jnp.float32),
        ],
        compiler_params=pltpu.CompilerParams(
            dimension_semantics=("parallel",)),           # v7x: one image per TensorCore
    )(x, *packed)

    out = out.reshape(N, Ho, Wo, Co)
    return jnp.transpose(out, (0, 3, 1, 2))               # -> NCHW


# ------------------------------ init & pure-JAX reference -------------------------- #

def init_stem_params(key, in_channels, filters, stem_blocks, filters_rate,
                     convs_per_block, kernel_size):
    """Deterministic PyTorch-Conv2d-style uniform init (HWIO weights, f32)."""
    params = []
    c_in = in_channels
    for block in range(stem_blocks):
        block_filters = int(filters * filters_rate ** block)
        block_params = []
        for i in range(convs_per_block):
            key, kw_, kb_ = jax.random.split(key, 3)
            cin = c_in if i == 0 else block_filters
            bound = 1.0 / math.sqrt(cin * kernel_size * kernel_size)
            w = jax.random.uniform(
                kw_, (kernel_size, kernel_size, cin, block_filters),
                jnp.float32, -bound, bound)
            b = jax.random.uniform(kb_, (block_filters,), jnp.float32, -bound, bound)
            block_params.append((w, b))
        params.append(block_params)
        c_in = block_filters
    return params


def stem_block_reference(x_nchw, params):
    """Pure-JAX reference (lax conv / reduce_window) for correctness checking."""
    x = jnp.transpose(x_nchw, (0, 2, 3, 1)).astype(jnp.float32)

    def pool(v):
        return jax.lax.reduce_window(v, -jnp.inf, jax.lax.max,
                                     (1, 2, 2, 1), (1, 2, 2, 1), "SAME")

    for bi, block in enumerate(params):
        if bi > 0:
            x = pool(x)
        for (w, b) in block:
            y = jax.lax.conv_general_dilated(
                x, w, window_strides=(1, 1), padding="SAME",
                dimension_numbers=("NHWC", "HWIO", "NHWC"))
            x = jax.nn.relu(y + b)
    x = pool(x)
    return jnp.transpose(x, (0, 3, 1, 2))


# -------------------------------------- main --------------------------------------- #

if __name__ == "__main__":
    in_channels = 3
    filters = 8
    stem_blocks = 2          # PyTorch default 0 would crash StemBlock.__init__
    filters_rate = 2
    convs_per_block = 2
    kernel_size = 3
    N, H, W = 2, 16, 16

    key = jax.random.PRNGKey(0)
    kx, kp = jax.random.split(key)
    x = jax.random.normal(kx, (N, in_channels, H, W), jnp.float32)   # NCHW

    params = init_stem_params(kp, in_channels, filters, stem_blocks,
                              filters_rate, convs_per_block, kernel_size)
    packed, layout, out_hwc = pack_stem_params(params, H, W, kernel_size)

    out = stem_block_forward(x, packed, layout, out_hwc)
    out = jax.block_until_ready(out)

    # shape: two stem blocks (one pool) + final pool -> 16 / 2 / 2 = 4
    expected_shape = (N, int(filters * filters_rate ** (stem_blocks - 1)),
                      H // 4, W // 4)
    assert out.shape == expected_shape, (out.shape, expected_shape)

    ref = stem_block_reference(x, params)
    max_err = float(jnp.max(jnp.abs(out - ref)))
    assert jnp.allclose(out, ref, rtol=1e-3, atol=1e-3), max_err

    print("KERNEL_OK")
</pallas_src>

<mosaic_0001>
module attributes {stable_mosaic.version = 11 : i64} {
  func.func @kernel(%arg0: i32, %arg1: memref<1x16x48xf32, #tpu.memory_space<vmem>>, %arg2: memref<432x128xf32, #tpu.memory_space<vmem>>, %arg3: memref<1x128xf32, #tpu.memory_space<vmem>>, %arg4: memref<1152x128xf32, #tpu.memory_space<vmem>>, %arg5: memref<1x128xf32, #tpu.memory_space<vmem>>, %arg6: memref<120x64xf32, #tpu.memory_space<vmem>>, %arg7: memref<8x15xf32, #tpu.memory_space<vmem>>, %arg8: memref<576x128xf32, #tpu.memory_space<vmem>>, %arg9: memref<1x128xf32, #tpu.memory_space<vmem>>, %arg10: memref<1152x128xf32, #tpu.memory_space<vmem>>, %arg11: memref<1x128xf32, #tpu.memory_space<vmem>>, %arg12: memref<112x64xf32, #tpu.memory_space<vmem>>, %arg13: memref<4x7xf32, #tpu.memory_space<vmem>>, %arg14: memref<1x4x64xf32, #tpu.memory_space<vmem>>, %arg15: memref<18x160xf32, #tpu.memory_space<vmem>>, %arg16: memref<16x1152xf32, #tpu.memory_space<vmem>>) attributes {dimension_semantics = [#tpu.dimension_semantics<parallel>], iteration_bounds = array<i64: 2>, scalar_prefetch = 0 : i64, scratch_operands = 2 : i64, tpu.core_type = #tpu.core_type<tc>, window_params = [{transform_indices = @transform_0, window_bounds = array<i64: 1, 16, 48>}, {pipeline_mode = #tpu.pipeline_mode<synchronous>, transform_indices = @transform_1, window_bounds = array<i64: 432, 128>}, {pipeline_mode = #tpu.pipeline_mode<synchronous>, transform_indices = @transform_2, window_bounds = array<i64: 1, 128>}, {pipeline_mode = #tpu.pipeline_mode<synchronous>, transform_indices = @transform_3, window_bounds = array<i64: 1152, 128>}, {pipeline_mode = #tpu.pipeline_mode<synchronous>, transform_indices = @transform_4, window_bounds = array<i64: 1, 128>}, {pipeline_mode = #tpu.pipeline_mode<synchronous>, transform_indices = @transform_5, window_bounds = array<i64: 120, 64>}, {pipeline_mode = #tpu.pipeline_mode<synchronous>, transform_indices = @transform_6, window_bounds = array<i64: 8, 15>}, {pipeline_mode = #tpu.pipeline_mode<synchronous>, transform_indices = @transform_7, window_bounds = array<i64: 576, 128>}, {pipeline_mode = #tpu.pipeline_mode<synchronous>, transform_indices = @transform_8, window_bounds = array<i64: 1, 128>}, {pipeline_mode = #tpu.pipeline_mode<synchronous>, transform_indices = @transform_9, window_bounds = array<i64: 1152, 128>}, {pipeline_mode = #tpu.pipeline_mode<synchronous>, transform_indices = @transform_10, window_bounds = array<i64: 1, 128>}, {pipeline_mode = #tpu.pipeline_mode<synchronous>, transform_indices = @transform_11, window_bounds = array<i64: 112, 64>}, {pipeline_mode = #tpu.pipeline_mode<synchronous>, transform_indices = @transform_12, window_bounds = array<i64: 4, 7>}, {transform_indices = @transform_13, window_bounds = array<i64: 1, 4, 64>}]} {
    %c0 = arith.constant 0 : index
    %c0_0 = arith.constant 0 : index
    %c0_1 = arith.constant 0 : index
    %0 = vector.load %arg1[%c0, %c0_0, %c0_1] : memref<1x16x48xf32, #tpu.memory_space<vmem>>, vector<1x16x48xf32>
    %1 = vector.shape_cast %0 : vector<1x16x48xf32> to vector<16x48xf32>
    %c0_2 = arith.constant 0 : index
    %c0_3 = arith.constant 0 : index
    %2 = vector.load %arg2[%c0_2, %c0_3] : memref<432x128xf32, #tpu.memory_space<vmem>>, vector<432x128xf32>
    %c0_4 = arith.constant 0 : index
    %c0_5 = arith.constant 0 : index
    %3 = vector.load %arg3[%c0_4, %c0_5] : memref<1x128xf32, #tpu.memory_space<vmem>>, vector<1x128xf32>
    %cst = arith.constant 0.000000e+00 : f32
    %4 = vector.broadcast %cst : f32 to vector<18x54xf32>
    %c0_6 = arith.constant 0 : index
    %c0_7 = arith.constant 0 : index
    %5 = vector.load %arg15[%c0_6, %c0_7] : memref<18x160xf32, #tpu.memory_space<vmem>>, vector<18x54xf32>
    tpu.vector_store %arg15[%c0_6, %c0_7], %4 {strides = array<i32>} : memref<18x160xf32, #tpu.memory_space<vmem>>, vector<18x54xf32>,
    %c1 = arith.constant 1 : index
    %c3 = arith.constant 3 : index
    %6 = vector.load %arg15[%c1, %c3] : memref<18x160xf32, #tpu.memory_space<vmem>>, vector<16x48xf32>
    tpu.vector_store %arg15[%c1, %c3], %1 {strides = array<i32>} : memref<18x160xf32, #tpu.memory_space<vmem>>, vector<16x48xf32>,
    %c0_8 = arith.constant 0 : index
    %c0_9 = arith.constant 0 : index
    %7 = vector.load %arg15[%c0_8, %c0_9] : memref<18x160xf32, #tpu.memory_space<vmem>>, vector<16x48xf32>
    %c0_10 = arith.constant 0 : index
    %c0_11 = arith.constant 0 : index
    %8 = vector.load %arg16[%c0_10, %c0_11] : memref<16x1152xf32, #tpu.memory_space<vmem>>, vector<16x48xf32>
    tpu.vector_store %arg16[%c0_10, %c0_11], %7 {strides = array<i32>} : memref<16x1152xf32, #tpu.memory_space<vmem>>, vector<16x48xf32>,
    %c0_12 = arith.constant 0 : index
    %c3_13 = arith.constant 3 : index
    %9 = vector.load %arg15[%c0_12, %c3_13] : memref<18x160xf32, #tpu.memory_space<vmem>>, vector<16x48xf32>
    %c0_14 = arith.constant 0 : index
    %c48 = arith.constant 48 : index
    %10 = vector.load %arg16[%c0_14, %c48] : memref<16x1152xf32, #tpu.memory_space<vmem>>, vector<16x48xf32>
    tpu.vector_store %arg16[%c0_14, %c48], %9 {strides = array<i32>} : memref<16x1152xf32, #tpu.memory_space<vmem>>, vector<16x48xf32>,
    %c0_15 = arith.constant 0 : index
    %c6 = arith.constant 6 : index
    %11 = vector.load %arg15[%c0_15, %c6] : memref<18x160xf32, #tpu.memory_space<vmem>>, vector<16x48xf32>
    %c0_16 = arith.constant 0 : index
    %c96 = arith.constant 96 : index
    %12 = vector.load %arg16[%c0_16, %c96] : memref<16x1152xf32, #tpu.memory_space<vmem>>, vector<16x48xf32>
    tpu.vector_store %arg16[%c0_16, %c96], %11 {strides = array<i32>} : memref<16x1152xf32, #tpu.memory_space<vmem>>, vector<16x48xf32>,
    %c1_17 = arith.constant 1 : index
    %c0_18 = arith.constant 0 : index
    %13 = vector.load %arg15[%c1_17, %c0_18] : memref<18x160xf32, #tpu.memory_space<vmem>>, vector<16x48xf32>
    %c0_19 = arith.constant 0 : index
    %c144 = arith.constant 144 : index
    %14 = vector.load %arg16[%c0_19, %c144] : memref<16x1152xf32, #tpu.memory_space<vmem>>, vector<16x48xf32>
    tpu.vector_store %arg16[%c0_19, %c144], %13 {strides = array<i32>} : memref<16x1152xf32, #tpu.memory_space<vmem>>, vector<16x48xf32>,
    %c1_20 = arith.constant 1 : index
    %c3_21 = arith.constant 3 : index
    %15 = vector.load %arg15[%c1_20, %c3_21] : memref<18x160xf32, #tpu.memory_space<vmem>>, vector<16x48xf32>
    %c0_22 = arith.constant 0 : index
    %c192 = arith.constant 192 : index
    %16 = vector.load %arg16[%c0_22, %c192] : memref<16x1152xf32, #tpu.memory_space<vmem>>, vector<16x48xf32>
    tpu.vector_store %arg16[%c0_22, %c192], %15 {strides = array<i32>} : memref<16x1152xf32, #tpu.memory_space<vmem>>, vector<16x48xf32>,
    %c1_23 = arith.constant 1 : index
    %c6_24 = arith.constant 6 : index
    %17 = vector.load %arg15[%c1_23, %c6_24] : memref<18x160xf32, #tpu.memory_space<vmem>>, vector<16x48xf32>
    %c0_25 = arith.constant 0 : index
    %c240 = arith.constant 240 : index
    %18 = vector.load %arg16[%c0_25, %c240] : memref<16x1152xf32, #tpu.memory_space<vmem>>, vector<16x48xf32>
    tpu.vector_store %arg16[%c0_25, %c240], %17 {strides = array<i32>} : memref<16x1152xf32, #tpu.memory_space<vmem>>, vector<16x48xf32>,
    %c2 = arith.constant 2 : index
    %c0_26 = arith.constant 0 : index
    %19 = vector.load %arg15[%c2, %c0_26] : memref<18x160xf32, #tpu.memory_space<vmem>>, vector<16x48xf32>
    %c0_27 = arith.constant 0 : index
    %c288 = arith.constant 288 : index
    %20 = vector.load %arg16[%c0_27, %c288] : memref<16x1152xf32, #tpu.memory_space<vmem>>, vector<16x48xf32>
    tpu.vector_store %arg16[%c0_27, %c288], %19 {strides = array<i32>} : memref<16x1152xf32, #tpu.memory_space<vmem>>, vector<16x48xf32>,
    %c2_28 = arith.constant 2 : index
    %c3_29 = arith.constant 3 : index
    %21 = vector.load %arg15[%c2_28, %c3_29] : memref<18x160xf32, #tpu.memory_space<vmem>>, vector<16x48xf32>
    %c0_30 = arith.constant 0 : index
    %c336 = arith.constant 336 : index
    %22 = vector.load %arg16[%c0_30, %c336] : memref<16x1152xf32, #tpu.memory_space<vmem>>, vector<16x48xf32>
    tpu.vector_store %arg16[%c0_30, %c336], %21 {strides = array<i32>} : memref<16x1152xf32, #tpu.memory_space<vmem>>, vector<16x48xf32>,
    %c2_31 = arith.constant 2 : index
    %c6_32 = arith.constant 6 : index
    %23 = vector.load %arg15[%c2_31, %c6_32] : memref<18x160xf32, #tpu.memory_space<vmem>>, vector<16x48xf32>
    %c0_33 = arith.constant 0 : index
    %c384 = arith.constant 384 : index
    %24 = vector.load %arg16[%c0_33, %c384] : memref<16x1152xf32, #tpu.memory_space<vmem>>, vector<16x48xf32>
    tpu.vector_store %arg16[%c0_33, %c384], %23 {strides = array<i32>} : memref<16x1152xf32, #tpu.memory_space<vmem>>, vector<16x48xf32>,
    %c0_34 = arith.constant 0 : index
    %c0_35 = arith.constant 0 : index
    %25 = vector.load %arg16[%c0_34, %c0_35] : memref<16x1152xf32, #tpu.memory_space<vmem>>, vector<16x432xf32>
    %cst_36 = arith.constant dense<0.000000e+00> : vector<16x128xf32>
    %26 = tpu.matmul %25, %2, %cst_36 {dimension_numbers = #tpu.dot_dimension_numbers<[1], [0], [0], [1], [0, 0, 1, 1], [], []>} : vector<16x432xf32>, vector<432x128xf32>, vector<16x128xf32> -> vector<16x128xf32>
    %27 = vector.broadcast %3 : vector<1x128xf32> to vector<16x128xf32>
    %28 = arith.addf %26, %27 : vector<16x128xf32>
    %cst_37 = arith.constant 0.000000e+00 : f32
    %29 = vector.broadcast %cst_37 : f32 to vector<16x128xf32>
    %30 = arith.maximumf %28, %29 : vector<16x128xf32>
    %c0_38 = arith.constant 0 : index
    %c0_39 = arith.constant 0 : index
    %31 = vector.load %arg4[%c0_38, %c0_39] : memref<1152x128xf32, #tpu.memory_space<vmem>>, vector<1152x128xf32>
    %c0_40 = arith.constant 0 : index
    %c0_41 = arith.constant 0 : index
    %32 = vector.load %arg5[%c0_40, %c0_41] : memref<1x128xf32, #tpu.memory_space<vmem>>, vector<1x128xf32>
    %cst_42 = arith.constant 0.000000e+00 : f32
    %33 = vector.broadcast %cst_42 : f32 to vector<18x144xf32>
    %c0_43 = arith.constant 0 : index
    %c0_44 = arith.constant 0 : index
    %34 = vector.load %arg15[%c0_43, %c0_44] : memref<18x160xf32, #tpu.memory_space<vmem>>, vector<18x144xf32>
    tpu.vector_store %arg15[%c0_43, %c0_44], %33 {strides = array<i32>} : memref<18x160xf32, #tpu.memory_space<vmem>>, vector<18x144xf32>,
    %c1_45 = arith.constant 1 : index
    %c8 = arith.constant 8 : index
    %35 = vector.load %arg15[%c1_45, %c8] : memref<18x160xf32, #tpu.memory_space<vmem>>, vector<16x128xf32>
    tpu.vector_store %arg15[%c1_45, %c8], %30 {strides = array<i32>} : memref<18x160xf32, #tpu.memory_space<vmem>>, vector<16x128xf32>,
    %c0_46 = arith.constant 0 : index
    %c0_47 = arith.constant 0 : index
    %36 = vector.load %arg15[%c0_46, %c0_47] : memref<18x160xf32, #tpu.memory_space<vmem>>, vector<16x128xf32>
    %c0_48 = arith.constant 0 : index
    %c0_49 = arith.constant 0 : index
    %37 = vector.load %arg16[%c0_48, %c0_49] : memref<16x1152xf32, #tpu.memory_space<vmem>>, vector<16x128xf32>
    tpu.vector_store %arg16[%c0_48, %c0_49], %36 {strides = array<i32>} : memref<16x1152xf32, #tpu.memory_space<vmem>>, vector<16x128xf32>,
    %c0_50 = arith.constant 0 : index
    %c8_51 = arith.constant 8 : index
    %38 = vector.load %arg15[%c0_50, %c8_51] : memref<18x160xf32, #tpu.memory_space<vmem>>, vector<16x128xf32>
    %c0_52 = arith.constant 0 : index
    %c128 = arith.constant 128 : index
    %39 = vector.load %arg16[%c0_52, %c128] : memref<16x1152xf32, #tpu.memory_space<vmem>>, vector<16x128xf32>
    tpu.vector_store %arg16[%c0_52, %c128], %38 {strides = array<i32>} : memref<16x1152xf32, #tpu.memory_space<vmem>>, vector<16x128xf32>,
    %c0_53 = arith.constant 0 : index
    %c16 = arith.constant 16 : index
    %40 = vector.load %arg15[%c0_53, %c16] : memref<18x160xf32, #tpu.memory_space<vmem>>, vector<16x128xf32>
    %c0_54 = arith.constant 0 : index
    %c256 = arith.constant 256 : index
    %41 = vector.load %arg16[%c0_54, %c256] : memref<16x1152xf32, #tpu.memory_space<vmem>>, vector<16x128xf32>
    tpu.vector_store %arg16[%c0_54, %c256], %40 {strides = array<i32>} : memref<16x1152xf32, #tpu.memory_space<vmem>>, vector<16x128xf32>,
    %c1_55 = arith.constant 1 : index
    %c0_56 = arith.constant 0 : index
    %42 = vector.load %arg15[%c1_55, %c0_56] : memref<18x160xf32, #tpu.memory_space<vmem>>, vector<16x128xf32>
    %c0_57 = arith.constant 0 : index
    %c384_58 = arith.constant 384 : index
    %43 = vector.load %arg16[%c0_57, %c384_58] : memref<16x1152xf32, #tpu.memory_space<vmem>>, vector<16x128xf32>
    tpu.vector_store %arg16[%c0_57, %c384_58], %42 {strides = array<i32>} : memref<16x1152xf32, #tpu.memory_space<vmem>>, vector<16x128xf32>,
    %c1_59 = arith.constant 1 : index
    %c8_60 = arith.constant 8 : index
    %44 = vector.load %arg15[%c1_59, %c8_60] : memref<18x160xf32, #tpu.memory_space<vmem>>, vector<16x128xf32>
    %c0_61 = arith.constant 0 : index
    %c512 = arith.constant 512 : index
    %45 = vector.load %arg16[%c0_61, %c512] : memref<16x1152xf32, #tpu.memory_space<vmem>>, vector<16x128xf32>
    tpu.vector_store %arg16[%c0_61, %c512], %44 {strides = array<i32>} : memref<16x1152xf32, #tpu.memory_space<vmem>>, vector<16x128xf32>,
    %c1_62 = arith.constant 1 : index
    %c16_63 = arith.constant 16 : index
    %46 = vector.load %arg15[%c1_62, %c16_63] : memref<18x160xf32, #tpu.memory_space<vmem>>, vector<16x128xf32>
    %c0_64 = arith.constant 0 : index
    %c640 = arith.constant 640 : index
    %47 = vector.load %arg16[%c0_64, %c640] : memref<16x1152xf32, #tpu.memory_space<vmem>>, vector<16x128xf32>
    tpu.vector_store %arg16[%c0_64, %c640], %46 {strides = array<i32>} : memref<16x1152xf32, #tpu.memory_space<vmem>>, vector<16x128xf32>,
    %c2_65 = arith.constant 2 : index
    %c0_66 = arith.constant 0 : index
    %48 = vector.load %arg15[%c2_65, %c0_66] : memref<18x160xf32, #tpu.memory_space<vmem>>, vector<16x128xf32>
    %c0_67 = arith.constant 0 : index
    %c768 = arith.constant 768 : index
    %49 = vector.load %arg16[%c0_67, %c768] : memref<16x1152xf32, #tpu.memory_space<vmem>>, vector<16x128xf32>
    tpu.vector_store %arg16[%c0_67, %c768], %48 {strides = array<i32>} : memref<16x1152xf32, #tpu.memory_space<vmem>>, vector<16x128xf32>,
    %c2_68 = arith.constant 2 : index
    %c8_69 = arith.constant 8 : index
    %50 = vector.load %arg15[%c2_68, %c8_69] : memref<18x160xf32, #tpu.memory_space<vmem>>, vector<16x128xf32>
    %c0_70 = arith.constant 0 : index
    %c896 = arith.constant 896 : index
    %51 = vector.load %arg16[%c0_70, %c896] : memref<16x1152xf32, #tpu.memory_space<vmem>>, vector<16x128xf32>
    tpu.vector_store %arg16[%c0_70, %c896], %50 {strides = array<i32>} : memref<16x1152xf32, #tpu.memory_space<vmem>>, vector<16x128xf32>,
    %c2_71 = arith.constant 2 : index
    %c16_72 = arith.constant 16 : index
    %52 = vector.load %arg15[%c2_71, %c16_72] : memref<18x160xf32, #tpu.memory_space<vmem>>, vector<16x128xf32>
    %c0_73 = arith.constant 0 : index
    %c1024 = arith.constant 1024 : index
    %53 = vector.load %arg16[%c0_73, %c1024] : memref<16x1152xf32, #tpu.memory_space<vmem>>, vector<16x128xf32>
    tpu.vector_store %arg16[%c0_73, %c1024], %52 {strides = array<i32>} : memref<16x1152xf32, #tpu.memory_space<vmem>>, vector<16x128xf32>,
    %c0_74 = arith.constant 0 : index
    %c0_75 = arith.constant 0 : index
    %54 = vector.load %arg16[%c0_74, %c0_75] : memref<16x1152xf32, #tpu.memory_space<vmem>>, vector<16x1152xf32>
    %cst_76 = arith.constant dense<0.000000e+00> : vector<16x128xf32>
    %55 = tpu.matmul %54, %31, %cst_76 {dimension_numbers = #tpu.dot_dimension_numbers<[1], [0], [0], [1], [0, 0, 1, 1], [], []>} : vector<16x1152xf32>, vector<1152x128xf32>, vector<16x128xf32> -> vector<16x128xf32>
    %56 = vector.broadcast %32 : vector<1x128xf32> to vector<16x128xf32>
    %57 = arith.addf %55, %56 : vector<16x128xf32>
    %cst_77 = arith.constant 0.000000e+00 : f32
    %58 = vector.broadcast %cst_77 : f32 to vector<16x128xf32>
    %59 = arith.maximumf %57, %58 : vector<16x128xf32>
    %c0_78 = arith.constant 0 : index
    %c0_79 = arith.constant 0 : index
    %60 = vector.load %arg6[%c0_78, %c0_79] : memref<120x64xf32, #tpu.memory_space<vmem>>, vector<120x64xf32>
    %c0_80 = arith.constant 0 : index
    %c0_81 = arith.constant 0 : index
    %61 = vector.load %arg7[%c0_80, %c0_81] : memref<8x15xf32, #tpu.memory_space<vmem>>, vector<8x15xf32>
    %62 = vector.extract_strided_slice %59 {offsets = [0, 0], sizes = [16, 120], strides = [1, 1]} : vector<16x128xf32> to vector<16x120xf32>
    %63 = vector.extract_strided_slice %59 {offsets = [0, 8], sizes = [16, 120], strides = [1, 1]} : vector<16x128xf32> to vector<16x120xf32>
    %64 = arith.maximumf %62, %63 : vector<16x120xf32>
    %cst_82 = arith.constant dense<0.000000e+00> : vector<16x64xf32>
    %65 = tpu.matmul %64, %60, %cst_82 {dimension_numbers = #tpu.dot_dimension_numbers<[1], [0], [0], [1], [0, 0, 1, 1], [], []>} : vector<16x120xf32>, vector<120x64xf32>, vector<16x64xf32> -> vector<16x64xf32>
    %66 = vector.extract_strided_slice %65 {offsets = [0, 0], sizes = [15, 64], strides = [1, 1]} : vector<16x64xf32> to vector<15x64xf32>
    %67 = vector.extract_strided_slice %65 {offsets = [1, 0], sizes = [15, 64], strides = [1, 1]} : vector<16x64xf32> to vector<15x64xf32>
    %68 = arith.maximumf %66, %67 : vector<15x64xf32>
    %cst_83 = arith.constant dense<0.000000e+00> : vector<8x64xf32>
    %69 = tpu.matmul %61, %68, %cst_83 {dimension_numbers = #tpu.dot_dimension_numbers<[1], [0], [0], [1], [0, 0, 1, 1], [], []>} : vector<8x15xf32>, vector<15x64xf32>, vector<8x64xf32> -> vector<8x64xf32>
    %c0_84 = arith.constant 0 : index
    %c0_85 = arith.constant 0 : index
    %70 = vector.load %arg8[%c0_84, %c0_85] : memref<576x128xf32, #tpu.memory_space<vmem>>, vector<576x128xf32>
    %c0_86 = arith.constant 0 : index
    %c0_87 = arith.constant 0 : index
    %71 = vector.load %arg9[%c0_86, %c0_87] : memref<1x128xf32, #tpu.memory_space<vmem>>, vector<1x128xf32>
    %cst_88 = arith.constant 0.000000e+00 : f32
    %72 = vector.broadcast %cst_88 : f32 to vector<10x80xf32>
    %c0_89 = arith.constant 0 : index
    %c0_90 = arith.constant 0 : index
    %73 = vector.load %arg15[%c0_89, %c0_90] : memref<18x160xf32, #tpu.memory_space<vmem>>, vector<10x80xf32>
    tpu.vector_store %arg15[%c0_89, %c0_90], %72 {strides = array<i32>} : memref<18x160xf32, #tpu.memory_space<vmem>>, vector<10x80xf32>,
    %c1_91 = arith.constant 1 : index
    %c8_92 = arith.constant 8 : index
    %74 = vector.load %arg15[%c1_91, %c8_92] : memref<18x160xf32, #tpu.memory_space<vmem>>, vector<8x64xf32>
    tpu.vector_store %arg15[%c1_91, %c8_92], %69 {strides = array<i32>} : memref<18x160xf32, #tpu.memory_space<vmem>>, vector<8x64xf32>,
    %c0_93 = arith.constant 0 : index
    %c0_94 = arith.constant 0 : index
    %75 = vector.load %arg15[%c0_93, %c0_94] : memref<18x160xf32, #tpu.memory_space<vmem>>, vector<8x64xf32>
    %c0_95 = arith.constant 0 : index
    %c0_96 = arith.constant 0 : index
    %76 = vector.load %arg16[%c0_95, %c0_96] : memref<16x1152xf32, #tpu.memory_space<vmem>>, vector<8x64xf32>
    tpu.vector_store %arg16[%c0_95, %c0_96], %75 {strides = array<i32>} : memref<16x1152xf32, #tpu.memory_space<vmem>>, vector<8x64xf32>,
    %c0_97 = arith.constant 0 : index
    %c8_98 = arith.constant 8 : index
    %77 = vector.load %arg15[%c0_97, %c8_98] : memref<18x160xf32, #tpu.memory_space<vmem>>, vector<8x64xf32>
    %c0_99 = arith.constant 0 : index
    %c64 = arith.constant 64 : index
    %78 = vector.load %arg16[%c0_99, %c64] : memref<16x1152xf32, #tpu.memory_space<vmem>>, vector<8x64xf32>
    tpu.vector_store %arg16[%c0_99, %c64], %77 {strides = array<i32>} : memref<16x1152xf32, #tpu.memory_space<vmem>>, vector<8x64xf32>,
    %c0_100 = arith.constant 0 : index
    %c16_101 = arith.constant 16 : index
    %79 = vector.load %arg15[%c0_100, %c16_101] : memref<18x160xf32, #tpu.memory_space<vmem>>, vector<8x64xf32>
    %c0_102 = arith.constant 0 : index
    %c128_103 = arith.constant 128 : index
    %80 = vector.load %arg16[%c0_102, %c128_103] : memref<16x1152xf32, #tpu.memory_space<vmem>>, vector<8x64xf32>
    tpu.vector_store %arg16[%c0_102, %c128_103], %79 {strides = array<i32>} : memref<16x1152xf32, #tpu.memory_space<vmem>>, vector<8x64xf32>,
    %c1_104 = arith.constant 1 : index
    %c0_105 = arith.constant 0 : index
    %81 = vector.load %arg15[%c1_104, %c0_105] : memref<18x160xf32, #tpu.memory_space<vmem>>, vector<8x64xf32>
    %c0_106 = arith.constant 0 : index
    %c192_107 = arith.constant 192 : index
    %82 = vector.load %arg16[%c0_106, %c192_107] : memref<16x1152xf32, #tpu.memory_space<vmem>>, vector<8x64xf32>
    tpu.vector_store %arg16[%c0_106, %c192_107], %81 {strides = array<i32>} : memref<16x1152xf32, #tpu.memory_space<vmem>>, vector<8x64xf32>,
    %c1_108 = arith.constant 1 : index
    %c8_109 = arith.constant 8 : index
    %83 = vector.load %arg15[%c1_108, %c8_109] : memref<18x160xf32, #tpu.memory_space<vmem>>, vector<8x64xf32>
    %c0_110 = arith.constant 0 : index
    %c256_111 = arith.constant 256 : index
    %84 = vector.load %arg16[%c0_110, %c256_111] : memref<16x1152xf32, #tpu.memory_space<vmem>>, vector<8x64xf32>
    tpu.vector_store %arg16[%c0_110, %c256_111], %83 {strides = array<i32>} : memref<16x1152xf32, #tpu.memory_space<vmem>>, vector<8x64xf32>,
    %c1_112 = arith.constant 1 : index
    %c16_113 = arith.constant 16 : index
    %85 = vector.load %arg15[%c1_112, %c16_113] : memref<18x160xf32, #tpu.memory_space<vmem>>, vector<8x64xf32>
    %c0_114 = arith.constant 0 : index
    %c320 = arith.constant 320 : index
    %86 = vector.load %arg16[%c0_114, %c320] : memref<16x1152xf32, #tpu.memory_space<vmem>>, vector<8x64xf32>
    tpu.vector_store %arg16[%c0_114, %c320], %85 {strides = array<i32>} : memref<16x1152xf32, #tpu.memory_space<vmem>>, vector<8x64xf32>,
    %c2_115 = arith.constant 2 : index
    %c0_116 = arith.constant 0 : index
    %87 = vector.load %arg15[%c2_115, %c0_116] : memref<18x160xf32, #tpu.memory_space<vmem>>, vector<8x64xf32>
    %c0_117 = arith.constant 0 : index
    %c384_118 = arith.constant 384 : index
    %88 = vector.load %arg16[%c0_117, %c384_118] : memref<16x1152xf32, #tpu.memory_space<vmem>>, vector<8x64xf32>
    tpu.vector_store %arg16[%c0_117, %c384_118], %87 {strides = array<i32>} : memref<16x1152xf32, #tpu.memory_space<vmem>>, vector<8x64xf32>,
    %c2_119 = arith.constant 2 : index
    %c8_120 = arith.constant 8 : index
    %89 = vector.load %arg15[%c2_119, %c8_120] : memref<18x160xf32, #tpu.memory_space<vmem>>, vector<8x64xf32>
    %c0_121 = arith.constant 0 : index
    %c448 = arith.constant 448 : index
    %90 = vector.load %arg16[%c0_121, %c448] : memref<16x1152xf32, #tpu.memory_space<vmem>>, vector<8x64xf32>
    tpu.vector_store %arg16[%c0_121, %c448], %89 {strides = array<i32>} : memref<16x1152xf32, #tpu.memory_space<vmem>>, vector<8x64xf32>,
    %c2_122 = arith.constant 2 : index
    %c16_123 = arith.constant 16 : index
    %91 = vector.load %arg15[%c2_122, %c16_123] : memref<18x160xf32, #tpu.memory_space<vmem>>, vector<8x64xf32>
    %c0_124 = arith.constant 0 : index
    %c512_125 = arith.constant 512 : index
    %92 = vector.load %arg16[%c0_124, %c512_125] : memref<16x1152xf32, #tpu.memory_space<vmem>>, vector<8x64xf32>
    tpu.vector_store %arg16[%c0_124, %c512_125], %91 {strides = array<i32>} : memref<16x1152xf32, #tpu.memory_space<vmem>>, vector<8x64xf32>,
    %c0_126 = arith.constant 0 : index
    %c0_127 = arith.constant 0 : index
    %93 = vector.load %arg16[%c0_126, %c0_127] : memref<16x1152xf32, #tpu.memory_space<vmem>>, vector<8x576xf32>
    %cst_128 = arith.constant dense<0.000000e+00> : vector<8x128xf32>
    %94 = tpu.matmul %93, %70, %cst_128 {dimension_numbers = #tpu.dot_dimension_numbers<[1], [0], [0], [1], [0, 0, 1, 1], [], []>} : vector<8x576xf32>, vector<576x128xf32>, vector<8x128xf32> -> vector<8x128xf32>
    %95 = vector.broadcast %71 : vector<1x128xf32> to vector<8x128xf32>
    %96 = arith.addf %94, %95 : vector<8x128xf32>
    %cst_129 = arith.constant 0.000000e+00 : f32
    %97 = vector.broadcast %cst_129 : f32 to vector<8x128xf32>
    %98 = arith.maximumf %96, %97 : vector<8x128xf32>
    %c0_130 = arith.constant 0 : index
    %c0_131 = arith.constant 0 : index
    %99 = vector.load %arg10[%c0_130, %c0_131] : memref<1152x128xf32, #tpu.memory_space<vmem>>, vector<1152x128xf32>
    %c0_132 = arith.constant 0 : index
    %c0_133 = arith.constant 0 : index
    %100 = vector.load %arg11[%c0_132, %c0_133] : memref<1x128xf32, #tpu.memory_space<vmem>>, vector<1x128xf32>
    %cst_134 = arith.constant 0.000000e+00 : f32
    %101 = vector.broadcast %cst_134 : f32 to vector<10x160xf32>
    %c0_135 = arith.constant 0 : index
    %c0_136 = arith.constant 0 : index
    %102 = vector.load %arg15[%c0_135, %c0_136] : memref<18x160xf32, #tpu.memory_space<vmem>>, vector<10x160xf32>
    tpu.vector_store %arg15[%c0_135, %c0_136], %101 {strides = array<i32>} : memref<18x160xf32, #tpu.memory_space<vmem>>, vector<10x160xf32>,
    %c1_137 = arith.constant 1 : index
    %c16_138 = arith.constant 16 : index
    %103 = vector.load %arg15[%c1_137, %c16_138] : memref<18x160xf32, #tpu.memory_space<vmem>>, vector<8x128xf32>
    tpu.vector_store %arg15[%c1_137, %c16_138], %98 {strides = array<i32>} : memref<18x160xf32, #tpu.memory_space<vmem>>, vector<8x128xf32>,
    %c0_139 = arith.constant 0 : index
    %c0_140 = arith.constant 0 : index
    %104 = vector.load %arg15[%c0_139, %c0_140] : memref<18x160xf32, #tpu.memory_space<vmem>>, vector<8x128xf32>
    %c0_141 = arith.constant 0 : index
    %c0_142 = arith.constant 0 : index
    %105 = vector.load %arg16[%c0_141, %c0_142] : memref<16x1152xf32, #tpu.memory_space<vmem>>, vector<8x128xf32>
    tpu.vector_store %arg16[%c0_141, %c0_142], %104 {strides = array<i32>} : memref<16x1152xf32, #tpu.memory_space<vmem>>, vector<8x128xf32>,
    %c0_143 = arith.constant 0 : index
    %c16_144 = arith.constant 16 : index
    %106 = vector.load %arg15[%c0_143, %c16_144] : memref<18x160xf32, #tpu.memory_space<vmem>>, vector<8x128xf32>
    %c0_145 = arith.constant 0 : index
    %c128_146 = arith.constant 128 : index
    %107 = vector.load %arg16[%c0_145, %c128_146] : memref<16x1152xf32, #tpu.memory_space<vmem>>, vector<8x128xf32>
    tpu.vector_store %arg16[%c0_145, %c128_146], %106 {strides = array<i32>} : memref<16x1152xf32, #tpu.memory_space<vmem>>, vector<8x128xf32>,
    %c0_147 = arith.constant 0 : index
    %c32 = arith.constant 32 : index
    %108 = vector.load %arg15[%c0_147, %c32] : memref<18x160xf32, #tpu.memory_space<vmem>>, vector<8x128xf32>
    %c0_148 = arith.constant 0 : index
    %c256_149 = arith.constant 256 : index
    %109 = vector.load %arg16[%c0_148, %c256_149] : memref<16x1152xf32, #tpu.memory_space<vmem>>, vector<8x128xf32>
    tpu.vector_store %arg16[%c0_148, %c256_149], %108 {strides = array<i32>} : memref<16x1152xf32, #tpu.memory_space<vmem>>, vector<8x128xf32>,
    %c1_150 = arith.constant 1 : index
    %c0_151 = arith.constant 0 : index
    %110 = vector.load %arg15[%c1_150, %c0_151] : memref<18x160xf32, #tpu.memory_space<vmem>>, vector<8x128xf32>
    %c0_152 = arith.constant 0 : index
    %c384_153 = arith.constant 384 : index
    %111 = vector.load %arg16[%c0_152, %c384_153] : memref<16x1152xf32, #tpu.memory_space<vmem>>, vector<8x128xf32>
    tpu.vector_store %arg16[%c0_152, %c384_153], %110 {strides = array<i32>} : memref<16x1152xf32, #tpu.memory_space<vmem>>, vector<8x128xf32>,
    %c1_154 = arith.constant 1 : index
    %c16_155 = arith.constant 16 : index
    %112 = vector.load %arg15[%c1_154, %c16_155] : memref<18x160xf32, #tpu.memory_space<vmem>>, vector<8x128xf32>
    %c0_156 = arith.constant 0 : index
    %c512_157 = arith.constant 512 : index
    %113 = vector.load %arg16[%c0_156, %c512_157] : memref<16x1152xf32, #tpu.memory_space<vmem>>, vector<8x128xf32>
    tpu.vector_store %arg16[%c0_156, %c512_157], %112 {strides = array<i32>} : memref<16x1152xf32, #tpu.memory_space<vmem>>, vector<8x128xf32>,
    %c1_158 = arith.constant 1 : index
    %c32_159 = arith.constant 32 : index
    %114 = vector.load %arg15[%c1_158, %c32_159] : memref<18x160xf32, #tpu.memory_space<vmem>>, vector<8x128xf32>
    %c0_160 = arith.constant 0 : index
    %c640_161 = arith.constant 640 : index
    %115 = vector.load %arg16[%c0_160, %c640_161] : memref<16x1152xf32, #tpu.memory_space<vmem>>, vector<8x128xf32>
    tpu.vector_store %arg16[%c0_160, %c640_161], %114 {strides = array<i32>} : memref<16x1152xf32, #tpu.memory_space<vmem>>, vector<8x128xf32>,
    %c2_162 = arith.constant 2 : index
    %c0_163 = arith.constant 0 : index
    %116 = vector.load %arg15[%c2_162, %c0_163] : memref<18x160xf32, #tpu.memory_space<vmem>>, vector<8x128xf32>
    %c0_164 = arith.constant 0 : index
    %c768_165 = arith.constant 768 : index
    %117 = vector.load %arg16[%c0_164, %c768_165] : memref<16x1152xf32, #tpu.memory_space<vmem>>, vector<8x128xf32>
    tpu.vector_store %arg16[%c0_164, %c768_165], %116 {strides = array<i32>} : memref<16x1152xf32, #tpu.memory_space<vmem>>, vector<8x128xf32>,
    %c2_166 = arith.constant 2 : index
    %c16_167 = arith.constant 16 : index
    %118 = vector.load %arg15[%c2_166, %c16_167] : memref<18x160xf32, #tpu.memory_space<vmem>>, vector<8x128xf32>
    %c0_168 = arith.constant 0 : index
    %c896_169 = arith.constant 896 : index
    %119 = vector.load %arg16[%c0_168, %c896_169] : memref<16x1152xf32, #tpu.memory_space<vmem>>, vector<8x128xf32>
    tpu.vector_store %arg16[%c0_168, %c896_169], %118 {strides = array<i32>} : memref<16x1152xf32, #tpu.memory_space<vmem>>, vector<8x128xf32>,
    %c2_170 = arith.constant 2 : index
    %c32_171 = arith.constant 32 : index
    %120 = vector.load %arg15[%c2_170, %c32_171] : memref<18x160xf32, #tpu.memory_space<vmem>>, vector<8x128xf32>
    %c0_172 = arith.constant 0 : index
    %c1024_173 = arith.constant 1024 : index
    %121 = vector.load %arg16[%c0_172, %c1024_173] : memref<16x1152xf32, #tpu.memory_space<vmem>>, vector<8x128xf32>
    tpu.vector_store %arg16[%c0_172, %c1024_173], %120 {strides = array<i32>} : memref<16x1152xf32, #tpu.memory_space<vmem>>, vector<8x128xf32>,
    %c0_174 = arith.constant 0 : index
    %c0_175 = arith.constant 0 : index
    %122 = vector.load %arg16[%c0_174, %c0_175] : memref<16x1152xf32, #tpu.memory_space<vmem>>, vector<8x1152xf32>
    %cst_176 = arith.constant dense<0.000000e+00> : vector<8x128xf32>
    %123 = tpu.matmul %122, %99, %cst_176 {dimension_numbers = #tpu.dot_dimension_numbers<[1], [0], [0], [1], [0, 0, 1, 1], [], []>} : vector<8x1152xf32>, vector<1152x128xf32>, vector<8x128xf32> -> vector<8x128xf32>
    %124 = vector.broadcast %100 : vector<1x128xf32> to vector<8x128xf32>
    %125 = arith.addf %123, %124 : vector<8x128xf32>
    %cst_177 = arith.constant 0.000000e+00 : f32
    %126 = vector.broadcast %cst_177 : f32 to vector<8x128xf32>
    %127 = arith.maximumf %125, %126 : vector<8x128xf32>
    %c0_178 = arith.constant 0 : index
    %c0_179 = arith.constant 0 : index
    %128 = vector.load %arg12[%c0_178, %c0_179] : memref<112x64xf32, #tpu.memory_space<vmem>>, vector<112x64xf32>
    %c0_180 = arith.constant 0 : index
    %c0_181 = arith.constant 0 : index
    %129 = vector.load %arg13[%c0_180, %c0_181] : memref<4x7xf32, #tpu.memory_space<vmem>>, vector<4x7xf32>
    %130 = vector.extract_strided_slice %127 {offsets = [0, 0], sizes = [8, 112], strides = [1, 1]} : vector<8x128xf32> to vector<8x112xf32>
    %131 = vector.extract_strided_slice %127 {offsets = [0, 16], sizes = [8, 112], strides = [1, 1]} : vector<8x128xf32> to vector<8x112xf32>
    %132 = arith.maximumf %130, %131 : vector<8x112xf32>
    %cst_182 = arith.constant dense<0.000000e+00> : vector<8x64xf32>
    %133 = tpu.matmul %132, %128, %cst_182 {dimension_numbers = #tpu.dot_dimension_numbers<[1], [0], [0], [1], [0, 0, 1, 1], [], []>} : vector<8x112xf32>, vector<112x64xf32>, vector<8x64xf32> -> vector<8x64xf32>
    %134 = vector.extract_strided_slice %133 {offsets = [0, 0], sizes = [7, 64], strides = [1, 1]} : vector<8x64xf32> to vector<7x64xf32>
    %135 = vector.extract_strided_slice %133 {offsets = [1, 0], sizes = [7, 64], strides = [1, 1]} : vector<8x64xf32> to vector<7x64xf32>
    %136 = arith.maximumf %134, %135 : vector<7x64xf32>
    %cst_183 = arith.constant dense<0.000000e+00> : vector<4x64xf32>
    %137 = tpu.matmul %129, %136, %cst_183 {dimension_numbers = #tpu.dot_dimension_numbers<[1], [0], [0], [1], [0, 0, 1, 1], [], []>} : vector<4x7xf32>, vector<7x64xf32>, vector<4x64xf32> -> vector<4x64xf32>
    %c0_184 = arith.constant 0 : index
    %c0_185 = arith.constant 0 : index
    %c0_186 = arith.constant 0 : index
    %138 = vector.load %arg14[%c0_184, %c0_185, %c0_186] : memref<1x4x64xf32, #tpu.memory_space<vmem>>, vector<1x4x64xf32>
    %139 = vector.shape_cast %138 : vector<1x4x64xf32> to vector<4x64xf32>
    %140 = vector.shape_cast %137 : vector<4x64xf32> to vector<1x4x64xf32>
    tpu.vector_store %arg14[%c0_184, %c0_185, %c0_186], %140 {strides = array<i32>} : memref<1x4x64xf32, #tpu.memory_space<vmem>>, vector<1x4x64xf32>,
    return
  }
  func.func @transform_0(%arg0: i32) -> (i32, i32, i32) {
    %c0_i32 = arith.constant 0 : i32
    %c0_i32_0 = arith.constant 0 : i32
    %c0_i32_1 = arith.constant 0 : i32
    return %arg0, %c0_i32, %c0_i32_0 : i32, i32, i32
  }
  func.func @transform_1(%arg0: i32) -> (i32, i32) {
    %c0_i32 = arith.constant 0 : i32
    %c0_i32_0 = arith.constant 0 : i32
    %c0_i32_1 = arith.constant 0 : i32
    return %c0_i32, %c0_i32_0 : i32, i32
  }
  func.func @transform_2(%arg0: i32) -> (i32, i32) {
    %c0_i32 = arith.constant 0 : i32
    %c0_i32_0 = arith.constant 0 : i32
    %c0_i32_1 = arith.constant 0 : i32
    return %c0_i32, %c0_i32_0 : i32, i32
  }
  func.func @transform_3(%arg0: i32) -> (i32, i32) {
    %c0_i32 = arith.constant 0 : i32
    %c0_i32_0 = arith.constant 0 : i32
    %c0_i32_1 = arith.constant 0 : i32
    return %c0_i32, %c0_i32_0 : i32, i32
  }
  func.func @transform_4(%arg0: i32) -> (i32, i32) {
    %c0_i32 = arith.constant 0 : i32
    %c0_i32_0 = arith.constant 0 : i32
    %c0_i32_1 = arith.constant 0 : i32
    return %c0_i32, %c0_i32_0 : i32, i32
  }
  func.func @transform_5(%arg0: i32) -> (i32, i32) {
    %c0_i32 = arith.constant 0 : i32
    %c0_i32_0 = arith.constant 0 : i32
    %c0_i32_1 = arith.constant 0 : i32
    return %c0_i32, %c0_i32_0 : i32, i32
  }
  func.func @transform_6(%arg0: i32) -> (i32, i32) {
    %c0_i32 = arith.constant 0 : i32
    %c0_i32_0 = arith.constant 0 : i32
    %c0_i32_1 = arith.constant 0 : i32
    return %c0_i32, %c0_i32_0 : i32, i32
  }
  func.func @transform_7(%arg0: i32) -> (i32, i32) {
    %c0_i32 = arith.constant 0 : i32
    %c0_i32_0 = arith.constant 0 : i32
    %c0_i32_1 = arith.constant 0 : i32
    return %c0_i32, %c0_i32_0 : i32, i32
  }
  func.func @transform_8(%arg0: i32) -> (i32, i32) {
    %c0_i32 = arith.constant 0 : i32
    %c0_i32_0 = arith.constant 0 : i32
    %c0_i32_1 = arith.constant 0 : i32
    return %c0_i32, %c0_i32_0 : i32, i32
  }
  func.func @transform_9(%arg0: i32) -> (i32, i32) {
    %c0_i32 = arith.constant 0 : i32
    %c0_i32_0 = arith.constant 0 : i32
    %c0_i32_1 = arith.constant 0 : i32
    return %c0_i32, %c0_i32_0 : i32, i32
  }
  func.func @transform_10(%arg0: i32) -> (i32, i32) {
    %c0_i32 = arith.constant 0 : i32
    %c0_i32_0 = arith.constant 0 : i32
    %c0_i32_1 = arith.constant 0 : i32
    return %c0_i32, %c0_i32_0 : i32, i32
  }
  func.func @transform_11(%arg0: i32) -> (i32, i32) {
    %c0_i32 = arith.constant 0 : i32
    %c0_i32_0 = arith.constant 0 : i32
    %c0_i32_1 = arith.constant 0 : i32
    return %c0_i32, %c0_i32_0 : i32, i32
  }
  func.func @transform_12(%arg0: i32) -> (i32, i32) {
    %c0_i32 = arith.constant 0 : i32
    %c0_i32_0 = arith.constant 0 : i32
    %c0_i32_1 = arith.constant 0 : i32
    return %c0_i32, %c0_i32_0 : i32, i32
  }
  func.func @transform_13(%arg0: i32) -> (i32, i32, i32) {
    %c0_i32 = arith.constant 0 : i32
    %c0_i32_0 = arith.constant 0 : i32
    %c0_i32_1 = arith.constant 0 : i32
    return %arg0, %c0_i32, %c0_i32_0 : i32, i32, i32
  }
}

</mosaic_0001>

<bundles_post_ra>
// kernel: tpu_custom_call.1
= control target key start
LH: loop header
LB: loop body
LE: loop exit
PB: predicated region body
PF: predicated region fallthrough
CT: control target
= control target key end

     0   :  { %18 = vsyncpa [#allocation5], 0  ;;  %s4921_s0 = inlined_call_operand.vmem [shape: f32[2,16,48], index: 0, kind: input, shape index: {}]   ;;  %s4922_s1 = inlined_call_operand.hbm [shape: f32[432,128], index: 1, kind: input, shape index: {}]   ;;  %s4923_s2 = inlined_call_operand.vmem [shape: f32[1,128], index: 2, kind: input, shape index: {}]   ;;  %s4924_s3 = inlined_call_operand.hbm [shape: f32[1152,128], index: 3, kind: input, shape index: {}]   ;;  %s4925_s4 = inlined_call_operand.vmem [shape: f32[1,128], index: 4, kind: input, shape index: {}]   ;;  %s4926_s5 = inlined_call_operand.vmem [shape: f32[120,64], index: 5, kind: input, shape index: {}]   ;;  %s4927_s6 = inlined_call_operand.vmem [shape: f32[8,15], index: 6, kind: input, shape index: {}]   ;;  %s4928_s7 = inlined_call_operand.hbm [shape: f32[576,128], index: 7, kind: input, shape index: {}]   ;;  %s4929_s8 = inlined_call_operand.vmem [shape: f32[1,128], index: 8, kind: input, shape index: {}]   ;;  %s4930_s9 = inlined_call_operand.hbm [shape: f32[1152,128], index: 9, kind: input, shape index: {}]   ;;  %s4931_s10 = inlined_call_operand.vmem [shape: f32[1,128], index: 10, kind: input, shape index: {}]   ;;  %s4932_s11 = inlined_call_operand.vmem [shape: f32[112,64], index: 11, kind: input, shape index: {}]   ;;  %s4933_s12 = inlined_call_operand.vmem [shape: f32[4,7], index: 12, kind: input, shape index: {}]   ;;  %s4934_s13 = inlined_call_operand.hbm [shape: f32[2,4,64], index: 13, kind: output, shape index: {}]  }
   0x1   :  { %19 = vsyncpa [#allocation8], 0 }
   0x2   :  { %20 = vsyncpa [#allocation11], 0 }
   0x3   :  { %21 = vsyncpa [#allocation6], 0 }
   0x4   :  { %23 = vsyncpa [#allocation6 + $0x1], 0  ;;  %s4297_s25 = smov 0   ;;  %s4299_s26 = smov 0  }
   0x5   :  { %s4301_s27 = smov 0   ;;  %s4303_s28 = smov 0  }
   0x6 LB: > { %4939 = sst [smem:[#allocation17_spill]] %s4196_s27  ;;  %s4318_s29 = sadd.s32 4294967295, %s4200_s28   ;;  %s4200_s28 = sphi %s4303_s28, %s4948_s28   ;;  %s4196_s27 = sphi %s4301_s27, %s4950_s27   ;;  %s4192_s26 = sphi %s4299_s26, %s4952_s26   ;;  %s4188_s25 = sphi %s4297_s25, %s4951_s25  }
   0x7   : > { %s3244_s30 = sadd.s32 4294967294, %s4200_s28   ;;  %s4322_s14 = sadd.s32 1, %s4200_s28  }
   0x8   : > { %4940 = sst [smem:[#allocation18_spill]] %s4322_s14  ;;  %s314_s15 = sadd.s32 1, %s4196_s27 }
   0x9   : > { %s311_s16 = ssub.s32 %s4200_s28, %s4322_s14  ;;  %p324_p0 = scmp.ne.s32.totalorder %s4196_s27, %s4192_s26 }
   0xa   : > { %p312_p1 = scmp.eq.s32.totalorder %s311_s16, 0  ;;  %p325_p2 = scmp.eq.s32.totalorder %s4318_s29, 1 }
   0xb   : > { %p330_p3 = scmp.ne.s32.totalorder %s4192_s26, %s4188_s25  ;;  %p331_p4 = scmp.eq.s32.totalorder %s3244_s30, 1 }
   0xc   : > { %s4333_s17 = scalar_select %p312_p1, %s4196_s27, %s314_s15  }
   0xd   : > { %p4335_p5 = por %p325_p2, %p324_p0  ;;  %p4339_p6 = por %p331_p4, %p330_p3 }
   0xe   : > { %4941 = sst [smem:[#allocation19_spill]] %s4333_s17  ;;  %p3245_p7 = scmp.ge.s32.totalorder %s4200_s28, 1 }
   0xf   : > { %s4943_s19 = scalar_select %p4339_p6, 1, 0 }
  0x10   : > { %p338_p8 = scmp.lt.s32.totalorder %s4200_s28, 3  ;;  %p3959_p9 = scmp.eq.s32.totalorder %s4318_s29, 0 }
  0x11   : > { %4944 = sst [smem:[#allocation20_spill]] %s4943_s19  ;;  %s4202_s21 = smov [#allocation7]  }
  0x12   : > { %p4346_p10 = pnand %p3245_p7, %p338_p8  ;;  %s366_s22 = sshll.u32 %s4202_s21, 4  ;;  %s367_s22 = int_to_ptr.vmem [resolvable:$true] %s366_s22 }
  0x13   : > { %s4203_s24 = smov [#allocation4]   ;;  %s4204_s15 = smov [#allocation9]  }
  0x14   : > { %p3942_p11 = pneg %p4346_p10  ;;  %s350_s30 = sshll.u32 %s4203_s24, 4  ;;  %s351_s30 = int_to_ptr.vmem [resolvable:$true] %s350_s30 }
  0x15   : > { %s388_s16 = sshll.u32 %s4204_s15, 4  ;;  %s4035_s17 = scalar_lea.vmem %s367_s22, 18432  ;;  %s389_s16 = int_to_ptr.vmem [resolvable:$true] %s388_s16 }
  0x16   : > { %p4354_p12 = pnand %p3959_p9, %p3942_p11  ;;  %p4036_p0 = scmp.ne.s32.totalorder %s367_s22, %s4035_s17 }
  0x17   : > { %p4043_p3 = scmp.lt.s32.totalorder %s367_s22, %s367_s22  ;;  %p4044_p4 = scmp.lt.s32.totalorder %s4035_s17, %s4035_s17 }
  0x18   : > { %p4026_p13 = pneg %p4354_p12 }
  0x19   : > { %p4045_p7 = por %p4044_p4, %p4043_p3 }
  0x1a   : > { %p4038_p1 = pnand %p4036_p0, %p4026_p13 }
  0x1c   : > { %p4039_p2 = pneg %p4038_p1 }
  0x1e   : > { %p4046_p8 = pnand %p4045_p7, %p4039_p2 }
  0x20   : > { %4049 = shalt.err (!%p4046_p8)
}
  0x21   : > { %s4205_s21 = smov 128   ;;  %s4206_s24 = smov 8  }
  0x22   : > { %3948 = dma.hbm_to_vmem [thread:$0]  (!%p4354_p12), %s4924_s3, 18432, %s367_s22, [#allocation8], %s4205_s21, %s4205_s21, %s4206_s24  }
  0x23   : > { %s4061_s14 = scalar_lea.vmem %s351_s30, 6912  ;;  %p4069_p2 = scmp.lt.s32.totalorder %s351_s30, %s351_s30 }
  0x24   : > { %p4062_p11 = scmp.ne.s32.totalorder %s351_s30, %s4061_s14  ;;  %p4070_p3 = scmp.lt.s32.totalorder %s4061_s14, %s4061_s14 }
  0x26   : > { %p4064_p0 = pnand %p4062_p11, %p4026_p13  ;;  %p4071_p4 = por %p4070_p3, %p4069_p2 }
  0x28   : > { %p4065_p1 = pneg %p4064_p0 }
  0x2a   : > { %p4072_p7 = pnand %p4071_p4, %p4065_p1 }
  0x2c   : > { %4075 = shalt.err (!%p4072_p7)
}
  0x2d   : > { %3945 = dma.hbm_to_vmem [thread:$0]  (!%p4354_p12), %s4922_s1, 6912, %s351_s30, [#allocation5], %s4205_s21, %s4205_s21, %s4206_s24  }
  0x2e   : > { %s4087_s27 = scalar_lea.vmem %s389_s16, 9216  ;;  %p4095_p2 = scmp.lt.s32.totalorder %s389_s16, %s389_s16 }
  0x2f   : > { %p4088_p8 = scmp.ne.s32.totalorder %s389_s16, %s4087_s27  ;;  %p4096_p1 = scmp.lt.s32.totalorder %s4087_s27, %s4087_s27 }
  0x31   : > { %p4090_p11 = pnand %p4088_p8, %p4026_p13  ;;  %p4097_p3 = por %p4096_p1, %p4095_p2 }
  0x33   : > { %p4091_p0 = pneg %p4090_p11 }
  0x35   : > { %p4098_p4 = pnand %p4097_p3, %p4091_p0 }
  0x37   : > { %4101 = shalt.err (!%p4098_p4)
}
  0x38   : > { %3951 = dma.hbm_to_vmem [thread:$0]  (!%p4354_p12), %s4928_s7, 9216, %s389_s16, [#allocation8], %s4205_s21, %s4205_s21, %s4206_s24  }
  0x39   : > { %s4207_s22 = smov [#allocation10]  }
  0x3a   : > { %s404_s30 = sshll.u32 %s4207_s22, 4  ;;  %s405_s30 = int_to_ptr.vmem [resolvable:$true] %s404_s30 }
  0x3b   : > { %s4113_s15 = scalar_lea.vmem %s405_s30, 18432  ;;  %p4121_p0 = scmp.lt.s32.totalorder %s405_s30, %s405_s30 }
  0x3c   : > { %p4114_p7 = scmp.ne.s32.totalorder %s405_s30, %s4113_s15  ;;  %p4122_p2 = scmp.lt.s32.totalorder %s4113_s15, %s4113_s15 }
  0x3e   : > { %p4116_p8 = pnand %p4114_p7, %p4026_p13  ;;  %p4123_p1 = por %p4122_p2, %p4121_p0 }
  0x40   : > { %p4117_p11 = pneg %p4116_p8 }
  0x42   : > { %p4124_p3 = pnand %p4123_p1, %p4117_p11 }
  0x44   : > { %4127 = shalt.err (!%p4124_p3)
}
  0x45   : > { %3954 = dma.hbm_to_vmem [thread:$0]  (!%p4354_p12), %s4930_s9, 18432, %s405_s30, [#allocation11], %s4205_s21, %s4205_s21, %s4206_s24  }
  0x46   : > { %437 = sbr.rel (%p4346_p10) target bundleno = 3070 (0xbfe), region = 72 }
  0x4b   : > { %4171 = dma.done.wait (%p3959_p9), [#allocation5], 6912  }
  0x4c   : > { %4173 = vsyncadd (%p3959_p9), [#allocation5], 4294960384 }
  0x4d   : > { %4175 = dma.done.wait (%p3959_p9), [#allocation8], 27648  }
  0x4e   : > { %4177 = vsyncadd (%p3959_p9), [#allocation8], 4294939648 }
  0x4f   : > { %4179 = dma.done.wait (%p3959_p9), [#allocation11], 18432  }
  0x50   : > { %4181 = vsyncadd (%p3959_p9), [#allocation11], 4294948864  ;;  %p493_p10 = scmp.lt.s32.totalorder %s4318_s29, 1  ;;  %vm555_vm0 = vcmask 441344   ;;  %vm558_vm1 = vcmask 435200   ;;  %v4208_v0 = vmov 0.0  }
  0x51   : > { %556 = vst.msk [vmem:[#allocation2] sm:$0xff] %vm555_vm0, %v4208_v0  ;;  %557 = vst.msk [vmem:[#allocation2 + $0x10] sm:$0xff] %vm555_vm0, %v4208_v0  ;;  %834 = vmatprep.subr.mxu1 %v4208_v0  ;;  %vm562_vm2 = vcmask 1040384   ;;  %s4209_s14 = smov 3   ;;  %v547_v6 = vld [vmem:[#allocation4 + $0x178] sm:$0xff]  ;;  %v546_v7 = vld [vmem:[#allocation4 + $0x170] sm:$0xff] }
  0x52   : > { %s494_s20 = scalar_select %p493_p10, %s4318_s29, 1  ;;  %559 = vst.msk [vmem:[#allocation2 + $0x20] sm:$0x3] %vm558_vm1, %v4208_v0  ;;  %v531_v8 = vld [vmem:[#allocation4 + $0xf8] sm:$0xff]  ;;  %vm611_vm3 = vcmask 130048   ;;  %835 = vmatpush1.msra.mxu1 %v547_v6  ;;  %v530_v10 = vld [vmem:[#allocation4 + $0xf0] sm:$0xff] }
  0x53   : > { %3278 = vmatprep.subr.mxu0 %v531_v8  ;;  %v515_v9 = vld [vmem:[#allocation4 + $0x78] sm:$0xff]  ;;  %1057 = vst.msk [vmem:[#allocation2 + $0x8] sm:$0xff] %vm611_vm3, %v4208_v0  ;;  %1059 = vst.msk [vmem:[#allocation2 + $0x18] sm:$0xff] %vm611_vm3, %v4208_v0  ;;  %836 = vmatprep.subr.mxu1 %v4208_v0  ;;  %v545_v11 = vld [vmem:[#allocation4 + $0x168] sm:$0xff]  ;;  %vm575_vm4 = vcmask 416793   ;;  %vm579_vm5 = vcmask 409624  }
  0x54   : > { %s3277_s23 = sshll.u32 %s494_s20, 4  ;;  %3279 = vmatpush3.msra.mxu0 %v515_v9  ;;  %v514_v12 = vld [vmem:[#allocation4 + $0x70] sm:$0xff]  ;;  %v529_v13 = vld [vmem:[#allocation4 + $0xe8] sm:$0xff]  ;;  %837 = vmatpush1.msra.mxu1 %v546_v7  ;;  %v544_v15 = vld [vmem:[#allocation4 + $0x160] sm:$0xff]  ;;  %vm577_vm6 = vcmask 416792   ;;  %vm583_vm7 = vcmask 392192  }
  0x55   : > { %s497_s27 = scalar_lea.vmem %s4921_s0, %s3277_s23  ;;  %3280 = vmatprep.subr.mxu0 %v530_v10  ;;  %v513_v14 = vld [vmem:[#allocation4 + $0x68] sm:$0xff]  ;;  %838 = vmatprep.subr.mxu1 %v4208_v0  ;;  %v528_v16 = vld [vmem:[#allocation4 + $0xe0] sm:$0xff]  ;;  %v543_v18 = vld [vmem:[#allocation4 + $0x158] sm:$0xff]  ;;  %s4210_s19 = smov 90   ;;  %vm621_vm8 = vcmask 1046528   ;;  %vm685_vm9 = vcmask 1045504  }
  0x56   : > { %v498_v1 = vld [vmem:[%s497_s27] sm:$0xff]  ;;  %v499_v2 = vld [vmem:[%s497_s27 + $0x8] sm:$0xff]  ;;  %3281 = vmatpush3.msra.mxu0 %v514_v12  ;;  %839 = vmatpush1.msra.mxu1 %v545_v11  ;;  %v527_v19 = vld [vmem:[#allocation4 + $0xd8] sm:$0xff]  ;;  %s4211_s22 = smov 61   ;;  %s4212_s30 = smov 16   ;;  %vm633_vm10 = vcmask 523392  }
  0x57   : > { %v563_v3 = vrot.slane %v498_v1, 7  ;;  %v564_v4 = vrot.slane %v499_v2, 7  ;;  %3282 = vmatprep.subr.mxu0 %v529_v13  ;;  %v512_v17 = vld [vmem:[#allocation4 + $0x60] sm:$0xff]  ;;  %840 = vmatprep.subr.mxu1 %v4208_v0  ;;  %v511_v20 = vld [vmem:[#allocation4 + $0x58] sm:$0xff]  ;;  %v542_v21 = vld [vmem:[#allocation4 + $0x150] sm:$0xff]  ;;  %s4213_s15 = smov 106  }
  0x58   : > { %3283 = vmatpush3.msra.mxu0 %v513_v14  ;;  %841 = vmatpush1.msra.mxu1 %v544_v15  ;;  %v526_v22 = vld [vmem:[#allocation4 + $0xd0] sm:$0xff]  ;;  %v541_v24 = vld [vmem:[#allocation4 + $0x148] sm:$0xff]  ;;  %v540_v25 = vld [vmem:[#allocation4 + $0x140] sm:$0xff]  ;;  %s4214_s16 = smov 45   ;;  %s4215_s17 = smov 122   ;;  %vm653_vm11 = vcmask 916992  }
  0x59   : > { %566 = vrot.lane.b32.xlu0 %v563_v3, %s4209_s14  ;;  %570 = vrot.lane.b32.xlu1 %v564_v4, %s4209_s14  ;;  %v565_v5 = vsel %vm562_vm2, %v563_v3, %v564_v4  ;;  %v510_v23 = vld [vmem:[#allocation4 + $0x50] sm:$0xff]  ;;  %v525_v26 = vld [vmem:[#allocation4 + $0xc8] sm:$0xff]  ;;  %v539_v27 = vld [vmem:[#allocation4 + $0x138] sm:$0xff]  ;;  %s4216_s20 = smov 32   ;;  %s4217_s23 = smov 77   ;;  %vm673_vm12 = vcmask 1048448  }
  0x5a   : > { %3284 = vmatprep.subr.mxu0 %v528_v16  ;;  %842 = vmatprep.subr.mxu1 %v4208_v0  ;;  %v509_v28 = vld [vmem:[#allocation4 + $0x48] sm:$0xff]  ;;  %v524_v29 = vld [vmem:[#allocation4 + $0xc0] sm:$0xff]  ;;  %v538_v30 = vld [vmem:[#allocation4 + $0x130] sm:$0xff]  ;;  %vm675_vm13 = vcmask 261120   ;;  %vm596_vm14 = vcmask 785792   ;;  %vm609_vm15 = vcmask 1048320  }
  0x5b   : > { %3285 = vmatpush3.msra.mxu0 %v512_v17  ;;  %843 = vmatpush1.msra.mxu1 %v543_v18  ;;  %v508_v31 = vld [vmem:[#allocation4 + $0x40] sm:$0xff]  ;;  %v523_v32 = vld [vmem:[#allocation4 + $0xb8] sm:$0xff]  ;;  %v537_v33 = vld [vmem:[#allocation4 + $0x128] sm:$0xff]  ;;  %vm697_vm0 = vcmask 654592   ;;  %vm717_vm1 = vcmask 1048192   ;;  %s4218_s27 = smov 8  }
  0x5c   : > { %3286 = vmatprep.subr.mxu0 %v527_v19  ;;  %844 = vmatprep.subr.mxu1 %v4208_v0  ;;  %v507_v34 = vld [vmem:[#allocation4 + $0x38] sm:$0xff]  ;;  %v522_v37 = vld [vmem:[#allocation4 + $0xb0] sm:$0xff]  ;;  %v536_v38 = vld [vmem:[#allocation4 + $0x120] sm:$0xff] }
  0x5d   : > { %568 = vrot.lane.b32.xlu0 %v565_v5, %s4209_s14  ;;  %3287 = vmatpush3.msra.mxu0 %v511_v20  ;;  %v506_v39 = vld [vmem:[#allocation4 + $0x30] sm:$0xff]  ;;  %v521_v40 = vld [vmem:[#allocation4 + $0xa8] sm:$0xff]  ;;  %v535_v41 = vld [vmem:[#allocation4 + $0x118] sm:$0xff]  ;;  %s4219_s14 = smov 120  }
  0x5e   : > { %845 = vmatpush1.msra.mxu1 %v542_v21  ;;  %3288 = vmatprep.subr.mxu0 %v526_v22  ;;  %v505_v43 = vld [vmem:[#allocation4 + $0x28] sm:$0xff]  ;;  %v520_v44 = vld [vmem:[#allocation4 + $0xa0] sm:$0xff]  ;;  %v534_v45 = vld [vmem:[#allocation4 + $0x110] sm:$0xff] }
  0x5f   : > { %846 = vmatprep.subr.mxu1 %v4208_v0  ;;  %3289 = vmatpush3.msra.mxu0 %v510_v23  ;;  %v504_v58 = vld [vmem:[#allocation4 + $0x20] sm:$0xff]  ;;  %v519_v62 = vld [vmem:[#allocation4 + $0x98] sm:$0xff]  ;;  %v533_v2 = vld [vmem:[#allocation4 + $0x108] sm:$0xff] }
  0x60   : > { %847 = vmatpush1.msra.mxu1 %v541_v24  ;;  %3290 = vmatprep.subr.mxu0 %v525_v26  ;;  %v503_v5 = vld [vmem:[#allocation4 + $0x18] sm:$0xff]  ;;  %v518_v6 = vld [vmem:[#allocation4 + $0x90] sm:$0xff]  ;;  %v532_v7 = vld [vmem:[#allocation4 + $0x100] sm:$0xff] }
  0x61   : > { %848 = vmatprep.subr.mxu1 %v4208_v0  ;;  %3291 = vmatpush3.msra.mxu0 %v509_v28  ;;  %v502_v8 = vld [vmem:[#allocation4 + $0x10] sm:$0xff]  ;;  %v517_v10 = vld [vmem:[#allocation4 + $0x88] sm:$0xff]  ;;  %v516_v15 = vld [vmem:[#allocation4 + $0x80] sm:$0xff] }
  0x62   : > { %849 = vmatpush1.msra.mxu1 %v540_v25  ;;  %3292 = vmatprep.subr.mxu0 %v524_v29  ;;  %v553_v11 = vld [vmem:[#allocation4 + $0x1a8] sm:$0xff]  ;;  %v552_v16 = vld [vmem:[#allocation4 + $0x1a0] sm:$0xff]  ;;  %v551_v22 = vld [vmem:[#allocation4 + $0x198] sm:$0xff] }
  0x63   : > { %850 = vmatprep.subr.mxu1 %v4208_v0  ;;  %3293 = vmatpush3.msra.mxu0 %v508_v31  ;;  %v501_v14 = vld [vmem:[#allocation4 + $0x8] sm:$0xff]  ;;  %v500_v19 = vld [vmem:[#allocation4] sm:$0xff]  ;;  %v550_v24 = vld [vmem:[#allocation4 + $0x190] sm:$0xff] }
  0x64   : > { %851 = vmatpush1.msra.mxu1 %v539_v27  ;;  %3294 = vmatprep.subr.mxu0 %v523_v32  ;;  %v549_v28 = vld [vmem:[#allocation4 + $0x188] sm:$0xff]  ;;  %v548_v32 = vld [vmem:[#allocation4 + $0x180] sm:$0xff] }
  0x65   : > { %852 = vmatprep.subr.mxu1 %v4208_v0  ;;  %3295 = vmatpush3.msra.mxu0 %v507_v34 }
  0x66   : > { %853 = vmatpush1.msra.mxu1 %v538_v30  ;;  %3296 = vmatprep.subr.mxu0 %v522_v37 }
  0x67   : > { %854 = vmatprep.subr.mxu1 %v4208_v0  ;;  %3297 = vmatpush3.msra.mxu0 %v506_v39 }
  0x68   : > { %855 = vmatpush1.msra.mxu1 %v537_v33  ;;  %3298 = vmatprep.subr.mxu0 %v521_v40 }
  0x69   : > { %856 = vmatprep.subr.mxu1 %v4208_v0  ;;  %3299 = vmatpush3.msra.mxu0 %v505_v43 }
  0x6a   : > { %857 = vmatpush1.msra.mxu1 %v536_v38  ;;  %3300 = vmatprep.subr.mxu0 %v520_v44 }
  0x6b   : > { %858 = vmatprep.subr.mxu1 %v4208_v0  ;;  %3301 = vmatpush3.msra.mxu0 %v504_v58 }
  0x6c   : > { %859 = vmatpush1.msra.mxu1 %v535_v41  ;;  %3302 = vmatprep.subr.mxu0 %v519_v62 }
  0x6d   : > { %860 = vmatprep.subr.mxu1 %v4208_v0  ;;  %3303 = vmatpush3.msra.mxu0 %v503_v5 }
  0x6e   : > { %861 = vmatpush1.msra.mxu1 %v534_v45  ;;  %3304 = vmatprep.subr.mxu0 %v518_v6 }
  0x6f   : > { %862 = vmatprep.subr.mxu1 %v4208_v0  ;;  %3305 = vmatpush3.msra.mxu0 %v502_v8 }
  0x70   : > { %863 = vmatpush1.msra.mxu1 %v533_v2  ;;  %3306 = vmatprep.subr.mxu0 %v517_v10 }
  0x71   : > { %864 = vmatprep.subr.mxu1 %v4208_v0  ;;  %3307 = vmatpush3.msra.mxu0 %v501_v14 }
  0x72   : > { %865 = vmatpush1.msra.mxu1 %v532_v7  ;;  %3308 = vmatprep.subr.mxu0 %v516_v15 }
  0x73   : > { %886 = vmatprep.subr.mxu1 %v4208_v0  ;;  %3309 = vmatpush3.msra.mxu0 %v500_v19 }
  0x74   : > { %887 = vmatpush2.msra.mxu1 %v553_v11 }
  0x75   : > { %888 = vmatprep.subr.mxu1 %v4208_v0 }
  0x76   : > { %889 = vmatpush2.msra.mxu1 %v552_v16 }
  0x77   : > { %890 = vmatprep.subr.mxu1 %v4208_v0 }
  0x78   : > { %891 = vmatpush2.msra.mxu1 %v551_v22  ;;  %v926_v22 = vld [vmem:[#allocation7 + $0x78] sm:$0xff] }
  0x79   : > { %892 = vmatprep.subr.mxu1 %v4208_v0 }
  0x7a   : > { %893 = vmatpush2.msra.mxu1 %v550_v24  ;;  %v925_v24 = vld [vmem:[#allocation7 + $0x70] sm:$0xff] }
  0x7b   : > { %894 = vmatprep.subr.mxu1 %v4208_v0 }
  0x7c   : > { %895 = vmatpush2.msra.mxu1 %v549_v28  ;;  %v973_v28 = vld [vmem:[#allocation7 + $0x1f0] sm:$0xff] }
  0x7d   : > { %896 = vmatprep.subr.mxu1 %v4208_v0 }
  0x7e   : > { %897 = vmatpush2.msra.mxu1 %v548_v32  ;;  %v972_v32 = vld [vmem:[#allocation7 + $0x1e8] sm:$0xff] }
  0xcb   : > { %v567_v35 = vpop.permute.xlu0 %566  ;;  %v571_v36 = vpop.permute.xlu1 %570 }
  0xcc   : > { %576 = vst.msk [vmem:[#allocation2] sm:$0xfe] %vm575_vm4, %v567_v35  ;;  %vm1079_vm4 = vcmask 64513  }
  0xcd   : > { %580 = vst.msk [vmem:[#allocation2 + $0x20] sm:$0x1] %vm579_vm5, %v571_v36  ;;  %vm1085_vm5 = vcmask 1040448  }
  0xcf   : > { %v569_v42 = vpop.permute.xlu0 %568 }
  0xd0   : > { %578 = vst.msk [vmem:[#allocation2 + $0x10] sm:$0xff] %vm577_vm6, %v569_v42  ;;  %vm1087_vm6 = vcmask 57344  }
  0xd3   : > { %v599_v46 = vld [vmem:[#allocation2] sm:$0xff] }
  0xd4   : > { %603 = vrot.lane.b32.xlu1 %v599_v46, %s4210_s19  ;;  %v636_v47 = vld [vmem:[#allocation2] sm:$0xfe]  ;;  %584 = vst.msk [vmem:[#allocation3] sm:$0xff] %vm583_vm7, %v599_v46  ;;  %v4453_v56 = vld [vmem:[#allocation2 + $0x20] sm:$0x1] }
  0xd5   : > { %v615_v48 = vld [vmem:[#allocation2] sm:$0xfe]  ;;  %v642_v54 = vrot.slane %v636_v47, 1  ;;  %v4455_v57 = vld [vmem:[#allocation2 + $0x20] sm:$0x1]  ;;  %v625_v26 = vrot.slane %v4453_v56, 1 }
  0xd6   : > { %v656_v49 = vld [vmem:[#allocation2] sm:$0xfe]  ;;  %v622_v55 = vrot.slane %v615_v48, 1  ;;  %v4460_v60 = vld [vmem:[#allocation2 + $0x20] sm:$0x1]  ;;  %v645_v27 = vrot.slane %v4455_v57, 1 }
  0xd7   : > { %v720_v50 = vld [vmem:[#allocation2] sm:$0xfc]  ;;  %v4451_v53 = vld [vmem:[#allocation2 + $0x10] sm:$0xff]  ;;  %v4462_v61 = vld [vmem:[#allocation2 + $0x20] sm:$0x3]  ;;  %v662_v9 = vrot.slane %v656_v49, 1 }
  0xd8   : > { %v679_v51 = vld [vmem:[#allocation2] sm:$0xfc]  ;;  %v4458_v59 = vrot.slane %v4451_v53, 1  ;;  %585 = vst.msk [vmem:[#allocation3 + $0x48] sm:$0xff] %vm583_vm7, %v4451_v53  ;;  %1058 = vst [vmem:[#allocation2 + $0x10] sm:$0xff] %v4208_v0  ;;  %v727_v13 = vrot.slane %v4451_v53, 2 }
  0xd9   : > { %v4448_v52 = vld [vmem:[#allocation2] sm:$0xfc]  ;;  %v4467_v63 = vld [vmem:[#allocation2 + $0x20] sm:$0x3]  ;;  %v726_v17 = vrot.slane %v720_v50, 2  ;;  %v686_v18 = vrot.slane %v679_v51, 2 }
  0xda   : > { %1056 = vst [vmem:[#allocation2] sm:$0xff] %v4208_v0  ;;  %v4469_v1 = vld [vmem:[#allocation2 + $0x20] sm:$0x3]  ;;  %v644_v3 = vsel %vm621_vm8, %v642_v54, %v4458_v59  ;;  %v624_v4 = vsel %vm621_vm8, %v622_v55, %v4458_v59  ;;  %v664_v12 = vsel %vm621_vm8, %v662_v9, %v4458_v59  ;;  %v706_v23 = vrot.slane %v4448_v52, 2 }
  0xdb   : > { %1060 = vst [vmem:[#allocation2 + $0x20] sm:$0x3] %v4208_v0  ;;  %647 = vrot.lane.b32.xlu1 %v644_v3, %s4211_s22  ;;  %627 = vrot.lane.b32.xlu0 %v624_v4, %s4212_s30  ;;  %v728_v20 = vsel %vm685_vm9, %v726_v17, %v727_v13  ;;  %v688_v21 = vsel %vm685_vm9, %v686_v18, %v727_v13  ;;  %v665_v31 = vrot.slane %v4460_v60, 1  ;;  %v729_v34 = vrot.slane %v4462_v61, 2  ;;  %v3259_v3 = vld [vmem:[%s4923_s2] ss:$0 sm:$0xff] }
  0xdc   : > { %v708_v25 = vsel %vm685_vm9, %v706_v23, %v727_v13  ;;  %v626_v29 = vsel %vm621_vm8, %v4458_v59, %v625_v26  ;;  %v646_v30 = vsel %vm621_vm8, %v4458_v59, %v645_v27  ;;  %v689_v35 = vrot.slane %v4467_v63, 2  ;;  %v941_v23 = vld [vmem:[#allocation7 + $0xf0] sm:$0xff]  ;;  %v940_v26 = vld [vmem:[#allocation7 + $0xe8] sm:$0xff]  ;;  %v958_v27 = vld [vmem:[#allocation7 + $0x178] sm:$0xff] }
  0xdd   : > { %v666_v33 = vsel %vm621_vm8, %v4458_v59, %v665_v31  ;;  %v730_v36 = vsel %vm685_vm9, %v727_v13, %v729_v34  ;;  %v709_v38 = vrot.slane %v4469_v1, 2  ;;  %v939_v31 = vld [vmem:[#allocation7 + $0xe0] sm:$0xff] }
  0xde   : > { %v690_v37 = vsel %vm685_vm9, %v727_v13, %v689_v35  ;;  %v923_v34 = vld [vmem:[#allocation7 + $0x60] sm:$0xff] }
  0xdf   : > { %667 = vrot.lane.b32.xlu1 %v664_v12, %s4213_s15  ;;  %590 = vrot.lane.b32.xlu0 %v599_v46, %s4214_s16  ;;  %v710_v39 = vsel %vm685_vm9, %v727_v13, %v709_v38  ;;  %v971_v35 = vld [vmem:[#allocation7 + $0x1e0] sm:$0xff]  ;;  %v922_v38 = vld [vmem:[#allocation7 + $0x58] sm:$0xff] }
  0xe3   : > { %731 = vrot.lane.b32.xlu1 %v728_v20, %s4215_s17  ;;  %691 = vrot.lane.b32.xlu0 %v688_v21, %s4216_s20  ;;  %v942_v21 = vld [vmem:[#allocation7 + $0xf8] sm:$0xff] }
  0xe4   : > { %3316 = vmatprep.subr.mxu0 %v942_v21  ;;  %v1006_v21 = vld [vmem:[#allocation7 + $0x2f8] sm:$0xff] }
  0xe7   : > { %711 = vrot.lane.b32.xlu0 %v708_v25, %s4217_s23  ;;  %605 = vrot.lane.b32.xlu1 %v4451_v53, %s4210_s19  ;;  %v974_v25 = vld [vmem:[#allocation7 + $0x1f8] sm:$0xff]  ;;  %s4220_s19 = smov 112  }
  0xe8   : > { %3354 = vmatprep.subr.mxu1 %v974_v25 }
  0xeb   : > { %629 = vrot.lane.b32.xlu0 %v626_v29, %s4212_s30  ;;  %649 = vrot.lane.b32.xlu1 %v646_v30, %s4211_s22  ;;  %v924_v29 = vld [vmem:[#allocation7 + $0x68] sm:$0xff]  ;;  %v957_v30 = vld [vmem:[#allocation7 + $0x170] sm:$0xff] }
  0xef   : > { %669 = vrot.lane.b32.xlu1 %v666_v33, %s4213_s15  ;;  %592 = vrot.lane.b32.xlu0 %v4451_v53, %s4214_s16  ;;  %v956_v33 = vld [vmem:[#allocation7 + $0x168] sm:$0xff]  ;;  %s4223_s16 = smov 56  }
  0xf3   : > { %733 = vrot.lane.b32.xlu1 %v730_v36, %s4215_s17  ;;  %693 = vrot.lane.b32.xlu0 %v690_v37, %s4216_s20  ;;  %v938_v36 = vld [vmem:[#allocation7 + $0xd8] sm:$0xff]  ;;  %v955_v37 = vld [vmem:[#allocation7 + $0x160] sm:$0xff]  ;;  %s4224_s17 = smov 48  }
  0xf7   : > { %713 = vrot.lane.b32.xlu0 %v710_v39, %s4217_s23  ;;  %v970_v39 = vld [vmem:[#allocation7 + $0x1d8] sm:$0xff] }
 0x146   : > { %v604_v40 = vpop.permute.xlu1 %603 }
 0x147   : > { %612 = vst.msk [vmem:[#allocation3 + $0x8] sm:$0xff] %vm611_vm3, %v604_v40 }
 0x14d   : > { %v648_v41 = vpop.permute.xlu1 %647  ;;  %v628_v42 = vpop.permute.xlu0 %627 }
 0x14e   : > { %634 = vst.msk [vmem:[#allocation3 + $0x8] sm:$0xff] %vm633_vm10, %v628_v42  ;;  %v921_v42 = vld [vmem:[#allocation7 + $0x50] sm:$0xff] }
 0x14f   : > { %654 = vst.msk [vmem:[#allocation3 + $0x8] sm:$0xff] %vm653_vm11, %v648_v41  ;;  %v954_v41 = vld [vmem:[#allocation7 + $0x158] sm:$0xff] }
 0x151   : > { %v668_v43 = vpop.permute.xlu1 %667  ;;  %v591_v44 = vpop.permute.xlu0 %590 }
 0x152   : > { %674 = vst.msk [vmem:[#allocation3 + $0x8] sm:$0xff] %vm673_vm12, %v668_v43 }
 0x153   : > { %676 = vst.msk [vmem:[#allocation3 + $0x10] sm:$0xff] %vm675_vm13, %v668_v43  ;;  %v969_v43 = vld [vmem:[#allocation7 + $0x1d0] sm:$0xff] }
 0x154   : > { %597 = vst.msk [vmem:[#allocation3] sm:$0xff] %vm596_vm14, %v591_v44  ;;  %v936_v44 = vld [vmem:[#allocation7 + $0xc8] sm:$0xff] }
 0x155   : > { %610 = vst.msk [vmem:[#allocation3] sm:$0xff] %vm609_vm15, %v604_v40  ;;  %v732_v45 = vpop.permute.xlu1 %731  ;;  %v692_v46 = vpop.permute.xlu0 %691  ;;  %v937_v40 = vld [vmem:[#allocation7 + $0xd0] sm:$0xff] }
 0x156   : > { %737 = vst.msk [vmem:[#allocation3 + $0x18] sm:$0xff] %vm583_vm7, %v732_v45  ;;  %v953_v45 = vld [vmem:[#allocation7 + $0x150] sm:$0xff] }
 0x157   : > { %698 = vst.msk [vmem:[#allocation3 + $0x10] sm:$0xff] %vm697_vm0, %v692_v46  ;;  %v920_v46 = vld [vmem:[#allocation7 + $0x48] sm:$0xff] }
 0x159   : > { %v712_v47 = vpop.permute.xlu0 %711  ;;  %v606_v48 = vpop.permute.xlu1 %605  ;;  %v740_v49 = vld [vmem:[#allocation3 + $0x8] sm:$0xff] }
 0x15a   : > { %718 = vst.msk [vmem:[#allocation3 + $0x10] sm:$0xff] %vm717_vm1, %v712_v47  ;;  %823 = vmatprep.mubr.f32.mxu0 %v740_v49  ;;  %v968_v47 = vld [vmem:[#allocation7 + $0x1c8] sm:$0xff] }
 0x15b   : > { %614 = vst.msk [vmem:[#allocation3 + $0x50] sm:$0xff] %vm611_vm3, %v606_v48  ;;  %vm1061_vm3 = vcmask 123904   ;;  %v952_v49 = vld [vmem:[#allocation7 + $0x148] sm:$0xff] }
 0x15c   : > { %v739_v50 = vld [vmem:[#allocation3] sm:$0xff]  ;;  %1062 = vst.msk [vmem:[#allocation2 + $0x28] sm:$0x3] %vm1061_vm3, %v4208_v0  ;;  %vm1989_vm3 = vcmask 588865  }
 0x15d   : > { %824 = vmatmul.mubr.f32.vlgmr.msra.gmra.mxu0 %v739_v50  ;;  %v630_v51 = vpop.permute.xlu0 %629  ;;  %v650_v52 = vpop.permute.xlu1 %649  ;;  %v742_v53 = vld [vmem:[#allocation3 + $0x18] sm:$0xff]  ;;  %v919_v50 = vld [vmem:[#allocation7 + $0x40] sm:$0xff] }
 0x15e   : > { %635 = vst.msk [vmem:[#allocation3 + $0x50] sm:$0xff] %vm633_vm10, %v630_v51  ;;  %3260 = vmatprep.mubr.msk.f32.mxu1 %vm583_vm7, %v742_v53  ;;  %3317 = vmatpush3.msra.mxu0 %v926_v22  ;;  %v967_v51 = vld [vmem:[#allocation7 + $0x1c0] sm:$0xff]  ;;  %vm1083_vm10 = vcmask 64512  }
 0x15f   : > { %655 = vst.msk [vmem:[#allocation3 + $0x50] sm:$0xff] %vm653_vm11, %v650_v52  ;;  %3318 = vmatprep.subr.mxu0 %v941_v23  ;;  %v934_v52 = vld [vmem:[#allocation7 + $0xb8] sm:$0xff]  ;;  %v951_v53 = vld [vmem:[#allocation7 + $0x140] sm:$0xff]  ;;  %vm2446_vm11 = vcmask 254976  }
 0x160   : > { %3319 = vmatpush3.msra.mxu0 %v925_v24  ;;  %v959_v22 = vld [vmem:[#allocation7 + $0x180] sm:$0xff]  ;;  %v1038_v24 = vld [vmem:[#allocation7 + $0x3f8] sm:$0xff] }
 0x161   : > { %v670_v54 = vpop.permute.xlu1 %669  ;;  %v593_v55 = vpop.permute.xlu0 %592  ;;  %v741_v56 = vld [vmem:[#allocation3 + $0x10] sm:$0xff]  ;;  %3320 = vmatprep.subr.mxu0 %v940_v26  ;;  %v943_v23 = vld [vmem:[#allocation7 + $0x100] sm:$0xff] }
 0x162   : > { %677 = vst.msk [vmem:[#allocation3 + $0x50] sm:$0xff] %vm673_vm12, %v670_v54  ;;  %899 = vmatmul.mubr.f32.vlgmr.msra.gmra.mxu1 %v741_v56  ;;  %3321 = vmatpush3.msra.mxu0 %v924_v29  ;;  %v933_v56 = vld [vmem:[#allocation7 + $0xb0] sm:$0xff]  ;;  %vm1982_vm12 = vcmask 648192  }
 0x163   : > { %678 = vst.msk [vmem:[#allocation3 + $0x58] sm:$0xff] %vm675_vm13, %v670_v54  ;;  %3355 = vmatpush3.msra.mxu1 %v958_v27  ;;  %3322 = vmatprep.subr.mxu0 %v939_v31  ;;  %v918_v54 = vld [vmem:[#allocation7 + $0x38] sm:$0xff] }
 0x164   : > { %598 = vst.msk [vmem:[#allocation3 + $0x48] sm:$0xff] %vm596_vm14, %v593_v55  ;;  %3356 = vmatprep.subr.mxu1 %v973_v28  ;;  %3323 = vmatpush3.msra.mxu0 %v923_v34  ;;  %v966_v55 = vld [vmem:[#allocation7 + $0x1b8] sm:$0xff]  ;;  %vm1132_vm14 = vcmask 916480  }
 0x165   : > { %613 = vst.msk [vmem:[#allocation3 + $0x48] sm:$0xff] %vm609_vm15, %v606_v48  ;;  %v734_v57 = vpop.permute.xlu1 %733  ;;  %v694_v58 = vpop.permute.xlu0 %693  ;;  %3357 = vmatpush3.msra.mxu1 %v957_v30  ;;  %3324 = vmatprep.subr.mxu0 %v938_v36  ;;  %v935_v48 = vld [vmem:[#allocation7 + $0xc0] sm:$0xff]  ;;  %vm4221_vm15 = vmmov 0  }
 0x166   : > { %738 = vst.msk [vmem:[#allocation3 + $0x60] sm:$0xff] %vm583_vm7, %v734_v57  ;;  %3358 = vmatprep.subr.mxu1 %v972_v32  ;;  %3325 = vmatpush3.msra.mxu0 %v922_v38  ;;  %v950_v57 = vld [vmem:[#allocation7 + $0x138] sm:$0xff] }
 0x167   : > { %699 = vst.msk [vmem:[#allocation3 + $0x58] sm:$0xff] %vm697_vm0, %v694_v58  ;;  %3359 = vmatpush3.msra.mxu1 %v956_v33  ;;  %3326 = vmatprep.subr.mxu0 %v937_v40  ;;  %v917_v58 = vld [vmem:[#allocation7 + $0x30] sm:$0xff]  ;;  %vm1830_vm0 = vcmask 121856  }
 0x168   : > { %3360 = vmatprep.subr.mxu1 %v971_v35  ;;  %3327 = vmatpush3.msra.mxu0 %v921_v42 }
 0x169   : > { %v714_v59 = vpop.permute.xlu0 %713  ;;  %v744_v60 = vld [vmem:[#allocation3 + $0x50] sm:$0xff]  ;;  %3361 = vmatpush3.msra.mxu1 %v955_v37  ;;  %3328 = vmatprep.subr.mxu0 %v936_v44 }
 0x16a   : > { %719 = vst.msk [vmem:[#allocation3 + $0x58] sm:$0xff] %vm717_vm1, %v714_v59  ;;  %828 = vmatprep.mubr.f32.mxu0 %v744_v60  ;;  %3362 = vmatprep.subr.mxu1 %v970_v39  ;;  %v965_v59 = vld [vmem:[#allocation7 + $0x1b0] sm:$0xff]  ;;  %v932_v60 = vld [vmem:[#allocation7 + $0xa8] sm:$0xff]  ;;  %vm1980_vm1 = vcmask 654336  }
 0x16b   : > { %3363 = vmatpush3.msra.mxu1 %v954_v41  ;;  %3329 = vmatpush3.msra.mxu0 %v920_v46 }
 0x16c   : > { %v743_v61 = vld [vmem:[#allocation3 + $0x48] sm:$0xff]  ;;  %3364 = vmatprep.subr.mxu1 %v969_v43  ;;  %3330 = vmatprep.subr.mxu0 %v935_v48 }
 0x16d   : > { %829 = vmatmul.mubr.f32.gmra.mxu0 %v743_v61  ;;  %v746_v62 = vld [vmem:[#allocation3 + $0x60] sm:$0xff]  ;;  %3365 = vmatpush3.msra.mxu1 %v953_v45  ;;  %v949_v61 = vld [vmem:[#allocation7 + $0x130] sm:$0xff] }
 0x16e   : > { %3261 = vmatprep.mubr.msk.f32.mxu1 %vm583_vm7, %v746_v62  ;;  %3366 = vmatprep.subr.mxu1 %v968_v47  ;;  %v916_v62 = vld [vmem:[#allocation7 + $0x28] sm:$0xff]  ;;  %vm1081_vm7 = vcmask 1047616  }
 0x16f   : > { %3367 = vmatpush3.msra.mxu1 %v952_v49  ;;  %3331 = vmatpush3.msra.mxu0 %v919_v50 }
 0x170   : > { %3368 = vmatprep.subr.mxu1 %v967_v51  ;;  %3332 = vmatprep.subr.mxu0 %v934_v52 }
 0x171   : > { %v745_v63 = vld [vmem:[#allocation3 + $0x58] sm:$0xff]  ;;  %3369 = vmatpush3.msra.mxu1 %v951_v53  ;;  %3333 = vmatpush3.msra.mxu0 %v918_v54 }
 0x172   : > { %904 = vmatmul.mubr.f32.gmra.mxu1 %v745_v63  ;;  %3370 = vmatprep.subr.mxu1 %v966_v55  ;;  %v931_v63 = vld [vmem:[#allocation7 + $0xa0] sm:$0xff] }
 0x173   : > { %3334 = vmatprep.subr.mxu0 %v933_v56  ;;  %3371 = vmatpush3.msra.mxu1 %v950_v57 }
 0x174   : > { %3335 = vmatpush3.msra.mxu0 %v917_v58  ;;  %3372 = vmatprep.subr.mxu1 %v965_v59 }
 0x175   : > { %3336 = vmatprep.subr.mxu0 %v932_v60  ;;  %3373 = vmatpush3.msra.mxu1 %v949_v61 }
 0x176   : > { %3337 = vmatpush3.msra.mxu0 %v916_v62 }
 0x177   : > { %3338 = vmatprep.subr.mxu0 %v931_v63 }
 0x21d   : > { %v3310_v1 = vpop.f32.mrf.mxu0 }
 0x21f   : > { %v3311_v2 = vpop.f32.mrf.mxu0 }
 0x220   : > { %v3312_v4 = vadd.f32 %v3311_v2, %v3310_v1  ;;  %v915_v1 = vld [vmem:[#allocation7 + $0x20] sm:$0xff]  ;;  %v964_v2 = vld [vmem:[#allocation7 + $0x1a8] sm:$0xff] }
 0x221   : > { %3339 = vmatpush3.msra.mxu0 %v915_v1  ;;  %3374 = vmatprep.subr.mxu1 %v964_v2 }
 0x222   : > { %v826_v5 = vadd.f32 %v3312_v4, %v3259_v3  ;;  %v900_v6 = vpop.f32.mrf.mxu1  ;;  %v948_v4 = vld [vmem:[#allocation7 + $0x128] sm:$0xff] }
 0x223   : > { %3375 = vmatpush3.msra.mxu1 %v948_v4 }
 0x224   : > { %v901_v7 = vadd.f32 %v900_v6, %v826_v5  ;;  %v902_v8 = vpop.f32.mrf.mxu1  ;;  %v914_v5 = vld [vmem:[#allocation7 + $0x18] sm:$0xff]  ;;  %v963_v6 = vld [vmem:[#allocation7 + $0x1a0] sm:$0xff] }
 0x225   : > { %3376 = vmatprep.subr.mxu1 %v963_v6  ;;  %v947_v8 = vld [vmem:[#allocation7 + $0x120] sm:$0xff] }
 0x226   : > { %v909_v9 = vmax.f32 %v901_v7, 0.0  ;;  %v929_v7 = vld [vmem:[#allocation7 + $0x90] sm:$0xff]  ;;  %3377 = vmatpush3.msra.mxu1 %v947_v8 }
 0x228   : > { %v1065_v10 = vrot.slane %v909_v9, 7  ;;  %v913_v9 = vld [vmem:[#allocation7 + $0x10] sm:$0xff] }
 0x22a   : > { %1068 = vrot.lane.b32.xlu1 %v1065_v10, %s4218_s27 }
 0x22d   : > { %v3313_v11 = vpop.f32.mrf.mxu0 }
 0x22f   : > { %v3314_v12 = vpop.f32.mrf.mxu0 }
 0x230   : > { %v3315_v13 = vadd.f32 %v3314_v12, %v3313_v11  ;;  %v928_v11 = vld [vmem:[#allocation7 + $0x88] sm:$0xff]  ;;  %v946_v12 = vld [vmem:[#allocation7 + $0x118] sm:$0xff] }
 0x232   : > { %v831_v14 = vadd.f32 %v3315_v13, %v3259_v3  ;;  %v905_v15 = vpop.f32.mrf.mxu1  ;;  %v930_v3 = vld [vmem:[#allocation7 + $0x98] sm:$0xff] }
 0x233   : > { %3340 = vmatprep.subr.mxu0 %v930_v3 }
 0x234   : > { %v906_v16 = vadd.f32 %v905_v15, %v831_v14  ;;  %v907_v17 = vpop.f32.mrf.mxu1  ;;  %3341 = vmatpush3.msra.mxu0 %v914_v5  ;;  %v912_v14 = vld [vmem:[#allocation7 + $0x8] sm:$0xff]  ;;  %v961_v15 = vld [vmem:[#allocation7 + $0x190] sm:$0xff] }
 0x235   : > { %3342 = vmatprep.subr.mxu0 %v929_v7  ;;  %v945_v17 = vld [vmem:[#allocation7 + $0x110] sm:$0xff] }
 0x236   : > { %v910_v18 = vmax.f32 %v906_v16, 0.0  ;;  %3343 = vmatpush3.msra.mxu0 %v913_v9  ;;  %v927_v16 = vld [vmem:[#allocation7 + $0x80] sm:$0xff] }
 0x237   : > { %3344 = vmatprep.subr.mxu0 %v928_v11 }
 0x238   : > { %v1066_v19 = vrot.slane %v910_v18, 7  ;;  %3345 = vmatpush3.msra.mxu0 %v912_v14  ;;  %v911_v18 = vld [vmem:[#allocation7] sm:$0xff] }
 0x239   : > { %3346 = vmatprep.subr.mxu0 %v927_v16 }
 0x23a   : > { %1072 = vrot.lane.b32.xlu1 %v1066_v19, %s4218_s27  ;;  %v1067_v20 = vsel %vm562_vm2, %v1065_v10, %v1066_v19  ;;  %vm1077_vm2 = vcmask 1047617   ;;  %v962_v10 = vld [vmem:[#allocation7 + $0x198] sm:$0xff]  ;;  %v960_v19 = vld [vmem:[#allocation7 + $0x188] sm:$0xff]  ;;  %3347 = vmatpush3.msra.mxu0 %v911_v18 }
 0x23b   : > { %1070 = vrot.lane.b32.xlu0 %v1067_v20, %s4218_s27  ;;  %3378 = vmatprep.subr.mxu1 %v962_v10  ;;  %v944_v20 = vld [vmem:[#allocation7 + $0x108] sm:$0xff] }
 0x23c   : > { %3379 = vmatpush3.msra.mxu1 %v946_v12  ;;  %3392 = vmatprep.subr.mxu0 %v1006_v21 }
 0x23d   : > { %3380 = vmatprep.subr.mxu1 %v961_v15 }
 0x23e   : > { %3381 = vmatpush3.msra.mxu1 %v945_v17 }
 0x23f   : > { %3382 = vmatprep.subr.mxu1 %v960_v19 }
 0x240   : > { %3383 = vmatpush3.msra.mxu1 %v944_v20 }
 0x241   : > { %3384 = vmatprep.subr.mxu1 %v959_v22 }
 0x242   : > { %3385 = vmatpush3.msra.mxu1 %v943_v23 }
 0x243   : > { %3430 = vmatprep.subr.mxu1 %v1038_v24 }
 0x29c   : > { %v1069_v13 = vpop.permute.xlu1 %1068 }
 0x29d   : > { %1078 = vst.msk [vmem:[#allocation2] sm:$0xfe] %vm1077_vm2, %v1069_v13  ;;  %vm1991_vm2 = vcmask 581696  }
 0x29e   : > { %1080 = vst.msk [vmem:[#allocation2 + $0x8] sm:$0xfe] %vm1079_vm4, %v1069_v13  ;;  %vm1994_vm4 = vcmask 523264  }
 0x2a4   : > { %v4550_v26 = vld [vmem:[#allocation2] sm:$0xff] }
 0x2a5   : > { %v1094_v25 = vld [vmem:[#allocation2 + $0x8] sm:$0xff]  ;;  %1101 = vrot.lane.b32.xlu0 %v4550_v26, %s4219_s14  ;;  %1091 = vst [vmem:[#allocation3] sm:$0xff] %v4550_v26  ;;  %v1190_v33 = vld [vmem:[#allocation2] sm:$0xfe] }
 0x2a6   : > { %1103 = vrot.lane.b32.xlu1 %v1094_v25, %s4219_s14  ;;  %v1191_v27 = vld [vmem:[#allocation2 + $0x8] sm:$0xfe]  ;;  %v1139_v34 = vld [vmem:[#allocation2] sm:$0xfe]  ;;  %v1202_v40 = vrot.slane %v1190_v33, 1 }
 0x2a7   : > { %v1155_v28 = vld [vmem:[#allocation2 + $0x8] sm:$0xfe]  ;;  %v1205_v38 = vrot.slane %v1191_v27, 1  ;;  %v1145_v41 = vrot.slane %v1139_v34, 1  ;;  %v1154_v44 = vld [vmem:[#allocation2] sm:$0xfe] }
 0x2a8   : > { %v4556_v29 = vld [vmem:[#allocation2 + $0x8] sm:$0xfc]  ;;  %v1169_v47 = vrot.slane %v1155_v28, 1  ;;  %v1166_v48 = vrot.slane %v1154_v44, 1  ;;  %v1241_v54 = vld [vmem:[#allocation2] sm:$0xfc] }
 0x2a9   : > { %v4558_v30 = vld [vmem:[#allocation2 + $0x8] sm:$0xfc]  ;;  %1124 = vrot.lane.b32.xlu0 %v4550_v26, %s4220_s19  ;;  %v1256_v60 = vrot.slane %v4556_v29, 2  ;;  %v1253_v61 = vrot.slane %v1241_v54, 2  ;;  %v1277_v16 = vld [vmem:[#allocation2] sm:$0xfc] }
 0x2aa   : > { %1126 = vrot.lane.b32.xlu1 %v1094_v25, %s4220_s19  ;;  %2444 = vst.msk [vmem:[#allocation2 + $0x8] sm:$0xff] %vm675_vm13, %v4208_v0  ;;  %v1292_v21 = vrot.slane %v4558_v30, 2  ;;  %v1289_v22 = vrot.slane %v1277_v16, 2  ;;  %vm1109_vm13 = vcmask 982016   ;;  %v990_v33 = vld [vmem:[#allocation7 + $0x278] sm:$0xff]  ;;  %v1005_v34 = vld [vmem:[#allocation7 + $0x2f0] sm:$0xff] }
 0x2ab   : > { %v1003_v44 = vld [vmem:[#allocation7 + $0x2e0] sm:$0xff]  ;;  %v1014_v16 = vld [vmem:[#allocation7 + $0x338] sm:$0xff] }
 0x2ac   : > { %v1073_v31 = vpop.permute.xlu1 %1072  ;;  %v1019_v54 = vld [vmem:[#allocation7 + $0x360] sm:$0xff] }
 0x2ad   : > { %1086 = vst.msk [vmem:[#allocation2 + $0x20] sm:$0x1] %vm1085_vm5, %v1073_v31  ;;  %v1071_v32 = vpop.permute.xlu0 %1070  ;;  %vm2001_vm5 = vcmask 1048064  }
 0x2ae   : > { %1088 = vst.msk [vmem:[#allocation2 + $0x28] sm:$0x1] %vm1087_vm6, %v1073_v31  ;;  %vm2455_vm6 = vcmask 130049  }
 0x2af   : > { %1082 = vst.msk [vmem:[#allocation2 + $0x10] sm:$0xff] %vm1081_vm7, %v1071_v32  ;;  %vm2459_vm7 = vcmask 122880  }
 0x2b0   : > { %1084 = vst.msk [vmem:[#allocation2 + $0x18] sm:$0xff] %vm1083_vm10, %v1071_v32  ;;  %vm2453_vm10 = vcmask 1047681  }
 0x2b4   : > { %v1141_v46 = vld [vmem:[#allocation2 + $0x20] sm:$0x1] }
 0x2b5   : > { %v1148_v49 = vrot.slane %v1141_v46, 1  ;;  %v1228_v55 = vld [vmem:[#allocation2 + $0x20] sm:$0x3]  ;;  %v1195_v58 = vld [vmem:[#allocation2 + $0x28] sm:$0x1]  ;;  %v987_v46 = vld [vmem:[#allocation7 + $0x260] sm:$0xff] }
 0x2b6   : > { %v4565_v35 = vld [vmem:[#allocation2 + $0x10] sm:$0xff]  ;;  %v1235_v57 = vrot.slane %v1228_v55, 2  ;;  %v1194_v59 = vld [vmem:[#allocation2 + $0x20] sm:$0x1]  ;;  %v1210_v2 = vrot.slane %v1195_v58, 1  ;;  %v984_v58 = vld [vmem:[#allocation7 + $0x248] sm:$0xff] }
 0x2b7   : > { %v1096_v36 = vld [vmem:[#allocation2 + $0x18] sm:$0xff]  ;;  %v1146_v37 = vrot.slane %v4565_v35, 1  ;;  %1092 = vst [vmem:[#allocation3 + $0x48] sm:$0xff] %v4565_v35  ;;  %1105 = vrot.lane.b32.xlu0 %v4565_v35, %s4219_s14  ;;  %1983 = vst.msk [vmem:[#allocation2 + $0x10] sm:$0x3] %vm1982_vm12, %v4208_v0  ;;  %v4587_v53 = vrot.slane %v4565_v35, 2 }
 0x2b8   : > { %1107 = vrot.lane.b32.xlu1 %v1096_v36, %s4219_s14  ;;  %v1206_v39 = vrot.slane %v1096_v36, 1  ;;  %2447 = vst.msk [vmem:[#allocation2 + $0x18] sm:$0x3] %vm2446_vm11, %v4208_v0  ;;  %v1257_v56 = vrot.slane %v1096_v36, 2  ;;  %v1208_v3 = vrot.slane %v1194_v59, 1  ;;  %v985_v55 = vld [vmem:[#allocation7 + $0x250] sm:$0xff] }
 0x2b9   : > { %v1204_v43 = vsel %vm621_vm8, %v1202_v40, %v1146_v37  ;;  %v1147_v45 = vsel %vm621_vm8, %v1145_v41, %v1146_v37  ;;  %v1168_v51 = vsel %vm621_vm8, %v1166_v48, %v1146_v37  ;;  %v4584_v52 = vsel %vm621_vm8, %v1146_v37, %v1148_v49  ;;  %v1159_v4 = vld [vmem:[#allocation2 + $0x28] sm:$0x1]  ;;  %v1158_v5 = vld [vmem:[#allocation2 + $0x20] sm:$0x1]  ;;  %v1020_v48 = vld [vmem:[#allocation7 + $0x368] sm:$0xff] }
 0x2ba   : > { %v1207_v42 = vsel %vm621_vm8, %v1205_v38, %v1206_v39  ;;  %1152 = vst [vmem:[#allocation3 + $0x18] sm:$0xff] %v1147_v45  ;;  %1476 = vmatprep.mubr.f32.mxu1 %v1147_v45  ;;  %v1171_v50 = vsel %vm621_vm8, %v1169_v47, %v1206_v39  ;;  %1153 = vst [vmem:[#allocation3 + $0x60] sm:$0xff] %v4584_v52  ;;  %v4596_v62 = vsel %vm685_vm9, %v4587_v53, %v1235_v57  ;;  %v1246_v10 = vld [vmem:[#allocation2 + $0x28] sm:$0x3]  ;;  %v1245_v11 = vld [vmem:[#allocation2 + $0x20] sm:$0x3] }
 0x2bb   : > { %1212 = vrot.lane.b32.xlu0 %v1204_v43, %s4220_s19  ;;  %v1258_v63 = vsel %vm685_vm9, %v1256_v60, %v1257_v56  ;;  %v1255_v1 = vsel %vm685_vm9, %v1253_v61, %v4587_v53  ;;  %v1211_v6 = vsel %vm621_vm8, %v1206_v39, %v1210_v2  ;;  %v1209_v7 = vsel %vm621_vm8, %v1146_v37, %v1208_v3  ;;  %v1282_v19 = vld [vmem:[#allocation2 + $0x28] sm:$0x3]  ;;  %v1281_v20 = vld [vmem:[#allocation2 + $0x20] sm:$0x3]  ;;  %v1000_v57 = vld [vmem:[#allocation7 + $0x2c8] sm:$0xff] }
 0x2bc   : > { %1214 = vrot.lane.b32.xlu1 %v1207_v42, %s4220_s19  ;;  %v1174_v8 = vrot.slane %v1159_v4, 1  ;;  %v1172_v9 = vrot.slane %v1158_v5, 1  ;;  %v1261_v14 = vrot.slane %v1246_v10, 2  ;;  %v1259_v15 = vrot.slane %v1245_v11, 2  ;;  %v1022_v40 = vld [vmem:[#allocation7 + $0x378] sm:$0xff]  ;;  %v988_v42 = vld [vmem:[#allocation7 + $0x268] sm:$0xff] }
 0x2bd   : > { %v1294_v23 = vsel %vm685_vm9, %v1292_v21, %v1257_v56  ;;  %v1291_v24 = vsel %vm685_vm9, %v1289_v22, %v4587_v53  ;;  %v1297_v25 = vrot.slane %v1282_v19, 2  ;;  %v1295_v27 = vrot.slane %v1281_v20, 2  ;;  %v1037_v43 = vld [vmem:[#allocation7 + $0x3f0] sm:$0xff]  ;;  %v1002_v47 = vld [vmem:[#allocation7 + $0x2d8] sm:$0xff]  ;;  %v999_v60 = vld [vmem:[#allocation7 + $0x2c0] sm:$0xff] }
 0x2be   : > { %v1175_v12 = vsel %vm621_vm8, %v1206_v39, %v1174_v8  ;;  %v1173_v13 = vsel %vm621_vm8, %v1146_v37, %v1172_v9  ;;  %v1262_v17 = vsel %vm685_vm9, %v1257_v56, %v1261_v14  ;;  %v1260_v18 = vsel %vm685_vm9, %v4587_v53, %v1259_v15  ;;  %v1004_v39 = vld [vmem:[#allocation7 + $0x2e8] sm:$0xff]  ;;  %v1021_v45 = vld [vmem:[#allocation7 + $0x370] sm:$0xff]  ;;  %v986_v49 = vld [vmem:[#allocation7 + $0x258] sm:$0xff] }
 0x2bf   : > { %1176 = vrot.lane.b32.xlu0 %v1168_v51, %s4219_s14  ;;  %v1298_v28 = vsel %vm685_vm9, %v1257_v56, %v1297_v25  ;;  %v1296_v29 = vsel %vm685_vm9, %v4587_v53, %v1295_v27  ;;  %v1001_v51 = vld [vmem:[#allocation7 + $0x2d0] sm:$0xff]  ;;  %v1034_v56 = vld [vmem:[#allocation7 + $0x3d8] sm:$0xff]  ;;  %v1016_v5 = vld [vmem:[#allocation7 + $0x348] sm:$0xff]  ;;  %vm2457_vm11 = vcmask 1040512   ;;  %vm2482_vm12 = vcmask 785408  }
 0x2c0   : > { %1178 = vrot.lane.b32.xlu1 %v1171_v50, %s4219_s14  ;;  %v1035_v50 = vld [vmem:[#allocation7 + $0x3e0] sm:$0xff]  ;;  %v1033_v59 = vld [vmem:[#allocation7 + $0x3d0] sm:$0xff]  ;;  %v998_v2 = vld [vmem:[#allocation7 + $0x2b8] sm:$0xff] }
 0x2c1   : > { %v1017_v61 = vld [vmem:[#allocation7 + $0x350] sm:$0xff]  ;;  %v1031_v8 = vld [vmem:[#allocation7 + $0x3c0] sm:$0xff]  ;;  %v1030_v14 = vld [vmem:[#allocation7 + $0x3b8] sm:$0xff] }
 0x2c2   : > { %v997_v9 = vld [vmem:[#allocation7 + $0x2b0] sm:$0xff]  ;;  %v1015_v10 = vld [vmem:[#allocation7 + $0x340] sm:$0xff]  ;;  %v996_v15 = vld [vmem:[#allocation7 + $0x2a8] sm:$0xff] }
 0x2c3   : > { %1128 = vrot.lane.b32.xlu0 %v4565_v35, %s4220_s19  ;;  %v981_v11 = vld [vmem:[#allocation7 + $0x230] sm:$0xff]  ;;  %v995_v20 = vld [vmem:[#allocation7 + $0x2a0] sm:$0xff]  ;;  %v1028_v25 = vld [vmem:[#allocation7 + $0x3a8] sm:$0xff] }
 0x2c4   : > { %1130 = vrot.lane.b32.xlu1 %v1096_v36, %s4220_s19  ;;  %v989_v36 = vld [vmem:[#allocation7 + $0x270] sm:$0xff]  ;;  %v994_v27 = vld [vmem:[#allocation7 + $0x298] sm:$0xff] }
 0x2c5   : > { %v1029_v19 = vld [vmem:[#allocation7 + $0x3b0] sm:$0xff] }
 0x2c6   : > { %v1013_v21 = vld [vmem:[#allocation7 + $0x330] sm:$0xff] }
 0x2c7   : > { %1263 = vrot.lane.b32.xlu0 %v1255_v1, %s4219_s14  ;;  %v1032_v1 = vld [vmem:[#allocation7 + $0x3c8] sm:$0xff] }
 0x2c8   : > { %1265 = vrot.lane.b32.xlu1 %v1258_v63, %s4219_s14  ;;  %v983_v63 = vld [vmem:[#allocation7 + $0x240] sm:$0xff] }
 0x2cb   : > { %1216 = vrot.lane.b32.xlu0 %v1209_v7, %s4220_s19  ;;  %v982_v7 = vld [vmem:[#allocation7 + $0x238] sm:$0xff] }
 0x2cc   : > { %1218 = vrot.lane.b32.xlu1 %v1211_v6, %s4220_s19 }
 0x2cf   : > { %1180 = vrot.lane.b32.xlu0 %v1173_v13, %s4219_s14 }
 0x2d0   : > { %1182 = vrot.lane.b32.xlu1 %v1175_v12, %s4219_s14 }
 0x2d3   : > { %1267 = vrot.lane.b32.xlu0 %v1260_v18, %s4219_s14 }
 0x2d4   : > { %1269 = vrot.lane.b32.xlu1 %v1262_v17, %s4219_s14  ;;  %v980_v17 = vld [vmem:[#allocation7 + $0x228] sm:$0xff] }
 0x2d7   : > { %1299 = vrot.lane.b32.xlu0 %v1291_v24, %s4220_s19  ;;  %v979_v24 = vld [vmem:[#allocation7 + $0x220] sm:$0xff] }
 0x2d8   : > { %1301 = vrot.lane.b32.xlu1 %v1294_v23, %s4220_s19 }
 0x2db   : > { %1303 = vrot.lane.b32.xlu0 %v1296_v29, %s4220_s19  ;;  %v978_v29 = vld [vmem:[#allocation7 + $0x218] sm:$0xff] }
 0x2dc   : > { %1305 = vrot.lane.b32.xlu1 %v1298_v28, %s4220_s19  ;;  %v1012_v28 = vld [vmem:[#allocation7 + $0x328] sm:$0xff] }
 0x317   : > { %v1102_v31 = vpop.permute.xlu0 %1101 }
 0x318   : > { %v1104_v30 = vpop.permute.xlu1 %1103 }
 0x319   : > { %v1110_v32 = vsel %vm1109_vm13, %v1102_v31, %v1104_v30  ;;  %v1027_v30 = vld [vmem:[#allocation7 + $0x3a0] sm:$0xff]  ;;  %v993_v31 = vld [vmem:[#allocation7 + $0x290] sm:$0xff] }
 0x31a   : > { %1114 = vst [vmem:[#allocation3 + $0x8] sm:$0xff] %v1110_v32  ;;  %1401 = vmatprep.mubr.f32.mxu0 %v1110_v32  ;;  %v1011_v32 = vld [vmem:[#allocation7 + $0x320] sm:$0xff] }
 0x31b   : > { %1402 = vmatmul.mubr.f32.vlgmr.msra.gmra.mxu0 %v4550_v26  ;;  %v1125_v38 = vpop.permute.xlu0 %1124  ;;  %v1036_v26 = vld [vmem:[#allocation7 + $0x3e8] sm:$0xff] }
 0x31c   : > { %v1127_v37 = vpop.permute.xlu1 %1126  ;;  %3393 = vmatpush3.msra.mxu0 %v990_v33 }
 0x31d   : > { %v1133_v41 = vsel %vm1132_vm14, %v1125_v38, %v1127_v37  ;;  %3394 = vmatprep.subr.mxu0 %v1005_v34  ;;  %v1026_v37 = vld [vmem:[#allocation7 + $0x398] sm:$0xff] }
 0x31e   : > { %1137 = vst [vmem:[#allocation3 + $0x10] sm:$0xff] %v1133_v41  ;;  %3395 = vmatpush3.msra.mxu0 %v989_v36  ;;  %1477 = vmatmul.mubr.f32.vlgmr.msra.gmra.mxu1 %v1133_v41  ;;  %v977_v36 = vld [vmem:[#allocation7 + $0x210] sm:$0xff]  ;;  %v976_v41 = vld [vmem:[#allocation7 + $0x208] sm:$0xff] }
 0x31f   : > { %3396 = vmatprep.subr.mxu0 %v1004_v39  ;;  %3431 = vmatpush3.msra.mxu1 %v1022_v40  ;;  %v992_v39 = vld [vmem:[#allocation7 + $0x288] sm:$0xff]  ;;  %v1010_v40 = vld [vmem:[#allocation7 + $0x318] sm:$0xff] }
 0x320   : > { %1481 = vmatprep.mubr.f32.mxu1 %v4584_v52  ;;  %3397 = vmatpush3.msra.mxu0 %v988_v42  ;;  %v1018_v52 = vld [vmem:[#allocation7 + $0x358] sm:$0xff]  ;;  %v1025_v42 = vld [vmem:[#allocation7 + $0x390] sm:$0xff] }
 0x321   : > { %3432 = vmatprep.subr.mxu1 %v1037_v43  ;;  %3398 = vmatprep.subr.mxu0 %v1003_v44  ;;  %v991_v43 = vld [vmem:[#allocation7 + $0x280] sm:$0xff] }
 0x322   : > { %3433 = vmatpush3.msra.mxu1 %v1021_v45  ;;  %3399 = vmatpush3.msra.mxu0 %v987_v46  ;;  %v1009_v46 = vld [vmem:[#allocation7 + $0x310] sm:$0xff] }
 0x323   : > { %3434 = vmatprep.subr.mxu1 %v1036_v26  ;;  %3400 = vmatprep.subr.mxu0 %v1002_v47  ;;  %v975_v26 = vld [vmem:[#allocation7 + $0x200] sm:$0xff]  ;;  %v1024_v47 = vld [vmem:[#allocation7 + $0x388] sm:$0xff] }
 0x324   : > { %3435 = vmatpush3.msra.mxu1 %v1020_v48  ;;  %3401 = vmatpush3.msra.mxu0 %v986_v49  ;;  %v1008_v48 = vld [vmem:[#allocation7 + $0x308] sm:$0xff]  ;;  %v1054_v49 = vld [vmem:[#allocation7 + $0x478] sm:$0xff] }
 0x325   : > { %3436 = vmatprep.subr.mxu1 %v1035_v50  ;;  %3402 = vmatprep.subr.mxu0 %v1001_v51  ;;  %v1226_v50 = vld [vmem:[#allocation2] sm:$0xfc] }
 0x326   : > { %3437 = vmatpush3.msra.mxu1 %v1019_v54  ;;  %3403 = vmatpush3.msra.mxu0 %v985_v55  ;;  %v1023_v54 = vld [vmem:[#allocation7 + $0x380] sm:$0xff]  ;;  %1981 = vst.msk [vmem:[#allocation2] sm:$0xff] %vm1980_vm1, %v4208_v0 }
 0x327   : > { %3438 = vmatprep.subr.mxu1 %v1034_v56  ;;  %3404 = vmatprep.subr.mxu0 %v1000_v57  ;;  %v1007_v57 = vld [vmem:[#allocation7 + $0x300] sm:$0xff] }
 0x328   : > { %3439 = vmatpush3.msra.mxu1 %v1018_v52  ;;  %3405 = vmatpush3.msra.mxu0 %v984_v58  ;;  %v1053_v58 = vld [vmem:[#allocation7 + $0x470] sm:$0xff] }
 0x329   : > { %v1106_v4 = vpop.permute.xlu0 %1105  ;;  %3440 = vmatprep.subr.mxu1 %v1033_v59  ;;  %3406 = vmatprep.subr.mxu0 %v999_v60  ;;  %v1232_v59 = vrot.slane %v1226_v50, 2  ;;  %v3262_v50 = vld [vmem:[%s4925_s4] ss:$0 sm:$0xff] }
 0x32a   : > { %v1108_v3 = vpop.permute.xlu1 %1107  ;;  %3441 = vmatpush3.msra.mxu1 %v1017_v61  ;;  %3407 = vmatpush3.msra.mxu0 %v983_v63  ;;  %v1052_v61 = vld [vmem:[#allocation7 + $0x468] sm:$0xff] }
 0x32b   : > { %v1111_v6 = vsel %vm1109_vm13, %v1106_v4, %v1108_v3  ;;  %3442 = vmatprep.subr.mxu1 %v1032_v1  ;;  %3408 = vmatprep.subr.mxu0 %v998_v2  ;;  %v1234_v60 = vsel %vm685_vm9, %v1232_v59, %v4587_v53  ;;  %v1051_v3 = vld [vmem:[#allocation7 + $0x460] sm:$0xff]  ;;  %v1050_v4 = vld [vmem:[#allocation7 + $0x458] sm:$0xff]  ;;  %v1049_v53 = vld [vmem:[#allocation7 + $0x450] sm:$0xff] }
 0x32c   : > { %1115 = vst [vmem:[#allocation3 + $0x50] sm:$0xff] %v1111_v6  ;;  %3443 = vmatpush3.msra.mxu1 %v1016_v5  ;;  %1406 = vmatprep.mubr.f32.mxu0 %v1111_v6  ;;  %v1715_v59 = vld [vmem:[%s4926_s5 + $0x8] sm:$0xff] }
 0x32d   : > { %v1213_v13 = vpop.permute.xlu0 %1212  ;;  %3409 = vmatpush3.msra.mxu0 %v982_v7  ;;  %3444 = vmatprep.subr.mxu1 %v1031_v8  ;;  %v1048_v8 = vld [vmem:[#allocation7 + $0x448] sm:$0xff] }
 0x32e   : > { %v1215_v12 = vpop.permute.xlu1 %1214  ;;  %1407 = vmatmul.mubr.f32.gmra.mxu0 %v4565_v35  ;;  %3410 = vmatprep.subr.mxu0 %v997_v9 }
 0x32f   : > { %v1220_v18 = vsel %vm1132_vm14, %v1213_v13, %v1215_v12  ;;  %3445 = vmatpush3.msra.mxu1 %v1015_v10  ;;  %3411 = vmatpush3.msra.mxu0 %v981_v11  ;;  %v1047_v12 = vld [vmem:[#allocation7 + $0x440] sm:$0xff]  ;;  %v1046_v13 = vld [vmem:[#allocation7 + $0x438] sm:$0xff] }
 0x330   : > { %3446 = vmatprep.subr.mxu1 %v1030_v14  ;;  %3412 = vmatprep.subr.mxu0 %v996_v15 }
 0x331   : > { %v1177_v23 = vpop.permute.xlu0 %1176  ;;  %3447 = vmatpush3.msra.mxu1 %v1014_v16  ;;  %3413 = vmatpush3.msra.mxu0 %v980_v17  ;;  %v1045_v17 = vld [vmem:[#allocation7 + $0x430] sm:$0xff] }
 0x332   : > { %v1179_v22 = vpop.permute.xlu1 %1178  ;;  %1551 = vmatprep.mubr.f32.mxu0 %v1220_v18  ;;  %3448 = vmatprep.subr.mxu1 %v1029_v19  ;;  %v1043_v18 = vld [vmem:[#allocation7 + $0x420] sm:$0xff]  ;;  %v1042_v19 = vld [vmem:[#allocation7 + $0x418] sm:$0xff] }
 0x333   : > { %v1184_v35 = vsel %vm1109_vm13, %v1177_v23, %v1179_v22  ;;  %3414 = vmatprep.subr.mxu0 %v995_v20  ;;  %3449 = vmatpush3.msra.mxu1 %v1013_v21  ;;  %v1041_v20 = vld [vmem:[#allocation7 + $0x410] sm:$0xff]  ;;  %v1040_v21 = vld [vmem:[#allocation7 + $0x408] sm:$0xff]  ;;  %v1039_v22 = vld [vmem:[#allocation7 + $0x400] sm:$0xff] }
 0x334   : > { %1188 = vst [vmem:[#allocation3 + $0x20] sm:$0xff] %v1184_v35  ;;  %3415 = vmatpush3.msra.mxu0 %v979_v24  ;;  %3450 = vmatprep.subr.mxu1 %v1028_v25  ;;  %v1728_v23 = vld [vmem:[%s4926_s5 + $0x70] sm:$0xff]  ;;  %v1727_v24 = vld [vmem:[%s4926_s5 + $0x68] sm:$0xff]  ;;  %v1726_v25 = vld [vmem:[%s4926_s5 + $0x60] sm:$0xff] }
 0x335   : > { %v1129_v34 = vpop.permute.xlu0 %1128  ;;  %3416 = vmatprep.subr.mxu0 %v994_v27  ;;  %3451 = vmatpush3.msra.mxu1 %v1012_v28  ;;  %v1724_v27 = vld [vmem:[%s4926_s5 + $0x50] sm:$0xff]  ;;  %v1723_v28 = vld [vmem:[%s4926_s5 + $0x48] sm:$0xff] }
 0x336   : > { %v1131_v33 = vpop.permute.xlu1 %1130  ;;  %3417 = vmatpush3.msra.mxu0 %v978_v29  ;;  %3452 = vmatprep.subr.mxu1 %v1027_v30  ;;  %v1722_v29 = vld [vmem:[%s4926_s5 + $0x40] sm:$0xff]  ;;  %v1721_v30 = vld [vmem:[%s4926_s5 + $0x38] sm:$0xff] }
 0x337   : > { %v1134_v38 = vsel %vm1132_vm14, %v1129_v34, %v1131_v33  ;;  %3418 = vmatprep.subr.mxu0 %v993_v31  ;;  %3453 = vmatpush3.msra.mxu1 %v1011_v32  ;;  %v1720_v31 = vld [vmem:[%s4926_s5 + $0x30] sm:$0xff]  ;;  %v1719_v32 = vld [vmem:[%s4926_s5 + $0x28] sm:$0xff]  ;;  %v1718_v33 = vld [vmem:[%s4926_s5 + $0x20] sm:$0xff] }
 0x338   : > { %1138 = vst [vmem:[#allocation3 + $0x58] sm:$0xff] %v1134_v38  ;;  %3419 = vmatpush3.msra.mxu0 %v977_v36  ;;  %3454 = vmatprep.subr.mxu1 %v1026_v37  ;;  %v1717_v34 = vld [vmem:[%s4926_s5 + $0x18] sm:$0xff]  ;;  %v1716_v36 = vld [vmem:[%s4926_s5 + $0x10] sm:$0xff] }
 0x339   : > { %v1264_v45 = vpop.permute.xlu0 %1263  ;;  %3420 = vmatprep.subr.mxu0 %v992_v39  ;;  %3455 = vmatpush3.msra.mxu1 %v1010_v40 }
 0x33a   : > { %v1266_v44 = vpop.permute.xlu1 %1265  ;;  %1482 = vmatmul.mubr.f32.gmra.mxu1 %v1134_v38  ;;  %3421 = vmatpush3.msra.mxu0 %v976_v41 }
 0x33b   : > { %3456 = vmatprep.subr.mxu1 %v1025_v42  ;;  %3422 = vmatprep.subr.mxu0 %v991_v43  ;;  %v1271_v51 = vsel %vm1109_vm13, %v1264_v45, %v1266_v44 }
 0x33c   : > { %3457 = vmatpush3.msra.mxu1 %v1009_v46  ;;  %3423 = vmatpush3.msra.mxu0 %v975_v26 }
 0x33d   : > { %v1217_v56 = vpop.permute.xlu0 %1216  ;;  %3458 = vmatprep.subr.mxu1 %v1024_v47  ;;  %1552 = vmatmul.mubr.f32.vlgmr.msra.gmra.mxu0 %v1184_v35  ;;  %v1725_v35 = vld [vmem:[%s4926_s5 + $0x58] sm:$0xff] }
 0x33e   : > { %v1219_v55 = vpop.permute.xlu1 %1218  ;;  %3459 = vmatpush3.msra.mxu1 %v1008_v48  ;;  %3759 = vmatprep.subr.mxu0 %v1054_v49 }
 0x33f   : > { %v1221_v52 = vsel %vm1132_vm14, %v1217_v56, %v1219_v55  ;;  %3460 = vmatprep.subr.mxu1 %v1023_v54  ;;  %1626 = vmatprep.mubr.f32.mxu1 %v1271_v51 }
 0x340   : > { %3760 = vmatpush3.msra.mxu0 %v1054_v49  ;;  %3461 = vmatpush3.msra.mxu1 %v1007_v57 }
 0x341   : > { %v1181_v1 = vpop.permute.xlu0 %1180  ;;  %3761 = vmatprep.subr.mxu0 %v1053_v58  ;;  %1627 = vmatmul.mubr.f32.vlgmr.msra.gmra.mxu1 %v1234_v60 }
 0x342   : > { %v1183_v63 = vpop.permute.xlu1 %1182  ;;  %3762 = vmatpush3.msra.mxu0 %v1053_v58  ;;  %1556 = vmatprep.mubr.f32.mxu0 %v1221_v52 }
 0x343   : > { %v1185_v2 = vsel %vm1109_vm13, %v1181_v1, %v1183_v63  ;;  %3763 = vmatprep.subr.mxu0 %v1052_v61  ;;  %3794 = vmatprep.subr.mxu1 %v1728_v23  ;;  %v1714_v1 = vld [vmem:[%s4926_s5] sm:$0xff] }
 0x344   : > { %1557 = vmatmul.mubr.f32.gmra.mxu0 %v1185_v2  ;;  %3795 = vmatpush3.msra.mxu1 %v1728_v23 }
 0x345   : > { %3764 = vmatpush3.msra.mxu0 %v1052_v61  ;;  %v1268_v6 = vpop.permute.xlu0 %1267  ;;  %3796 = vmatprep.subr.mxu1 %v1727_v24 }
 0x346   : > { %v1270_v5 = vpop.permute.xlu1 %1269  ;;  %3765 = vmatprep.subr.mxu0 %v1051_v3  ;;  %3797 = vmatpush3.msra.mxu1 %v1727_v24 }
 0x347   : > { %v1272_v7 = vsel %vm1109_vm13, %v1268_v6, %v1270_v5  ;;  %3766 = vmatpush3.msra.mxu0 %v1051_v3  ;;  %3798 = vmatprep.subr.mxu1 %v1726_v25 }
 0x348   : > { %3767 = vmatprep.subr.mxu0 %v1050_v4  ;;  %1631 = vmatprep.mubr.f32.mxu1 %v1272_v7 }
 0x349   : > { %3768 = vmatpush3.msra.mxu0 %v1050_v4  ;;  %1632 = vmatmul.mubr.f32.gmra.mxu1 %v4596_v62  ;;  %v1300_v10 = vpop.permute.xlu0 %1299  ;;  %v1044_v62 = vld [vmem:[#allocation7 + $0x428] sm:$0xff] }
 0x34a   : > { %v1302_v9 = vpop.permute.xlu1 %1301  ;;  %3769 = vmatprep.subr.mxu0 %v1049_v53  ;;  %3799 = vmatpush3.msra.mxu1 %v1726_v25  ;;  %v1729_v25 = vld [vmem:[%s4927_s6] sm:$0xff] }
 0x34b   : > { %v1307_v11 = vsel %vm1132_vm14, %v1300_v10, %v1302_v9  ;;  %3770 = vmatpush3.msra.mxu0 %v1049_v53  ;;  %3800 = vmatprep.subr.mxu1 %v1725_v35 }
 0x34c   : > { %3771 = vmatprep.subr.mxu0 %v1048_v8  ;;  %3791 = vmatprep.mubr.f32.mxu0 %v1307_v11 }
 0x34d   : > { %3772 = vmatpush3.msra.mxu0 %v1048_v8  ;;  %v1304_v15 = vpop.permute.xlu0 %1303  ;;  %3801 = vmatpush3.msra.mxu1 %v1725_v35 }
 0x34e   : > { %v1306_v14 = vpop.permute.xlu1 %1305  ;;  %3773 = vmatprep.subr.mxu0 %v1047_v12  ;;  %3802 = vmatprep.subr.mxu1 %v1724_v27 }
 0x34f   : > { %v1308_v16 = vsel %vm1132_vm14, %v1304_v15, %v1306_v14  ;;  %3774 = vmatpush3.msra.mxu0 %v1047_v12  ;;  %3803 = vmatpush3.msra.mxu1 %v1724_v27 }
 0x350   : > { %3775 = vmatprep.subr.mxu0 %v1046_v13  ;;  %3804 = vmatprep.subr.mxu1 %v1723_v28 }
 0x351   : > { %3776 = vmatpush3.msra.mxu0 %v1046_v13  ;;  %3805 = vmatpush3.msra.mxu1 %v1723_v28 }
 0x352   : > { %3777 = vmatprep.subr.mxu0 %v1045_v17  ;;  %3806 = vmatprep.subr.mxu1 %v1722_v29 }
 0x353   : > { %3778 = vmatpush3.msra.mxu0 %v1045_v17  ;;  %3807 = vmatpush3.msra.mxu1 %v1722_v29  ;;  %v1938_v29 = vld [vmem:[#allocation9 + $0xf8] sm:$0xff] }
 0x354   : > { %3779 = vmatprep.subr.mxu0 %v1044_v62  ;;  %3808 = vmatprep.subr.mxu1 %v1721_v30 }
 0x355   : > { %3780 = vmatpush3.msra.mxu0 %v1044_v62  ;;  %3809 = vmatpush3.msra.mxu1 %v1721_v30  ;;  %v1922_v30 = vld [vmem:[#allocation9 + $0x78] sm:$0xff] }
 0x356   : > { %3781 = vmatprep.subr.mxu0 %v1043_v18  ;;  %3810 = vmatprep.subr.mxu1 %v1720_v31 }
 0x357   : > { %3782 = vmatpush3.msra.mxu0 %v1043_v18  ;;  %3811 = vmatpush3.msra.mxu1 %v1720_v31  ;;  %v1937_v31 = vld [vmem:[#allocation9 + $0xf0] sm:$0xff] }
 0x358   : > { %3783 = vmatprep.subr.mxu0 %v1042_v19  ;;  %3812 = vmatprep.subr.mxu1 %v1719_v32 }
 0x359   : > { %3784 = vmatpush3.msra.mxu0 %v1042_v19  ;;  %3813 = vmatpush3.msra.mxu1 %v1719_v32  ;;  %v1921_v32 = vld [vmem:[#allocation9 + $0x70] sm:$0xff] }
 0x35a   : > { %3785 = vmatprep.subr.mxu0 %v1041_v20  ;;  %3814 = vmatprep.subr.mxu1 %v1718_v33 }
 0x35b   : > { %3786 = vmatpush3.msra.mxu0 %v1041_v20  ;;  %3815 = vmatpush3.msra.mxu1 %v1718_v33  ;;  %v1936_v33 = vld [vmem:[#allocation9 + $0xe8] sm:$0xff] }
 0x35c   : > { %3787 = vmatprep.subr.mxu0 %v1040_v21  ;;  %3816 = vmatprep.subr.mxu1 %v1717_v34 }
 0x35d   : > { %3788 = vmatpush3.msra.mxu0 %v1040_v21  ;;  %3817 = vmatpush3.msra.mxu1 %v1717_v34  ;;  %v1920_v34 = vld [vmem:[#allocation9 + $0x68] sm:$0xff] }
 0x35e   : > { %3789 = vmatprep.subr.mxu0 %v1039_v22  ;;  %3818 = vmatprep.subr.mxu1 %v1716_v36 }
 0x35f   : > { %3790 = vmatpush3.msra.mxu0 %v1039_v22  ;;  %3819 = vmatpush3.msra.mxu1 %v1716_v36  ;;  %v1970_v36 = vld [vmem:[#allocation9 + $0x1f8] sm:$0xff] }
 0x360   : > { %3792 = vmatmul.mubr.f32.vlgmr.msra.gmra.mxu0 %v1308_v16  ;;  %3827 = vmatprep.subr.mxu0 %v4208_v0 }
 0x361   : > { %3820 = vmatprep.subr.mxu1 %v1715_v59  ;;  %3831 = vmatprep.mubr.msk.f32.mxu0 %vm4221_vm15, %v4208_v0 }
 0x362   : > { %3821 = vmatpush3.msra.mxu1 %v1715_v59  ;;  %v1930_v59 = vld [vmem:[#allocation9 + $0xb8] sm:$0xff] }
 0x363   : > { %3822 = vmatprep.subr.mxu1 %v1714_v1 }
 0x364   : > { %3823 = vmatpush3.msra.mxu1 %v1714_v1  ;;  %v1928_v1 = vld [vmem:[#allocation9 + $0xa8] sm:$0xff] }
 0x365   : > { %3541 = vmatprep.subr.mxu1 %v1970_v36 }
 0x3db   : > { %v3348_v37 = vpop.f32.mrf.mxu0 }
 0x3dd   : > { %v3349_v39 = vpop.f32.mrf.mxu0 }
 0x3de   : > { %v3386_v38 = vpop.f32.mrf.mxu1  ;;  %v3350_v49 = vadd.f32 %v3349_v39, %v3348_v37  ;;  %v1954_v37 = vld [vmem:[#allocation9 + $0x178] sm:$0xff]  ;;  %v1969_v39 = vld [vmem:[#allocation9 + $0x1f0] sm:$0xff] }
 0x3e0   : > { %v3387_v40 = vpop.f32.mrf.mxu1  ;;  %v1404_v56 = vadd.f32 %v3350_v49, %v3262_v50  ;;  %v1966_v49 = vld [vmem:[#allocation9 + $0x1d8] sm:$0xff] }
 0x3e1   : > { %v3388_v57 = vadd.f32 %v3387_v40, %v3386_v38  ;;  %v1935_v38 = vld [vmem:[#allocation9 + $0xe0] sm:$0xff] }
 0x3e2   : > { %v1919_v40 = vld [vmem:[#allocation9 + $0x60] sm:$0xff] }
 0x3e3   : > { %v1479_v2 = vadd.f32 %v3388_v57, %v1404_v56  ;;  %v1931_v56 = vld [vmem:[#allocation9 + $0xc0] sm:$0xff]  ;;  %v1949_v57 = vld [vmem:[#allocation9 + $0x150] sm:$0xff] }
 0x3ee   : > { %v3351_v41 = vpop.f32.mrf.mxu0 }
 0x3f0   : > { %v3352_v43 = vpop.f32.mrf.mxu0 }
 0x3f1   : > { %v3353_v54 = vadd.f32 %v3352_v43, %v3351_v41  ;;  %v1953_v41 = vld [vmem:[#allocation9 + $0x170] sm:$0xff]  ;;  %v1934_v43 = vld [vmem:[#allocation9 + $0xd8] sm:$0xff] }
 0x3f3   : > { %v1409_v60 = vadd.f32 %v3353_v54, %v3262_v50  ;;  %v1932_v50 = vld [vmem:[#allocation9 + $0xc8] sm:$0xff] }
 0x3f4   : > { %v1916_v54 = vld [vmem:[#allocation9 + $0x48] sm:$0xff] }
 0x3fa   : > { %v3389_v42 = vpop.f32.mrf.mxu1 }
 0x3fc   : > { %v3390_v44 = vpop.f32.mrf.mxu1 }
 0x3fd   : > { %v3424_v45 = vpop.f32.mrf.mxu0  ;;  %v3391_v52 = vadd.f32 %v3390_v44, %v3389_v42  ;;  %v1968_v42 = vld [vmem:[#allocation9 + $0x1e8] sm:$0xff] }
 0x3fe   : > { %v1952_v44 = vld [vmem:[#allocation9 + $0x168] sm:$0xff] }
 0x3ff   : > { %v3425_v26 = vpop.f32.mrf.mxu0  ;;  %v1484_v3 = vadd.f32 %v3391_v52, %v1409_v60  ;;  %v1915_v52 = vld [vmem:[#allocation9 + $0x40] sm:$0xff]  ;;  %v1914_v60 = vld [vmem:[#allocation9 + $0x38] sm:$0xff] }
 0x400   : > { %v3426_v61 = vadd.f32 %v3425_v26, %v3424_v45  ;;  %v1918_v45 = vld [vmem:[#allocation9 + $0x58] sm:$0xff]  ;;  %v1933_v26 = vld [vmem:[#allocation9 + $0xd0] sm:$0xff] }
 0x401   : > { %v3462_v46 = vpop.f32.mrf.mxu1 }
 0x402   : > { %v1554_v5 = vadd.f32 %v3426_v61, %v1479_v2  ;;  %v1929_v61 = vld [vmem:[#allocation9 + $0xb0] sm:$0xff]  ;;  %v1912_v2 = vld [vmem:[#allocation9 + $0x28] sm:$0xff] }
 0x403   : > { %v3463_v47 = vpop.f32.mrf.mxu1 }
 0x404   : > { %v3427_v48 = vpop.f32.mrf.mxu0  ;;  %v3464_v6 = vadd.f32 %v3463_v47, %v3462_v46  ;;  %v1967_v46 = vld [vmem:[#allocation9 + $0x1e0] sm:$0xff] }
 0x405   : > { %v1951_v47 = vld [vmem:[#allocation9 + $0x160] sm:$0xff] }
 0x406   : > { %v3428_v55 = vpop.f32.mrf.mxu0  ;;  %v1629_v10 = vadd.f32 %v3464_v6, %v1554_v5  ;;  %v1963_v5 = vld [vmem:[#allocation9 + $0x1c0] sm:$0xff] }
 0x407   : > { %v3429_v63 = vadd.f32 %v3428_v55, %v3427_v48  ;;  %v1917_v48 = vld [vmem:[#allocation9 + $0x50] sm:$0xff]  ;;  %v1911_v6 = vld [vmem:[#allocation9 + $0x20] sm:$0xff] }
 0x408   : > { %v1965_v55 = vld [vmem:[#allocation9 + $0x1d0] sm:$0xff] }
 0x409   : > { %v3465_v51 = vpop.f32.mrf.mxu1  ;;  %v1559_v7 = vadd.f32 %v3429_v63, %v1484_v3  ;;  %v1913_v63 = vld [vmem:[#allocation9 + $0x30] sm:$0xff]  ;;  %v1948_v3 = vld [vmem:[#allocation9 + $0x148] sm:$0xff] }
 0x40b   : > { %v3466_v58 = vpop.f32.mrf.mxu1 }
 0x40c   : > { %v3467_v4 = vadd.f32 %v3466_v58, %v3465_v51  ;;  %v1950_v51 = vld [vmem:[#allocation9 + $0x158] sm:$0xff]  ;;  %v1964_v58 = vld [vmem:[#allocation9 + $0x1c8] sm:$0xff] }
 0x40e   : > { %v1634_v53 = vadd.f32 %v3467_v4, %v1559_v7  ;;  %v1927_v4 = vld [vmem:[#allocation9 + $0xa0] sm:$0xff] }
 0x40f   : > { %v1947_v7 = vld [vmem:[#allocation9 + $0x140] sm:$0xff] }
 0x420   : > { %v3793_v8 = vpop.f32.mrf.mxu0 }
 0x421   : > { %v1709_v9 = vadd.f32 %v3793_v8, %v1634_v53  ;;  %v1926_v53 = vld [vmem:[#allocation9 + $0x98] sm:$0xff] }
 0x422   : > { %v1703_v11 = vpop.f32.mrf.mxu0  ;;  %v1962_v8 = vld [vmem:[#allocation9 + $0x1b8] sm:$0xff] }
 0x423   : > { %v1713_v12 = vmax.f32 %v1709_v9, 0.0  ;;  %v1704_v13 = vadd.f32 %v1703_v11, %v1629_v10  ;;  %v1910_v10 = vld [vmem:[#allocation9 + $0x18] sm:$0xff] }
 0x424   : > { %v1946_v11 = vld [vmem:[#allocation9 + $0x138] sm:$0xff] }
 0x425   : > { %v1712_v14 = vmax.f32 %v1704_v13, 0.0  ;;  %1734 = vrot.lane.b32.xlu1 %v1713_v12, %s4219_s14  ;;  %v1961_v13 = vld [vmem:[#allocation9 + $0x1b0] sm:$0xff] }
 0x427   : > { %1732 = vrot.lane.b32.xlu0 %v1712_v14, %s4219_s14 }
 0x497   : > { %v1735_v15 = vpop.permute.xlu1 %1734 }
 0x498   : > { %v1739_v62 = vmax.f32 %v1713_v12, %v1735_v15  ;;  %v1925_v12 = vld [vmem:[#allocation9 + $0x90] sm:$0xff] }
 0x499   : > { %v1733_v16 = vpop.permute.xlu0 %1732  ;;  %v1945_v15 = vld [vmem:[#allocation9 + $0x130] sm:$0xff] }
 0x49a   : > { %v1738_v17 = vmax.f32 %v1712_v14, %v1733_v16  ;;  %v1909_v14 = vld [vmem:[#allocation9 + $0x10] sm:$0xff]  ;;  %v1924_v16 = vld [vmem:[#allocation9 + $0x88] sm:$0xff] }
 0x49c   : > { %3824 = vmatprep.mubr.msk.f32.mxu1 %vm1109_vm13, %v1738_v17  ;;  %v1960_v17 = vld [vmem:[#allocation9 + $0x1a8] sm:$0xff] }
 0x49d   : > { %3825 = vmatmul.mubr.msk.f32.vlgmr.msra.gmra.mxu1 %vm1109_vm13, %v1739_v62  ;;  %v1908_v62 = vld [vmem:[#allocation9 + $0x8] sm:$0xff]  ;;  %vm3128_vm13 = vcmask 519168  }
 0x49e   : > { %3542 = vmatpush3.msra.mxu1 %v1954_v37 }
 0x49f   : > { %3543 = vmatprep.subr.mxu1 %v1969_v39 }
 0x4a0   : > { %3544 = vmatpush3.msra.mxu1 %v1953_v41 }
 0x4a1   : > { %3545 = vmatprep.subr.mxu1 %v1968_v42 }
 0x4a2   : > { %3546 = vmatpush3.msra.mxu1 %v1952_v44 }
 0x4a3   : > { %3547 = vmatprep.subr.mxu1 %v1967_v46 }
 0x4a4   : > { %3548 = vmatpush3.msra.mxu1 %v1951_v47  ;;  %v1957_v47 = vld [vmem:[#allocation9 + $0x190] sm:$0xff] }
 0x4a5   : > { %3549 = vmatprep.subr.mxu1 %v1966_v49 }
 0x4a6   : > { %3550 = vmatpush3.msra.mxu1 %v1950_v51  ;;  %v1941_v51 = vld [vmem:[#allocation9 + $0x110] sm:$0xff] }
 0x4a7   : > { %3551 = vmatprep.subr.mxu1 %v1965_v55 }
 0x4a8   : > { %3552 = vmatpush3.msra.mxu1 %v1949_v57 }
 0x4a9   : > { %3553 = vmatprep.subr.mxu1 %v1964_v58  ;;  %v1940_v58 = vld [vmem:[#allocation9 + $0x108] sm:$0xff] }
 0x4aa   : > { %3554 = vmatpush3.msra.mxu1 %v1948_v3 }
 0x4ab   : > { %3555 = vmatprep.subr.mxu1 %v1963_v5 }
 0x4ac   : > { %3556 = vmatpush3.msra.mxu1 %v1947_v7 }
 0x4ad   : > { %3557 = vmatprep.subr.mxu1 %v1962_v8 }
 0x4ae   : > { %3558 = vmatpush3.msra.mxu1 %v1946_v11  ;;  %v1976_v11 = vld [vmem:[#allocation9 + $0x228] sm:$0xff] }
 0x4af   : > { %3559 = vmatprep.subr.mxu1 %v1961_v13  ;;  %v1975_v13 = vld [vmem:[#allocation9 + $0x220] sm:$0xff] }
 0x4b0   : > { %3560 = vmatpush3.msra.mxu1 %v1945_v15  ;;  %v1974_v15 = vld [vmem:[#allocation9 + $0x218] sm:$0xff] }
 0x4b1   : > { %3561 = vmatprep.subr.mxu1 %v1960_v17  ;;  %v1972_v17 = vld [vmem:[#allocation9 + $0x208] sm:$0xff] }
 0x55d   : > { %v3826_v18 = vpop.f32.mrf.mxu1 }
 0x55e   : > { %v1824_v19 = vrot.slane %v3826_v18, 1 }
 0x55f   : > { %v1812_v20 = vpop.f32.mrf.mxu1 }
 0x560   : > { %v1829_v21 = vmax.f32 %v3826_v18, %v1824_v19  ;;  %v1823_v22 = vrot.slane %v1812_v20, 1  ;;  %v1944_v18 = vld [vmem:[#allocation9 + $0x128] sm:$0xff] }
 0x561   : > { %3562 = vmatpush3.msra.mxu1 %v1944_v18 }
 0x562   : > { %v1825_v23 = vsel %vm621_vm8, %v1823_v22, %v1824_v19  ;;  %3828 = vmatpush3.msk.msra.mxu0 %vm621_vm8, %v1829_v21  ;;  %v1923_v19 = vld [vmem:[#allocation9 + $0x80] sm:$0xff] }
 0x563   : > { %v1828_v24 = vmax.f32 %v1812_v20, %v1825_v23  ;;  %3829 = vmatprep.subr.mxu0 %v4208_v0  ;;  %v1959_v20 = vld [vmem:[#allocation9 + $0x1a0] sm:$0xff]  ;;  %v1958_v23 = vld [vmem:[#allocation9 + $0x198] sm:$0xff] }
 0x564   : > { %v1907_v21 = vld [vmem:[#allocation9] sm:$0xff]  ;;  %3563 = vmatprep.subr.mxu1 %v1959_v20 }
 0x565   : > { %3830 = vmatpush3.msra.mxu0 %v1828_v24  ;;  %v1943_v22 = vld [vmem:[#allocation9 + $0x120] sm:$0xff] }
 0x566   : > { %3832 = vmatmul.mubr.msk.f32.vlgmr.msra.gmra.mxu0 %vm1830_vm0, %v1729_v25  ;;  %3506 = vmatprep.subr.mxu0 %v1938_v29 }
 0x567   : > { %3507 = vmatpush3.msra.mxu0 %v1922_v30  ;;  %3564 = vmatpush3.msra.mxu1 %v1943_v22 }
 0x568   : > { %3508 = vmatprep.subr.mxu0 %v1937_v31  ;;  %3565 = vmatprep.subr.mxu1 %v1958_v23 }
 0x569   : > { %3509 = vmatpush3.msra.mxu0 %v1921_v32 }
 0x56a   : > { %3510 = vmatprep.subr.mxu0 %v1936_v33 }
 0x56b   : > { %3511 = vmatpush3.msra.mxu0 %v1920_v34 }
 0x56c   : > { %3512 = vmatprep.subr.mxu0 %v1935_v38 }
 0x56d   : > { %3513 = vmatpush3.msra.mxu0 %v1919_v40 }
 0x56e   : > { %3514 = vmatprep.subr.mxu0 %v1934_v43 }
 0x56f   : > { %3515 = vmatpush3.msra.mxu0 %v1918_v45 }
 0x570   : > { %3516 = vmatprep.subr.mxu0 %v1933_v26  ;;  %v1942_v26 = vld [vmem:[#allocation9 + $0x118] sm:$0xff] }
 0x571   : > { %3517 = vmatpush3.msra.mxu0 %v1917_v48  ;;  %3566 = vmatpush3.msra.mxu1 %v1942_v26  ;;  %v2310_v26 = vld [vmem:[#allocation10 + $0x60] sm:$0xff] }
 0x572   : > { %3518 = vmatprep.subr.mxu0 %v1932_v50  ;;  %3567 = vmatprep.subr.mxu1 %v1957_v47  ;;  %v2358_v47 = vld [vmem:[#allocation10 + $0x1e0] sm:$0xff] }
 0x573   : > { %3519 = vmatpush3.msra.mxu0 %v1916_v54  ;;  %v1956_v54 = vld [vmem:[#allocation9 + $0x188] sm:$0xff]  ;;  %3568 = vmatpush3.msra.mxu1 %v1941_v51  ;;  %v2357_v51 = vld [vmem:[#allocation10 + $0x1d8] sm:$0xff] }
 0x574   : > { %3520 = vmatprep.subr.mxu0 %v1931_v56  ;;  %3569 = vmatprep.subr.mxu1 %v1956_v54  ;;  %v2324_v54 = vld [vmem:[#allocation10 + $0xd0] sm:$0xff] }
 0x575   : > { %3521 = vmatpush3.msra.mxu0 %v1915_v52  ;;  %3570 = vmatpush3.msra.mxu1 %v1940_v58  ;;  %v2340_v58 = vld [vmem:[#allocation10 + $0x150] sm:$0xff] }
 0x576   : > { %3522 = vmatprep.subr.mxu0 %v1930_v59  ;;  %v1955_v59 = vld [vmem:[#allocation9 + $0x180] sm:$0xff] }
 0x577   : > { %3523 = vmatpush3.msra.mxu0 %v1914_v60  ;;  %v1939_v60 = vld [vmem:[#allocation9 + $0x100] sm:$0xff]  ;;  %3571 = vmatprep.subr.mxu1 %v1955_v59  ;;  %v2307_v59 = vld [vmem:[#allocation10 + $0x48] sm:$0xff] }
 0x578   : > { %3524 = vmatprep.subr.mxu0 %v1929_v61  ;;  %3572 = vmatpush3.msra.mxu1 %v1939_v60  ;;  %v2355_v60 = vld [vmem:[#allocation10 + $0x1c8] sm:$0xff] }
 0x579   : > { %3525 = vmatpush3.msra.mxu0 %v1913_v63 }
 0x57a   : > { %3526 = vmatprep.subr.mxu0 %v1928_v1 }
 0x57b   : > { %3527 = vmatpush3.msra.mxu0 %v1912_v2 }
 0x57c   : > { %3528 = vmatprep.subr.mxu0 %v1927_v4 }
 0x57d   : > { %3529 = vmatpush3.msra.mxu0 %v1911_v6 }
 0x57e   : > { %3530 = vmatprep.subr.mxu0 %v1926_v53  ;;  %v1978_v53 = vld [vmem:[#allocation9 + $0x238] sm:$0xff] }
 0x57f   : > { %3531 = vmatpush3.msra.mxu0 %v1910_v10  ;;  %v1977_v10 = vld [vmem:[#allocation9 + $0x230] sm:$0xff] }
 0x580   : > { %3532 = vmatprep.subr.mxu0 %v1925_v12 }
 0x581   : > { %3533 = vmatpush3.msra.mxu0 %v1909_v14 }
 0x582   : > { %3534 = vmatprep.subr.mxu0 %v1924_v16  ;;  %v1973_v16 = vld [vmem:[#allocation9 + $0x210] sm:$0xff] }
 0x583   : > { %3535 = vmatpush3.msra.mxu0 %v1908_v62  ;;  %v1971_v62 = vld [vmem:[#allocation9 + $0x200] sm:$0xff] }
 0x584   : > { %3536 = vmatprep.subr.mxu0 %v1923_v19 }
 0x585   : > { %3537 = vmatpush3.msra.mxu0 %v1907_v21 }
 0x586   : > { %3834 = vmatprep.subr.mxu0 %v4208_v0 }
 0x626   : > { %v1903_v35 = vpop.f32.mrf.mxu0 }
 0x627   : > { %v1985_v27 = vrot.slane %v1903_v35, 7 }
 0x628   : > { %v3833_v28 = vpop.f32.mrf.mxu0 }
 0x629   : > { %1986 = vrot.lane.b32.xlu0 %v1985_v27, %s4218_s27  ;;  %s4222_s27 = smov 64  }
 0x69b   : > { %v1987_v9 = vpop.permute.xlu0 %1986 }
 0x69c   : > { %1990 = vst.msk [vmem:[#allocation2] sm:$0xfe] %vm1989_vm3, %v1987_v9 }
 0x69d   : > { %1992 = vst.msk [vmem:[#allocation2 + $0x10] sm:$0x1] %vm1991_vm2, %v1987_v9 }
 0x6a3   : > { %v2003_v24 = vld [vmem:[#allocation2] sm:$0xff] }
 0x6a4   : > { %v2009_v25 = vld [vmem:[#allocation2] sm:$0xfe]  ;;  %v2010_v35 = vld [vmem:[#allocation2 + $0x10] sm:$0x1]  ;;  %2005 = vrot.lane.b32.xlu1 %v2003_v24, %s4220_s19  ;;  %1995 = vst.msk [vmem:[#allocation3] sm:$0xff] %vm1994_vm4, %v2003_v24 }
 0x6a5   : > { %v2013_v27 = vrot.slane %v2009_v25, 1  ;;  %v2014_v28 = vrot.slane %v2010_v35, 1  ;;  %v2020_v29 = vld [vmem:[#allocation2] sm:$0xfe]  ;;  %v2021_v30 = vld [vmem:[#allocation2 + $0x10] sm:$0x1] }
 0x6a6   : > { %v2024_v31 = vrot.slane %v2020_v29, 1  ;;  %v2051_v32 = vld [vmem:[#allocation2] sm:$0xfc]  ;;  %v2052_v33 = vld [vmem:[#allocation2 + $0x10] sm:$0x3]  ;;  %v2025_v36 = vrot.slane %v2021_v30, 1 }
 0x6a7   : > { %v2015_v34 = vsel %vm621_vm8, %v2013_v27, %v2014_v28  ;;  %v2055_v37 = vrot.slane %v2051_v32, 2  ;;  %v2056_v38 = vrot.slane %v2052_v33, 2  ;;  %v2031_v39 = vld [vmem:[#allocation2] sm:$0xfe]  ;;  %v2032_v40 = vld [vmem:[#allocation2 + $0x10] sm:$0x1] }
 0x6a8   : > { %2016 = vrot.lane.b32.xlu0 %v2015_v34, %s4222_s27  ;;  %v2062_v41 = vld [vmem:[#allocation2] sm:$0xfc]  ;;  %1998 = vrot.lane.b32.xlu1 %v2003_v24, %s4223_s16  ;;  %v2063_v42 = vld [vmem:[#allocation2 + $0x10] sm:$0x3]  ;;  %v2026_v48 = vsel %vm621_vm8, %v2024_v31, %v2025_v36  ;;  %v2035_v49 = vrot.slane %v2031_v39, 1  ;;  %v2036_v50 = vrot.slane %v2032_v40, 1 }
 0x6a9   : > { %v2042_v43 = vld [vmem:[#allocation2] sm:$0xfc]  ;;  %v2043_v44 = vld [vmem:[#allocation2 + $0x10] sm:$0x3]  ;;  %v2057_v55 = vsel %vm685_vm9, %v2055_v37, %v2056_v38  ;;  %v2066_v56 = vrot.slane %v2062_v41, 2  ;;  %v2067_v57 = vrot.slane %v2063_v42, 2 }
 0x6aa   : > { %v2046_v45 = vrot.slane %v2042_v43, 2  ;;  %v2047_v46 = vrot.slane %v2043_v44, 2  ;;  %2445 = vst [vmem:[#allocation2 + $0x10] sm:$0x3] %v4208_v0  ;;  %2443 = vst [vmem:[#allocation2] sm:$0xff] %v4208_v0  ;;  %v2037_v61 = vsel %vm621_vm8, %v2035_v49, %v2036_v50  ;;  %v2329_v33 = vld [vmem:[#allocation10 + $0xf8] sm:$0xff] }
 0x6ab   : > { %v2068_v63 = vsel %vm685_vm9, %v2066_v56, %v2067_v57  ;;  %v3267_v24 = vld [vmem:[%s4929_s8] ss:$0 sm:$0xff]  ;;  %v2313_v34 = vld [vmem:[#allocation10 + $0x78] sm:$0xff]  ;;  %3585 = vmatprep.subr.mxu1 %v2329_v33  ;;  %v2327_v39 = vld [vmem:[#allocation10 + $0xe8] sm:$0xff] }
 0x6ac   : > { %2027 = vrot.lane.b32.xlu0 %v2026_v48, %s4219_s14  ;;  %v2048_v52 = vsel %vm685_vm9, %v2046_v45, %v2047_v46  ;;  %2058 = vrot.lane.b32.xlu1 %v2057_v55, %s4223_s16  ;;  %v2328_v36 = vld [vmem:[#allocation10 + $0xf0] sm:$0xff]  ;;  %v2361_v38 = vld [vmem:[#allocation10 + $0x1f8] sm:$0xff]  ;;  %v2311_v42 = vld [vmem:[#allocation10 + $0x68] sm:$0xff] }
 0x6ad   : > { %2050 = vst.msk [vmem:[#allocation3 + $0x18] sm:$0xff] %vm1994_vm4, %v2048_v52  ;;  %v2312_v37 = vld [vmem:[#allocation10 + $0x70] sm:$0xff]  ;;  %v2345_v40 = vld [vmem:[#allocation10 + $0x178] sm:$0xff]  ;;  %v2326_v44 = vld [vmem:[#allocation10 + $0xe0] sm:$0xff] }
 0x6ae   : > { %v2360_v41 = vld [vmem:[#allocation10 + $0x1f0] sm:$0xff]  ;;  %v2359_v45 = vld [vmem:[#allocation10 + $0x1e8] sm:$0xff]  ;;  %v2325_v48 = vld [vmem:[#allocation10 + $0xd8] sm:$0xff] }
 0x6af   : > { %v2344_v43 = vld [vmem:[#allocation10 + $0x170] sm:$0xff]  ;;  %v2343_v46 = vld [vmem:[#allocation10 + $0x168] sm:$0xff]  ;;  %v2342_v49 = vld [vmem:[#allocation10 + $0x160] sm:$0xff] }
 0x6b0   : > { %2038 = vrot.lane.b32.xlu0 %v2037_v61, %s4224_s17  ;;  %2069 = vrot.lane.b32.xlu1 %v2068_v63, %s4220_s19  ;;  %v2309_v50 = vld [vmem:[#allocation10 + $0x58] sm:$0xff]  ;;  %v2308_v56 = vld [vmem:[#allocation10 + $0x50] sm:$0xff]  ;;  %v2323_v52 = vld [vmem:[#allocation10 + $0xc8] sm:$0xff] }
 0x6b1   : > { %v2341_v55 = vld [vmem:[#allocation10 + $0x158] sm:$0xff]  ;;  %v2356_v57 = vld [vmem:[#allocation10 + $0x1d0] sm:$0xff]  ;;  %v2322_v61 = vld [vmem:[#allocation10 + $0xc0] sm:$0xff] }
 0x6b2   : > { %v2339_v63 = vld [vmem:[#allocation10 + $0x148] sm:$0xff]  ;;  %v2393_v33 = vld [vmem:[#allocation10 + $0x2f8] sm:$0xff] }
 0x716   : > { %v2006_v1 = vpop.permute.xlu1 %2005 }
 0x717   : > { %2008 = vst.msk [vmem:[#allocation3 + $0x8] sm:$0xff] %vm1994_vm4, %v2006_v1  ;;  %v2306_v1 = vld [vmem:[#allocation10 + $0x40] sm:$0xff] }
 0x71a   : > { %v2017_v2 = vpop.permute.xlu0 %2016  ;;  %v1999_v3 = vpop.permute.xlu1 %1998 }
 0x71b   : > { %2019 = vst.msk [vmem:[#allocation3 + $0x8] sm:$0xff] %vm2001_vm5, %v2017_v2  ;;  %2002 = vst.msk [vmem:[#allocation3] sm:$0xff] %vm2001_vm5, %v1999_v3  ;;  %v2354_v2 = vld [vmem:[#allocation10 + $0x1c0] sm:$0xff]  ;;  %v2321_v3 = vld [vmem:[#allocation10 + $0xb8] sm:$0xff] }
 0x71e   : > { %v2028_v4 = vpop.permute.xlu0 %2027  ;;  %v2059_v5 = vpop.permute.xlu1 %2058 }
 0x71f   : > { %2030 = vst.msk [vmem:[#allocation3 + $0x10] sm:$0xff] %vm1994_vm4, %v2028_v4  ;;  %v2338_v4 = vld [vmem:[#allocation10 + $0x140] sm:$0xff] }
 0x720   : > { %2061 = vst.msk [vmem:[#allocation3 + $0x18] sm:$0xff] %vm2001_vm5, %v2059_v5  ;;  %v2305_v5 = vld [vmem:[#allocation10 + $0x38] sm:$0xff] }
 0x722   : > { %v2039_v6 = vpop.permute.xlu0 %2038  ;;  %v2074_v7 = vld [vmem:[#allocation3 + $0x8] sm:$0xff]  ;;  %v2070_v8 = vpop.permute.xlu1 %2069  ;;  %v2073_v9 = vld [vmem:[#allocation3] sm:$0xff] }
 0x723   : > { %2041 = vst.msk [vmem:[#allocation3 + $0x10] sm:$0xff] %vm2001_vm5, %v2039_v6  ;;  %2151 = vmatprep.mubr.f32.mxu0 %v2074_v7  ;;  %v2353_v6 = vld [vmem:[#allocation10 + $0x1b8] sm:$0xff]  ;;  %v2320_v7 = vld [vmem:[#allocation10 + $0xb0] sm:$0xff] }
 0x724   : > { %2072 = vst.msk [vmem:[#allocation3 + $0x20] sm:$0xff] %vm1994_vm4, %v2070_v8  ;;  %2152 = vmatmul.mubr.f32.vlgmr.msra.gmra.mxu0 %v2073_v9  ;;  %v2304_v8 = vld [vmem:[#allocation10 + $0x30] sm:$0xff] }
 0x725   : > { %3835 = vmatpush3.msra.mxu0 %v1978_v53  ;;  %3850 = vmatprep.mubr.msk.f32.mxu0 %vm4221_vm15, %v4208_v0  ;;  %v2337_v53 = vld [vmem:[#allocation10 + $0x138] sm:$0xff]  ;;  %v2352_v9 = vld [vmem:[#allocation10 + $0x1b0] sm:$0xff] }
 0x726   : > { %3836 = vmatprep.subr.mxu0 %v4208_v0 }
 0x727   : > { %3837 = vmatpush3.msra.mxu0 %v1977_v10  ;;  %v2076_v12 = vld [vmem:[#allocation3 + $0x18] sm:$0xff]  ;;  %v2319_v10 = vld [vmem:[#allocation10 + $0xa8] sm:$0xff] }
 0x728   : > { %3838 = vmatprep.subr.mxu0 %v4208_v0  ;;  %2221 = vmatprep.mubr.f32.mxu1 %v2076_v12  ;;  %v2303_v12 = vld [vmem:[#allocation10 + $0x28] sm:$0xff] }
 0x729   : > { %3839 = vmatpush3.msra.mxu0 %v1976_v11  ;;  %v2336_v11 = vld [vmem:[#allocation10 + $0x130] sm:$0xff] }
 0x72a   : > { %3840 = vmatprep.subr.mxu0 %v4208_v0  ;;  %v2075_v14 = vld [vmem:[#allocation3 + $0x10] sm:$0xff] }
 0x72b   : > { %3841 = vmatpush3.msra.mxu0 %v1975_v13  ;;  %2222 = vmatmul.mubr.f32.vlgmr.msra.gmra.mxu1 %v2075_v14  ;;  %v2077_v18 = vld [vmem:[#allocation3 + $0x20] sm:$0xff] }
 0x72c   : > { %3842 = vmatprep.subr.mxu0 %v4208_v0  ;;  %3586 = vmatpush3.msra.mxu1 %v2313_v34  ;;  %v2318_v13 = vld [vmem:[#allocation10 + $0xa0] sm:$0xff] }
 0x72d   : > { %3843 = vmatpush3.msra.mxu0 %v1974_v15  ;;  %3587 = vmatprep.subr.mxu1 %v2328_v36  ;;  %v2302_v14 = vld [vmem:[#allocation10 + $0x20] sm:$0xff]  ;;  %v2351_v15 = vld [vmem:[#allocation10 + $0x1a8] sm:$0xff] }
 0x72e   : > { %3844 = vmatprep.subr.mxu0 %v4208_v0  ;;  %3588 = vmatpush3.msra.mxu1 %v2312_v37  ;;  %v2346_v34 = vld [vmem:[#allocation10 + $0x180] sm:$0xff] }
 0x72f   : > { %3845 = vmatpush3.msra.mxu0 %v1973_v16  ;;  %3589 = vmatprep.subr.mxu1 %v2327_v39  ;;  %v2317_v16 = vld [vmem:[#allocation10 + $0x98] sm:$0xff]  ;;  %v2330_v36 = vld [vmem:[#allocation10 + $0x100] sm:$0xff] }
 0x730   : > { %3846 = vmatprep.subr.mxu0 %v4208_v0  ;;  %3590 = vmatpush3.msra.mxu1 %v2311_v42 }
 0x731   : > { %3847 = vmatpush3.msra.mxu0 %v1972_v17  ;;  %3591 = vmatprep.subr.mxu1 %v2326_v44  ;;  %v2335_v17 = vld [vmem:[#allocation10 + $0x128] sm:$0xff] }
 0x732   : > { %3848 = vmatprep.subr.mxu0 %v4208_v0  ;;  %3592 = vmatpush3.msra.mxu1 %v2310_v26 }
 0x733   : > { %3849 = vmatpush3.msra.mxu0 %v1971_v62  ;;  %3593 = vmatprep.subr.mxu1 %v2325_v48  ;;  %v2301_v62 = vld [vmem:[#allocation10 + $0x18] sm:$0xff] }
 0x734   : > { %3851 = vmatmul.mubr.msk.f32.vlgmr.msra.gmra.mxu0 %vm1994_vm4, %v2077_v18  ;;  %3620 = vmatprep.subr.mxu0 %v2361_v38  ;;  %v2350_v18 = vld [vmem:[#allocation10 + $0x1a0] sm:$0xff] }
 0x735   : > { %3621 = vmatpush3.msra.mxu0 %v2345_v40  ;;  %3594 = vmatpush3.msra.mxu1 %v2309_v50 }
 0x736   : > { %3622 = vmatprep.subr.mxu0 %v2360_v41  ;;  %3595 = vmatprep.subr.mxu1 %v2324_v54 }
 0x737   : > { %3623 = vmatpush3.msra.mxu0 %v2344_v43  ;;  %3596 = vmatpush3.msra.mxu1 %v2308_v56 }
 0x738   : > { %3624 = vmatprep.subr.mxu0 %v2359_v45  ;;  %3597 = vmatprep.subr.mxu1 %v2323_v52 }
 0x739   : > { %3625 = vmatpush3.msra.mxu0 %v2343_v46  ;;  %3598 = vmatpush3.msra.mxu1 %v2307_v59 }
 0x73a   : > { %3626 = vmatprep.subr.mxu0 %v2358_v47  ;;  %3599 = vmatprep.subr.mxu1 %v2322_v61 }
 0x73b   : > { %3627 = vmatpush3.msra.mxu0 %v2342_v49  ;;  %3600 = vmatpush3.msra.mxu1 %v2306_v1 }
 0x73c   : > { %3628 = vmatprep.subr.mxu0 %v2357_v51  ;;  %3601 = vmatprep.subr.mxu1 %v2321_v3 }
 0x73d   : > { %3629 = vmatpush3.msra.mxu0 %v2341_v55  ;;  %3602 = vmatpush3.msra.mxu1 %v2305_v5 }
 0x73e   : > { %3630 = vmatprep.subr.mxu0 %v2356_v57  ;;  %3603 = vmatprep.subr.mxu1 %v2320_v7 }
 0x73f   : > { %3631 = vmatpush3.msra.mxu0 %v2340_v58  ;;  %3604 = vmatpush3.msra.mxu1 %v2304_v8 }
 0x740   : > { %3632 = vmatprep.subr.mxu0 %v2355_v60  ;;  %3605 = vmatprep.subr.mxu1 %v2319_v10 }
 0x741   : > { %3633 = vmatpush3.msra.mxu0 %v2339_v63  ;;  %3606 = vmatpush3.msra.mxu1 %v2303_v12 }
 0x742   : > { %3634 = vmatprep.subr.mxu0 %v2354_v2  ;;  %3607 = vmatprep.subr.mxu1 %v2318_v13 }
 0x743   : > { %3635 = vmatpush3.msra.mxu0 %v2338_v4  ;;  %3608 = vmatpush3.msra.mxu1 %v2302_v14  ;;  %v2425_v4 = vld [vmem:[#allocation10 + $0x3f8] sm:$0xff] }
 0x744   : > { %3636 = vmatprep.subr.mxu0 %v2353_v6  ;;  %3609 = vmatprep.subr.mxu1 %v2317_v16 }
 0x745   : > { %3637 = vmatpush3.msra.mxu0 %v2337_v53  ;;  %3610 = vmatpush3.msra.mxu1 %v2301_v62 }
 0x746   : > { %3638 = vmatprep.subr.mxu0 %v2352_v9 }
 0x747   : > { %3639 = vmatpush3.msra.mxu0 %v2336_v11 }
 0x748   : > { %3640 = vmatprep.subr.mxu0 %v2351_v15 }
 0x749   : > { %3641 = vmatpush3.msra.mxu0 %v2335_v17 }
 0x74a   : > { %3642 = vmatprep.subr.mxu0 %v2350_v18 }
 0x7e4   : > { %v3538_v19 = vpop.f32.mrf.mxu0 }
 0x7e6   : > { %v3539_v20 = vpop.f32.mrf.mxu0 }
 0x7e7   : > { %v3540_v22 = vadd.f32 %v3539_v20, %v3538_v19  ;;  %v2316_v19 = vld [vmem:[#allocation10 + $0x90] sm:$0xff]  ;;  %v2334_v20 = vld [vmem:[#allocation10 + $0x120] sm:$0xff] }
 0x7e8   : > { %3611 = vmatprep.subr.mxu1 %v2316_v19  ;;  %3643 = vmatpush3.msra.mxu0 %v2334_v20 }
 0x7e9   : > { %v2154_v35 = vadd.f32 %v3540_v22, %v3267_v24  ;;  %v2300_v22 = vld [vmem:[#allocation10 + $0x10] sm:$0xff]  ;;  %v2315_v24 = vld [vmem:[#allocation10 + $0x88] sm:$0xff] }
 0x7ea   : > { %3612 = vmatpush3.msra.mxu1 %v2300_v22 }
 0x7eb   : > { %v3573_v21 = vpop.f32.mrf.mxu1  ;;  %3613 = vmatprep.subr.mxu1 %v2315_v24 }
 0x7ed   : > { %v3574_v23 = vpop.f32.mrf.mxu1 }
 0x7ee   : > { %v3575_v25 = vadd.f32 %v3574_v23, %v3573_v21  ;;  %v2349_v23 = vld [vmem:[#allocation10 + $0x198] sm:$0xff] }
 0x7ef   : > { %3644 = vmatprep.subr.mxu0 %v2349_v23 }
 0x7f0   : > { %v2224_v27 = vadd.f32 %v3575_v25, %v2154_v35  ;;  %v2333_v25 = vld [vmem:[#allocation10 + $0x118] sm:$0xff]  ;;  %v2299_v35 = vld [vmem:[#allocation10 + $0x8] sm:$0xff] }
 0x7f1   : > { %3645 = vmatpush3.msra.mxu0 %v2333_v25  ;;  %3614 = vmatpush3.msra.mxu1 %v2299_v35 }
 0x7f4   : > { %v2293_v28 = vpop.f32.mrf.mxu0 }
 0x7f5   : > { %v2294_v29 = vadd.f32 %v2293_v28, %v2224_v27  ;;  %v2348_v27 = vld [vmem:[#allocation10 + $0x190] sm:$0xff]  ;;  %v2314_v28 = vld [vmem:[#allocation10 + $0x80] sm:$0xff] }
 0x7f6   : > { %v3852_v30 = vpop.f32.mrf.mxu0  ;;  %3646 = vmatprep.subr.mxu0 %v2348_v27  ;;  %3615 = vmatprep.subr.mxu1 %v2314_v28 }
 0x7f7   : > { %v2297_v31 = vmax.f32 %v2294_v29, 0.0  ;;  %v2332_v29 = vld [vmem:[#allocation10 + $0x110] sm:$0xff]  ;;  %v2298_v30 = vld [vmem:[#allocation10] sm:$0xff] }
 0x7f8   : > { %3647 = vmatpush3.msra.mxu0 %v2332_v29  ;;  %3616 = vmatpush3.msra.mxu1 %v2298_v30  ;;  %v2377_v29 = vld [vmem:[#allocation10 + $0x278] sm:$0xff]  ;;  %v2392_v30 = vld [vmem:[#allocation10 + $0x2f0] sm:$0xff] }
 0x7f9   : > { %v2449_v32 = vrot.slane %v2297_v31, 7  ;;  %v2347_v31 = vld [vmem:[#allocation10 + $0x188] sm:$0xff]  ;;  %3655 = vmatprep.subr.mxu1 %v2393_v33 }
 0x7fa   : > { %3648 = vmatprep.subr.mxu0 %v2347_v31  ;;  %v2376_v31 = vld [vmem:[#allocation10 + $0x270] sm:$0xff] }
 0x7fb   : > { %2450 = vrot.lane.b32.xlu0 %v2449_v32, %s4212_s30  ;;  %v2331_v32 = vld [vmem:[#allocation10 + $0x108] sm:$0xff]  ;;  %s4225_s30 = smov 96  }
 0x7fc   : > { %3649 = vmatpush3.msra.mxu0 %v2331_v32 }
 0x7fd   : > { %3650 = vmatprep.subr.mxu0 %v2346_v34  ;;  %v2391_v34 = vld [vmem:[#allocation10 + $0x2e8] sm:$0xff] }
 0x7fe   : > { %3651 = vmatpush3.msra.mxu0 %v2330_v36  ;;  %v2409_v36 = vld [vmem:[#allocation10 + $0x378] sm:$0xff] }
 0x7ff   : > { %3690 = vmatprep.subr.mxu0 %v2425_v4 }
 0x86d   : > { %v2451_v21 = vpop.permute.xlu0 %2450 }
 0x86e   : > { %2456 = vst.msk [vmem:[#allocation2 + $0x8] sm:$0xfe] %vm2455_vm6, %v2451_v21 }
 0x86f   : > { %2460 = vst.msk [vmem:[#allocation2 + $0x18] sm:$0x1] %vm2459_vm7, %v2451_v21 }
 0x870   : > { %2454 = vst.msk [vmem:[#allocation2] sm:$0xfe] %vm2453_vm10, %v2451_v21 }
 0x871   : > { %2458 = vst.msk [vmem:[#allocation2 + $0x10] sm:$0x1] %vm2457_vm11, %v2451_v21 }
 0x875   : > { %v2464_v37 = vld [vmem:[#allocation2 + $0x8] sm:$0xff] }
 0x876   : > { %v2517_v39 = vld [vmem:[#allocation2 + $0x8] sm:$0xfe]  ;;  %2469 = vrot.lane.b32.xlu0 %v2464_v37, %s4220_s19  ;;  %v2519_v40 = vld [vmem:[#allocation2 + $0x18] sm:$0x1] }
 0x877   : > { %v4743_v38 = vld [vmem:[#allocation2] sm:$0xff]  ;;  %v2527_v44 = vrot.slane %v2517_v39, 1  ;;  %v2528_v45 = vrot.slane %v2519_v40, 1  ;;  %v2496_v50 = vld [vmem:[#allocation2 + $0x8] sm:$0xfe]  ;;  %v2375_v39 = vld [vmem:[#allocation10 + $0x268] sm:$0xff] }
 0x878   : > { %2467 = vrot.lane.b32.xlu1 %v4743_v38, %s4220_s19  ;;  %v2516_v41 = vld [vmem:[#allocation2] sm:$0xfe]  ;;  %2462 = vst [vmem:[#allocation3] sm:$0xff] %v4743_v38  ;;  %v2518_v42 = vld [vmem:[#allocation2 + $0x10] sm:$0x1]  ;;  %v2506_v57 = vrot.slane %v2496_v50, 1 }
 0x879   : > { %v2486_v43 = vld [vmem:[#allocation2] sm:$0xfe]  ;;  %v2524_v46 = vrot.slane %v2516_v41, 1  ;;  %v2487_v26 = vld [vmem:[#allocation2 + $0x10] sm:$0x1]  ;;  %v2525_v48 = vrot.slane %v2518_v42, 1  ;;  %v2529_v58 = vsel %vm621_vm8, %v2527_v44, %v2528_v45 }
 0x87a   : > { %v2490_v47 = vrot.slane %v2486_v43, 1  ;;  %v2491_v49 = vrot.slane %v2487_v26, 1  ;;  %v2498_v51 = vld [vmem:[#allocation2 + $0x18] sm:$0x1]  ;;  %2480 = vrot.lane.b32.xlu0 %v2464_v37, %s4225_s30  ;;  %v2495_v54 = vld [vmem:[#allocation2] sm:$0xfe] }
 0x87b   : > { %v2497_v55 = vld [vmem:[#allocation2 + $0x10] sm:$0x1]  ;;  %v2507_v52 = vrot.slane %v2498_v51, 1  ;;  %v2526_v59 = vsel %vm621_vm8, %v2524_v46, %v2525_v48  ;;  %v2503_v60 = vrot.slane %v2495_v54, 1  ;;  %v2547_v63 = vld [vmem:[#allocation2 + $0x8] sm:$0xfc] }
 0x87c   : > { %2478 = vrot.lane.b32.xlu1 %v4743_v38, %s4225_s30  ;;  %v2492_v56 = vsel %vm621_vm8, %v2490_v47, %v2491_v49  ;;  %v2504_v61 = vrot.slane %v2497_v55, 1  ;;  %v2549_v1 = vld [vmem:[#allocation2 + $0x18] sm:$0x3]  ;;  %v2546_v2 = vld [vmem:[#allocation2] sm:$0xfc]  ;;  %v2557_v5 = vrot.slane %v2547_v63, 2 }
 0x87d   : > { %2494 = vst [vmem:[#allocation3 + $0x18] sm:$0xff] %v2492_v56  ;;  %2737 = vmatprep.mubr.f32.mxu0 %v2492_v56  ;;  %v2548_v3 = vld [vmem:[#allocation2 + $0x10] sm:$0x3]  ;;  %v2558_v6 = vrot.slane %v2549_v1, 2  ;;  %v2508_v7 = vsel %vm621_vm8, %v2506_v57, %v2507_v52  ;;  %v2554_v8 = vrot.slane %v2546_v2, 2  ;;  %v2424_v40 = vld [vmem:[#allocation10 + $0x3f0] sm:$0xff] }
 0x87e   : > { %2532 = vrot.lane.b32.xlu0 %v2529_v58, %s4225_s30  ;;  %v2505_v53 = vsel %vm621_vm8, %v2503_v60, %v2504_v61  ;;  %v2555_v9 = vrot.slane %v2548_v3, 2  ;;  %v2568_v10 = vld [vmem:[#allocation2 + $0x8] sm:$0xfc]  ;;  %v2570_v11 = vld [vmem:[#allocation2 + $0x18] sm:$0x3]  ;;  %v2408_v41 = vld [vmem:[#allocation10 + $0x370] sm:$0xff] }
 0x87f   : > { %v2567_v12 = vld [vmem:[#allocation2] sm:$0xfc]  ;;  %v2569_v13 = vld [vmem:[#allocation2 + $0x10] sm:$0x3]  ;;  %v2559_v14 = vsel %vm685_vm9, %v2557_v5, %v2558_v6  ;;  %v2578_v15 = vrot.slane %v2568_v10, 2  ;;  %v2579_v17 = vrot.slane %v2570_v11, 2 }
 0x880   : > { %2530 = vrot.lane.b32.xlu1 %v2526_v59, %s4225_s30  ;;  %v2556_v16 = vsel %vm685_vm9, %v2554_v8, %v2555_v9  ;;  %v2575_v62 = vrot.slane %v2567_v12, 2  ;;  %v2576_v18 = vrot.slane %v2569_v13, 2  ;;  %v2537_v21 = vld [vmem:[#allocation2] sm:$0xfc]  ;;  %v2538_v22 = vld [vmem:[#allocation2 + $0x10] sm:$0x3] }
 0x881   : > { %v2580_v19 = vsel %vm685_vm9, %v2578_v15, %v2579_v17  ;;  %v2541_v23 = vrot.slane %v2537_v21, 2  ;;  %v2542_v24 = vrot.slane %v2538_v22, 2  ;;  %v2390_v42 = vld [vmem:[#allocation10 + $0x2e0] sm:$0xff]  ;;  %v2389_v46 = vld [vmem:[#allocation10 + $0x2d8] sm:$0xff]  ;;  %v2407_v47 = vld [vmem:[#allocation10 + $0x368] sm:$0xff] }
 0x882   : > { %2511 = vrot.lane.b32.xlu0 %v2508_v7, %s4220_s19  ;;  %v2577_v20 = vsel %vm685_vm9, %v2575_v62, %v2576_v18  ;;  %v2374_v43 = vld [vmem:[#allocation10 + $0x260] sm:$0xff]  ;;  %v2373_v48 = vld [vmem:[#allocation10 + $0x258] sm:$0xff]  ;;  %v2388_v50 = vld [vmem:[#allocation10 + $0x2d0] sm:$0xff] }
 0x883   : > { %v4770_v25 = vsel %vm685_vm9, %v2541_v23, %v2542_v24  ;;  %v2422_v49 = vld [vmem:[#allocation10 + $0x3e0] sm:$0xff]  ;;  %v2372_v54 = vld [vmem:[#allocation10 + $0x250] sm:$0xff]  ;;  %v2421_v57 = vld [vmem:[#allocation10 + $0x3d8] sm:$0xff]  ;;  %vm3051_vm9 = vcmask 56320  }
 0x884   : > { %2509 = vrot.lane.b32.xlu1 %v2505_v53, %s4220_s19  ;;  %v2406_v51 = vld [vmem:[#allocation10 + $0x360] sm:$0xff]  ;;  %v2387_v52 = vld [vmem:[#allocation10 + $0x2c8] sm:$0xff]  ;;  %v2405_v59 = vld [vmem:[#allocation10 + $0x358] sm:$0xff] }
 0x885   : > { %v2371_v60 = vld [vmem:[#allocation10 + $0x248] sm:$0xff]  ;;  %v2420_v61 = vld [vmem:[#allocation10 + $0x3d0] sm:$0xff]  ;;  %v2386_v63 = vld [vmem:[#allocation10 + $0x2c0] sm:$0xff] }
 0x886   : > { %2562 = vrot.lane.b32.xlu0 %v2559_v14, %s4220_s19  ;;  %v2404_v1 = vld [vmem:[#allocation10 + $0x350] sm:$0xff]  ;;  %v2370_v2 = vld [vmem:[#allocation10 + $0x240] sm:$0xff]  ;;  %v2419_v5 = vld [vmem:[#allocation10 + $0x3c8] sm:$0xff] }
 0x887   : > { %v2385_v6 = vld [vmem:[#allocation10 + $0x2b8] sm:$0xff]  ;;  %v2403_v53 = vld [vmem:[#allocation10 + $0x348] sm:$0xff]  ;;  %v2418_v9 = vld [vmem:[#allocation10 + $0x3c0] sm:$0xff] }
 0x888   : > { %2560 = vrot.lane.b32.xlu1 %v2556_v16, %s4220_s19  ;;  %v2369_v8 = vld [vmem:[#allocation10 + $0x238] sm:$0xff]  ;;  %v2384_v10 = vld [vmem:[#allocation10 + $0x2b0] sm:$0xff]  ;;  %v2402_v11 = vld [vmem:[#allocation10 + $0x340] sm:$0xff] }
 0x889   : > { %v2368_v14 = vld [vmem:[#allocation10 + $0x230] sm:$0xff]  ;;  %v2417_v15 = vld [vmem:[#allocation10 + $0x3b8] sm:$0xff]  ;;  %v2383_v17 = vld [vmem:[#allocation10 + $0x2a8] sm:$0xff] }
 0x88a   : > { %2583 = vrot.lane.b32.xlu0 %v2580_v19, %s4225_s30  ;;  %v2401_v62 = vld [vmem:[#allocation10 + $0x338] sm:$0xff]  ;;  %v2367_v18 = vld [vmem:[#allocation10 + $0x228] sm:$0xff]  ;;  %v2416_v19 = vld [vmem:[#allocation10 + $0x3b0] sm:$0xff] }
 0x88b   : > { %v2400_v21 = vld [vmem:[#allocation10 + $0x330] sm:$0xff]  ;;  %v2366_v22 = vld [vmem:[#allocation10 + $0x220] sm:$0xff]  ;;  %v2415_v23 = vld [vmem:[#allocation10 + $0x3a8] sm:$0xff] }
 0x88c   : > { %2581 = vrot.lane.b32.xlu1 %v2577_v20, %s4225_s30  ;;  %v2382_v20 = vld [vmem:[#allocation10 + $0x2a0] sm:$0xff]  ;;  %v2381_v24 = vld [vmem:[#allocation10 + $0x298] sm:$0xff]  ;;  %s490_s30 = sand.u32 1, %s4192_s26  }
 0x88d   : > { %s3256_s23 = sshll.u32 %s490_s30, 2  ;;  %s3131_s16 = scalar_lea.sflag [#allocation6], %s490_s30 }
 0x88e   : > { %s492_s21 = scalar_lea.vmem [#allocation12], %s3256_s23 }
 0x88f   : > { %s3144_s24 = sshll.u32 %s492_s21, 4  ;;  %s4882_s24 = int_to_ptr.vmem [resolvable:$true] %s3144_s24 }
 0x890   : > { %s4128_s17 = scalar_lea.vmem %s4882_s24, 64 }
 0x891   : > { %p4129_p9 = scmp.ne.s32.totalorder %s4882_s24, %s4128_s17 }
 0x893   : > { %p4130_p12 = pnand %p4129_p9, %p4335_p5 }
 0x895   : > { %p4131_p13 = pneg %p4130_p12 }
 0x8e8   : > { %v2470_v35 = vpop.permute.xlu0 %2469 }
 0x8ea   : > { %v2468_v27 = vpop.permute.xlu1 %2467 }
 0x8eb   : > { %v2471_v28 = vsel %vm1132_vm14, %v2468_v27, %v2470_v35  ;;  %v2399_v35 = vld [vmem:[#allocation10 + $0x328] sm:$0xff]  ;;  %v2365_v27 = vld [vmem:[#allocation10 + $0x218] sm:$0xff] }
 0x8ec   : > { %2473 = vst [vmem:[#allocation3 + $0x8] sm:$0xff] %v2471_v28  ;;  %2667 = vmatprep.mubr.f32.mxu1 %v2471_v28  ;;  %v2481_v32 = vpop.permute.xlu0 %2480  ;;  %v2414_v28 = vld [vmem:[#allocation10 + $0x3a0] sm:$0xff] }
 0x8ed   : > { %2668 = vmatmul.mubr.f32.vlgmr.msra.gmra.mxu1 %v4743_v38  ;;  %v2423_v38 = vld [vmem:[#allocation10 + $0x3e8] sm:$0xff] }
 0x8ee   : > { %v2479_v33 = vpop.permute.xlu1 %2478  ;;  %3656 = vmatpush3.msra.mxu1 %v2377_v29  ;;  %v2380_v29 = vld [vmem:[#allocation10 + $0x290] sm:$0xff] }
 0x8ef   : > { %v2483_v37 = vsel %vm2482_vm12, %v2479_v33, %v2481_v32  ;;  %3657 = vmatprep.subr.mxu1 %v2392_v30  ;;  %v2398_v30 = vld [vmem:[#allocation10 + $0x320] sm:$0xff]  ;;  %v2413_v32 = vld [vmem:[#allocation10 + $0x398] sm:$0xff]  ;;  %v2379_v33 = vld [vmem:[#allocation10 + $0x288] sm:$0xff] }
 0x8f0   : > { %2485 = vst [vmem:[#allocation3 + $0x10] sm:$0xff] %v2483_v37  ;;  %3658 = vmatpush3.msra.mxu1 %v2376_v31  ;;  %2738 = vmatmul.mubr.f32.vlgmr.msra.gmra.mxu0 %v2483_v37  ;;  %v2533_v44 = vpop.permute.xlu0 %2532  ;;  %v2364_v31 = vld [vmem:[#allocation10 + $0x210] sm:$0xff] }
 0x8f1   : > { %3659 = vmatprep.subr.mxu1 %v2391_v34  ;;  %3691 = vmatpush3.msra.mxu0 %v2409_v36  ;;  %v2397_v34 = vld [vmem:[#allocation10 + $0x318] sm:$0xff]  ;;  %v2363_v36 = vld [vmem:[#allocation10 + $0x208] sm:$0xff]  ;;  %v2412_v37 = vld [vmem:[#allocation10 + $0x390] sm:$0xff] }
 0x8f2   : > { %v2531_v45 = vpop.permute.xlu1 %2530  ;;  %3660 = vmatpush3.msra.mxu1 %v2375_v39  ;;  %3692 = vmatprep.subr.mxu0 %v2424_v40  ;;  %v2378_v39 = vld [vmem:[#allocation10 + $0x280] sm:$0xff]  ;;  %v2396_v40 = vld [vmem:[#allocation10 + $0x310] sm:$0xff] }
 0x8f3   : > { %v2534_v26 = vsel %vm2482_vm12, %v2531_v45, %v2533_v44  ;;  %3693 = vmatpush3.msra.mxu0 %v2408_v41  ;;  %3661 = vmatprep.subr.mxu1 %v2390_v42  ;;  %v2362_v41 = vld [vmem:[#allocation10 + $0x200] sm:$0xff]  ;;  %v2411_v42 = vld [vmem:[#allocation10 + $0x388] sm:$0xff]  ;;  %v2441_v44 = vld [vmem:[#allocation10 + $0x478] sm:$0xff] }
 0x8f4   : > { %3662 = vmatpush3.msra.mxu1 %v2374_v43  ;;  %3694 = vmatprep.subr.mxu0 %v2423_v38  ;;  %v2512_v55 = vpop.permute.xlu0 %2511  ;;  %v2395_v43 = vld [vmem:[#allocation10 + $0x308] sm:$0xff]  ;;  %v2410_v38 = vld [vmem:[#allocation10 + $0x380] sm:$0xff] }
 0x8f5   : > { %3663 = vmatprep.subr.mxu1 %v2389_v46  ;;  %2807 = vmatprep.mubr.f32.mxu1 %v2534_v26  ;;  %v2394_v45 = vld [vmem:[#allocation10 + $0x300] sm:$0xff]  ;;  %v2440_v46 = vld [vmem:[#allocation10 + $0x470] sm:$0xff]  ;;  %v2439_v26 = vld [vmem:[#allocation10 + $0x468] sm:$0xff] }
 0x8f6   : > { %v2510_v56 = vpop.permute.xlu1 %2509  ;;  %3695 = vmatpush3.msra.mxu0 %v2407_v47  ;;  %3664 = vmatpush3.msra.mxu1 %v2373_v48  ;;  %v2438_v47 = vld [vmem:[#allocation10 + $0x460] sm:$0xff]  ;;  %v2437_v48 = vld [vmem:[#allocation10 + $0x458] sm:$0xff] }
 0x8f7   : > { %v4777_v58 = vsel %vm1132_vm14, %v2510_v56, %v2512_v55  ;;  %3696 = vmatprep.subr.mxu0 %v2422_v49  ;;  %3665 = vmatprep.subr.mxu1 %v2388_v50  ;;  %v2435_v49 = vld [vmem:[#allocation10 + $0x448] sm:$0xff]  ;;  %v2434_v50 = vld [vmem:[#allocation10 + $0x440] sm:$0xff] }
 0x8f8   : > { %2515 = vst [vmem:[#allocation3 + $0x20] sm:$0xff] %v4777_v58  ;;  %3697 = vmatpush3.msra.mxu0 %v2406_v51  ;;  %3666 = vmatpush3.msra.mxu1 %v2372_v54  ;;  %v2563_v3 = vpop.permute.xlu0 %2562  ;;  %v2433_v51 = vld [vmem:[#allocation10 + $0x438] sm:$0xff]  ;;  %v2432_v54 = vld [vmem:[#allocation10 + $0x430] sm:$0xff]  ;;  %v2431_v55 = vld [vmem:[#allocation10 + $0x428] sm:$0xff] }
 0x8f9   : > { %3698 = vmatprep.subr.mxu0 %v2421_v57  ;;  %3667 = vmatprep.subr.mxu1 %v2387_v52  ;;  %v2430_v56 = vld [vmem:[#allocation10 + $0x420] sm:$0xff]  ;;  %v2429_v57 = vld [vmem:[#allocation10 + $0x418] sm:$0xff]  ;;  %v2428_v52 = vld [vmem:[#allocation10 + $0x410] sm:$0xff] }
 0x8fa   : > { %v2561_v4 = vpop.permute.xlu1 %2560  ;;  %3699 = vmatpush3.msra.mxu0 %v2405_v59  ;;  %3668 = vmatpush3.msra.mxu1 %v2371_v60  ;;  %v2426_v59 = vld [vmem:[#allocation10 + $0x400] sm:$0xff]  ;;  %v2967_v60 = vld [vmem:[%s4932_s11 + $0x68] sm:$0xff] }
 0x8fb   : > { %v2564_v7 = vsel %vm1132_vm14, %v2561_v4, %v2563_v3  ;;  %3700 = vmatprep.subr.mxu0 %v2420_v61  ;;  %3669 = vmatprep.subr.mxu1 %v2386_v63  ;;  %v2966_v61 = vld [vmem:[%s4932_s11 + $0x60] sm:$0xff]  ;;  %v2965_v63 = vld [vmem:[%s4932_s11 + $0x58] sm:$0xff] }
 0x8fc   : > { %3701 = vmatpush3.msra.mxu0 %v2404_v1  ;;  %3670 = vmatpush3.msra.mxu1 %v2370_v2  ;;  %v2584_v12 = vpop.permute.xlu0 %2583  ;;  %v2964_v1 = vld [vmem:[%s4932_s11 + $0x50] sm:$0xff]  ;;  %v2963_v2 = vld [vmem:[%s4932_s11 + $0x48] sm:$0xff]  ;;  %v2962_v3 = vld [vmem:[%s4932_s11 + $0x40] sm:$0xff] }
 0x8fd   : > { %3702 = vmatprep.subr.mxu0 %v2419_v5  ;;  %3671 = vmatprep.subr.mxu1 %v2385_v6  ;;  %v2961_v4 = vld [vmem:[%s4932_s11 + $0x38] sm:$0xff]  ;;  %v2960_v5 = vld [vmem:[%s4932_s11 + $0x30] sm:$0xff]  ;;  %v2959_v6 = vld [vmem:[%s4932_s11 + $0x28] sm:$0xff] }
 0x8fe   : > { %v2582_v13 = vpop.permute.xlu1 %2581  ;;  %3703 = vmatpush3.msra.mxu0 %v2403_v53  ;;  %2877 = vmatprep.mubr.f32.mxu0 %v2564_v7  ;;  %v2958_v7 = vld [vmem:[%s4932_s11 + $0x20] sm:$0xff]  ;;  %v2957_v53 = vld [vmem:[%s4932_s11 + $0x18] sm:$0xff] }
 0x8ff   : > { %v4782_v16 = vsel %vm2482_vm12, %v2582_v13, %v2584_v12  ;;  %3672 = vmatpush3.msra.mxu1 %v2369_v8  ;;  %3704 = vmatprep.subr.mxu0 %v2418_v9  ;;  %v2956_v8 = vld [vmem:[%s4932_s11 + $0x10] sm:$0xff]  ;;  %v2955_v9 = vld [vmem:[%s4932_s11 + $0x8] sm:$0xff] }
 0x900   : > { %3673 = vmatprep.subr.mxu1 %v2384_v10  ;;  %3705 = vmatpush3.msra.mxu0 %v2402_v11 }
 0x901   : > { %3674 = vmatpush3.msra.mxu1 %v2368_v14  ;;  %3706 = vmatprep.subr.mxu0 %v2417_v15  ;;  %v3269_v15 = vld [vmem:[%s4931_s10] ss:$0 sm:$0xff] }
 0x902   : > { %3675 = vmatprep.subr.mxu1 %v2383_v17  ;;  %3707 = vmatpush3.msra.mxu0 %v2401_v62 }
 0x903   : > { %3676 = vmatpush3.msra.mxu1 %v2367_v18  ;;  %3708 = vmatprep.subr.mxu0 %v2416_v19 }
 0x904   : > { %3677 = vmatprep.subr.mxu1 %v2382_v20  ;;  %3709 = vmatpush3.msra.mxu0 %v2400_v21 }
 0x905   : > { %3678 = vmatpush3.msra.mxu1 %v2366_v22  ;;  %3710 = vmatprep.subr.mxu0 %v2415_v23 }
 0x906   : > { %3679 = vmatprep.subr.mxu1 %v2381_v24  ;;  %3711 = vmatpush3.msra.mxu0 %v2399_v35 }
 0x907   : > { %3680 = vmatpush3.msra.mxu1 %v2365_v27  ;;  %3712 = vmatprep.subr.mxu0 %v2414_v28 }
 0x908   : > { %3681 = vmatprep.subr.mxu1 %v2380_v29  ;;  %3713 = vmatpush3.msra.mxu0 %v2398_v30 }
 0x909   : > { %3682 = vmatpush3.msra.mxu1 %v2364_v31  ;;  %3714 = vmatprep.subr.mxu0 %v2413_v32 }
 0x90a   : > { %3683 = vmatprep.subr.mxu1 %v2379_v33  ;;  %3715 = vmatpush3.msra.mxu0 %v2397_v34 }
 0x90b   : > { %3684 = vmatpush3.msra.mxu1 %v2363_v36  ;;  %3716 = vmatprep.subr.mxu0 %v2412_v37 }
 0x90c   : > { %3685 = vmatprep.subr.mxu1 %v2378_v39  ;;  %3717 = vmatpush3.msra.mxu0 %v2396_v40  ;;  %v2968_v39 = vld [vmem:[%s4933_s12] sm:$0xf] }
 0x90d   : > { %3686 = vmatpush3.msra.mxu1 %v2362_v41  ;;  %3718 = vmatprep.subr.mxu0 %v2411_v42 }
 0x90e   : > { %2808 = vmatmul.mubr.f32.vlgmr.msra.gmra.mxu1 %v4777_v58  ;;  %3719 = vmatpush3.msra.mxu0 %v2395_v43  ;;  %v2427_v58 = vld [vmem:[#allocation10 + $0x408] sm:$0xff] }
 0x90f   : > { %3853 = vmatprep.subr.mxu1 %v4208_v0  ;;  %3720 = vmatprep.subr.mxu0 %v2410_v38 }
 0x910   : > { %3854 = vmatpush3.msra.mxu1 %v2441_v44  ;;  %3721 = vmatpush3.msra.mxu0 %v2394_v45 }
 0x911   : > { %3855 = vmatprep.subr.mxu1 %v4208_v0  ;;  %2878 = vmatmul.mubr.f32.vlgmr.msra.gmra.mxu0 %v4770_v25  ;;  %v2436_v25 = vld [vmem:[#allocation10 + $0x450] sm:$0xff] }
 0x912   : > { %3856 = vmatpush3.msra.mxu1 %v2440_v46  ;;  %3885 = vmatprep.mubr.msk.f32.mxu1 %vm4221_vm15, %v4208_v0 }
 0x913   : > { %3857 = vmatprep.subr.mxu1 %v4208_v0  ;;  %3888 = vmatprep.subr.mxu0 %v4208_v0 }
 0x914   : > { %3858 = vmatpush3.msra.mxu1 %v2439_v26  ;;  %3916 = vmatprep.mubr.msk.f32.mxu0 %vm4221_vm15, %v4208_v0 }
 0x915   : > { %3859 = vmatprep.subr.mxu1 %v4208_v0  ;;  %3889 = vmatpush3.msra.mxu0 %v2967_v60 }
 0x916   : > { %3860 = vmatpush3.msra.mxu1 %v2438_v47  ;;  %3890 = vmatprep.subr.mxu0 %v4208_v0 }
 0x917   : > { %3861 = vmatprep.subr.mxu1 %v4208_v0  ;;  %3891 = vmatpush3.msra.mxu0 %v2966_v61 }
 0x918   : > { %3862 = vmatpush3.msra.mxu1 %v2437_v48  ;;  %3892 = vmatprep.subr.mxu0 %v4208_v0 }
 0x919   : > { %3863 = vmatprep.subr.mxu1 %v4208_v0  ;;  %3893 = vmatpush3.msra.mxu0 %v2965_v63 }
 0x91a   : > { %3864 = vmatpush3.msra.mxu1 %v2436_v25  ;;  %3894 = vmatprep.subr.mxu0 %v4208_v0 }
 0x91b   : > { %3865 = vmatprep.subr.mxu1 %v4208_v0  ;;  %3895 = vmatpush3.msra.mxu0 %v2964_v1 }
 0x91c   : > { %3866 = vmatpush3.msra.mxu1 %v2435_v49  ;;  %3896 = vmatprep.subr.mxu0 %v4208_v0 }
 0x91d   : > { %3867 = vmatprep.subr.mxu1 %v4208_v0  ;;  %3897 = vmatpush3.msra.mxu0 %v2963_v2 }
 0x91e   : > { %3868 = vmatpush3.msra.mxu1 %v2434_v50  ;;  %3898 = vmatprep.subr.mxu0 %v4208_v0 }
 0x91f   : > { %3869 = vmatprep.subr.mxu1 %v4208_v0  ;;  %3899 = vmatpush3.msra.mxu0 %v2962_v3 }
 0x920   : > { %3870 = vmatpush3.msra.mxu1 %v2433_v51  ;;  %3900 = vmatprep.subr.mxu0 %v4208_v0 }
 0x921   : > { %3871 = vmatprep.subr.mxu1 %v4208_v0  ;;  %3901 = vmatpush3.msra.mxu0 %v2961_v4 }
 0x922   : > { %3872 = vmatpush3.msra.mxu1 %v2432_v54  ;;  %3902 = vmatprep.subr.mxu0 %v4208_v0 }
 0x923   : > { %3873 = vmatprep.subr.mxu1 %v4208_v0  ;;  %3903 = vmatpush3.msra.mxu0 %v2960_v5 }
 0x924   : > { %3874 = vmatpush3.msra.mxu1 %v2431_v55  ;;  %3904 = vmatprep.subr.mxu0 %v4208_v0 }
 0x925   : > { %3875 = vmatprep.subr.mxu1 %v4208_v0  ;;  %3905 = vmatpush3.msra.mxu0 %v2959_v6 }
 0x926   : > { %3876 = vmatpush3.msra.mxu1 %v2430_v56  ;;  %3906 = vmatprep.subr.mxu0 %v4208_v0 }
 0x927   : > { %3877 = vmatprep.subr.mxu1 %v4208_v0  ;;  %3907 = vmatpush3.msra.mxu0 %v2958_v7 }
 0x928   : > { %3878 = vmatpush3.msra.mxu1 %v2429_v57  ;;  %3908 = vmatprep.subr.mxu0 %v4208_v0 }
 0x929   : > { %3879 = vmatprep.subr.mxu1 %v4208_v0  ;;  %3909 = vmatpush3.msra.mxu0 %v2957_v53 }
 0x92a   : > { %3880 = vmatpush3.msra.mxu1 %v2428_v52  ;;  %3910 = vmatprep.subr.mxu0 %v4208_v0 }
 0x92b   : > { %3881 = vmatprep.subr.mxu1 %v4208_v0  ;;  %3911 = vmatpush3.msra.mxu0 %v2956_v8 }
 0x92c   : > { %3882 = vmatpush3.msra.mxu1 %v2427_v58  ;;  %3912 = vmatprep.subr.mxu0 %v4208_v0 }
 0x92d   : > { %3883 = vmatprep.subr.mxu1 %v4208_v0  ;;  %3913 = vmatpush3.msra.mxu0 %v2955_v9 }
 0x92e   : > { %3884 = vmatpush3.msra.mxu1 %v2426_v59  ;;  %3914 = vmatprep.subr.mxu0 %v4208_v0 }
 0x92f   : > { %3886 = vmatmul.mubr.f32.vlgmr.msra.gmra.mxu1 %v4782_v16  ;;  %3919 = vmatprep.subr.mxu1 %v4208_v0 }
 0x930   : > { %3921 = vmatprep.mubr.msk.f32.mxu1 %vm4221_vm15, %v4208_v0  ;;  %v2954_v0 = vld [vmem:[%s4932_s11] sm:$0xff] }
 0x931   : > { %3915 = vmatpush3.msra.mxu0 %v2954_v0 }
 0x9ad   : > { %v3617_v10 = vpop.f32.mrf.mxu1 }
 0x9af   : > { %v3618_v11 = vpop.f32.mrf.mxu1 }
 0x9b0   : > { %v3652_v12 = vpop.f32.mrf.mxu0  ;;  %v3619_v14 = vadd.f32 %v3618_v11, %v3617_v10 }
 0x9b2   : > { %v3653_v16 = vpop.f32.mrf.mxu0  ;;  %v2670_v18 = vadd.f32 %v3619_v14, %v3269_v15 }
 0x9b3   : > { %v3654_v19 = vadd.f32 %v3653_v16, %v3652_v12 }
 0x9b5   : > { %v2740_v22 = vadd.f32 %v3654_v19, %v2670_v18 }
 0x9ce   : > { %v3687_v13 = vpop.f32.mrf.mxu1 }
 0x9d0   : > { %v3688_v17 = vpop.f32.mrf.mxu1 }
 0x9d1   : > { %v3722_v62 = vpop.f32.mrf.mxu0  ;;  %v3689_v20 = vadd.f32 %v3688_v17, %v3687_v13 }
 0x9d3   : > { %v3723_v21 = vpop.f32.mrf.mxu0  ;;  %v2810_v23 = vadd.f32 %v3689_v20, %v2740_v22 }
 0x9d4   : > { %v3724_v24 = vadd.f32 %v3723_v21, %v3722_v62 }
 0x9d6   : > { %v2880_v35 = vadd.f32 %v3724_v24, %v2810_v23 }
 0x9ef   : > { %v2949_v27 = vpop.f32.mrf.mxu1 }
 0x9f0   : > { %v2950_v28 = vadd.f32 %v2949_v27, %v2880_v35 }
 0x9f1   : > { %v3887_v29 = vpop.f32.mrf.mxu1 }
 0x9f2   : > { %v2953_v30 = vmax.f32 %v2950_v28, 0.0 }
 0x9f4   : > { %2970 = vrot.lane.b32.xlu1 %v2953_v30, %s4220_s19  ;;  %s3274_s19 = sshll.u32 %s4318_s29, 6  ;;  %s4226_s29 = smov [#allocation12]  }
 0x9f5   : > { %s4880_s27 = scalar_lea.hbm %s4934_s13, %s3274_s19  ;;  %s4132_s14 = sshll.u32 %s4226_s29, 4  ;;  %s4133_s14 = int_to_ptr.vmem [resolvable:$false] %s4132_s14 }
 0x9f6   : > { %s4134_s20 = scalar_lea.vmem %s4133_s14, 128  ;;  %p4135_p4 = scmp.lt.s32.totalorder %s4882_s24, %s4133_s14 }
 0x9f7   : > { %p4136_p7 = scmp.lt.s32.totalorder %s4134_s20, %s4128_s17 }
 0x9f9   : > { %p4137_p8 = por %p4136_p7, %p4135_p4 }
 0x9fb   : > { %p4138_p11 = pnand %p4137_p8, %p4131_p13 }
 0xa66   : > { %v2971_v31 = vpop.permute.xlu1 %2970 }
 0xa67   : > { %v2973_v32 = vmax.f32 %v2953_v30, %v2971_v31 }
 0xa69   : > { %3917 = vmatmul.mubr.msk.f32.vlgmr.msra.gmra.mxu0 %vm1132_vm14, %v2973_v32 }
 0xb29   : > { %v3043_v33 = vpop.f32.mrf.mxu0 }
 0xb2a   : > { %v3048_v34 = vrot.slane %v3043_v33, 1 }
 0xb2b   : > { %v3918_v36 = vpop.f32.mrf.mxu0 }
 0xb2c   : > { %v3050_v37 = vmax.f32 %v3043_v33, %v3048_v34 }
 0xb2e   : > { %3920 = vmatpush3.msk.msra.mxu1 %vm621_vm8, %v3050_v37 }
 0xb2f   : > { %3922 = vmatmul.mubr.msk.f32.vlgmr.msra.gmra.mxu1 %vm3051_vm9, %v2968_v39 }
 0xbef   : > { %v3124_v40 = vpop.f32.mrf.mxu1 }
 0xbf0   : > { %3129 = vst.msk [vmem:[%s492_s21] sm:$0xf] %vm3128_vm13, %v3124_v40 }
 0xbf1   : > { %v3923_v41 = vpop.f32.mrf.mxu1 }
 0xbf2   : > { %4141 = shalt.err (!%p4138_p11)
}
 0xbf3   : > { %s4142_s23 = scalar_lea.hbm %s4880_s27, 64  ;;  %s4146_s21 = scalar_lea.hbm %s4934_s13, 128 }
 0xbf4   : > { %p4143_p0 = scmp.ne.s32.totalorder %s4880_s27, %s4142_s23  ;;  %p4147_p3 = scmp.lt.s32.totalorder %s4880_s27, %s4934_s13 }
 0xbf5   : > { %p4148_p10 = scmp.lt.s32.totalorder %s4146_s21, %s4142_s23 }
 0xbf6   : > { %p4144_p2 = pnand %p4143_p0, %p4335_p5 }
 0xbf7   : > { %p4149_p9 = por %p4148_p10, %p4147_p3 }
 0xbf8   : > { %p4145_p1 = pneg %p4144_p2 }
 0xbfa   : > { %p4150_p12 = pnand %p4149_p9, %p4145_p1 }
 0xbfc   : > { %4153 = shalt.err (!%p4150_p12)
}
 0xbfd   : > { %3940 = dma.vmem_to_hbm [thread:$0]  (%p4335_p5), %s4882_s24, 64, %s4880_s27, %s3131_s16  }
 0xbfe PF: > { %p3967_p13 = scmp.ge.s32.totalorder %s4200_s28, 2  ;;  %s3156_s29 = sand.u32 1, %s4188_s25  }
 0xbff   : > { %s3157_s14 = scalar_lea.sflag [#allocation6], %s3156_s29 }
 0xc00   : > { %p3956_p4 = pnand %p3967_p13, %p4339_p6 }
 0xc02   : > { %p3957_p7 = pneg %p3956_p4 }
 0xc04   : > { %4183 = dma.done.wait (%p3957_p7), %s3157_s14, 64  }
 0xc05   : > { %4185 = vsyncadd (%p3957_p7), %s3157_s14, 4294967232  ;;  %s4948_s28 = sld [smem:[#allocation18_spill]]  ;;  %s4951_s25 = smov %s4192_s26 }
 0xc06   : > { %s4949_s20 = sld [smem:[#allocation17_spill]] }
 0xc07   : > { %s4950_s27 = sld [smem:[#allocation19_spill]] }
 0xc0b   : > { %p26_p8 = scmp.ge.s32.totalorder %s4948_s28, 4  }
 0xc0c   : > { %s4952_s26 = smov %s4949_s20 }
 0xc0d   :  { %28 = sbr.rel (!%p26_p8) target bundleno = 6 (0x6), region = 124 }
 0xc12   :  { %3162 = vsyncpa [#allocation5], 1 }
 0xc13   :  { %3164 = vsyncpa [#allocation5 + $0x1], 1 }
 0xc14   :  { %3165 = vsyncpa [#allocation8], 1 }
 0xc15   :  { %3166 = vsyncpa [#allocation11], 1 }
 0xc16   :  { %3167 = vsyncpa [#allocation6], 1 }
 0xc17   :  { %3169 = vsyncpa [#allocation6 + $0x1], 1 }

</bundles_post_ra>
